<compile_context>
chip_gen: v5e
topology: v5e:2x2
jax: 0.10.0
libtpu: 0.0.40
codegen_flags: <defaults>
</compile_context>

<pallas_src>
import jax
import jax.numpy as jnp
from jax import lax
from jax.experimental import pallas as pl
from jax.experimental.pallas import tpu as pltpu

PACK = 64          # batch rows packed per lane-dense row (64 * 4 feats = 256 lanes in,
                   #                                       64 * 2 outs  = 128 lanes out)
_ROW_QUANTUM = 8 * PACK   # 512: batch-tile quantum so packed blocks obey the (8,128) rule
_SUB_ROWS = 64            # packed rows per inner step -> 64*4096*4B = 1 MiB live hidden


def _round_up(n, m):
    return ((n + m - 1) // m) * m


def _make_kernel(num_sub, r_sub):
    def kernel(xp_ref, w0p_ref, b0p_ref, w13p_ref, b13p_ref, op_ref):
        def compute(xs):
            # Layer 0 (+bias, ReLU) on packed rows: (r_sub, 256) @ (256, 4096).
            h = jnp.dot(xs, w0p_ref[...], preferred_element_type=jnp.float32)
            h = jnp.maximum(h + b0p_ref[...], 0.0)
            # Folded fc1.fc3 on packed rows: (r_sub, 4096) @ (4096, 128).
            o = jnp.dot(h, w13p_ref[...], preferred_element_type=jnp.float32)
            return o + b13p_ref[...]

        if num_sub == 1:
            op_ref[...] = compute(xp_ref[...]).astype(op_ref.dtype)
        else:
            def body(s, carry):
                row0 = pl.multiple_of(s * r_sub, 8)
                xs = xp_ref[pl.ds(row0, r_sub), :]
                op_ref[pl.ds(row0, r_sub), :] = compute(xs).astype(op_ref.dtype)
                return carry
            lax.fori_loop(0, num_sub, body, 0)

    return kernel


def my_adder_net(x, params, tile_b=65536, use_pallas=None):
    """x: (B, 4) float32. Returns (B, 2) float32."""
    w0, b0, w1, b1, w3, b3 = params
    B = x.shape[0]

    if use_pallas is None:
        use_pallas = B >= 1024
    if not use_pallas:
        # Small-batch fast path: fixed kernel-launch/prologue cost dominates there.
        h = jnp.maximum(x @ w0 + b0, 0.0)
        return (h @ w1 + b1) @ w3 + b3

    # --- wrapper-side weight prep (tiny, done once per call) -----------------------
    # Fold fc1 . fc3 (no nonlinearity between them).
    w13 = jnp.dot(w1, w3, preferred_element_type=jnp.float32)          # (64, 2)
    b13 = jnp.dot(b1, w3, preferred_element_type=jnp.float32) + b3     # (1, 2)
    eye = jnp.eye(PACK, dtype=jnp.float32)
    w0p = jnp.kron(eye, w0)                 # (256, 4096) block-diagonal
    b0p = jnp.tile(b0, (1, PACK))           # (1, 4096)
    w13p = jnp.kron(eye, w13)               # (4096, 128) block-diagonal
    b13p = jnp.tile(b13, (1, PACK))         # (1, 128)

    # --- batch tiling ---------------------------------------------------------------
    b_ceil = _round_up(B, _ROW_QUANTUM)
    tile = min(_round_up(tile_b, _ROW_QUANTUM), b_ceil)
    # Keep >= 2 grid steps whenever the batch allows it, so the parallel batch axis
    # can be sharded across v7x's two TensorCores (neutral on v5e/v6e).
    if b_ceil // tile < 2 and b_ceil >= 2 * _ROW_QUANTUM:
        tile = _round_up(b_ceil // 2, _ROW_QUANTUM)
    b_pad = _round_up(B, tile)
    grid = (b_pad // tile,)

    r_rows = tile // PACK                    # packed rows per grid step (multiple of 8)
    r_sub = min(_SUB_ROWS, r_rows)
    while r_rows % r_sub:                    # both are multiples of 8 -> terminates
        r_sub -= 8
    num_sub = r_rows // r_sub

    # Free contiguous reinterpretation: (b_pad, 4) f32 -> (b_pad/64, 256).
    xp = x
    if b_pad != B:
        xp = jnp.pad(xp, ((0, b_pad - B), (0, 0)))
    xp = xp.reshape(b_pad // PACK, 4 * PACK)

    const = lambda i: (0, 0)  # weights/biases: same block every step -> stay resident
    out_p = pl.pallas_call(
        _make_kernel(num_sub, r_sub),
        out_shape=jax.ShapeDtypeStruct((b_pad // PACK, 2 * PACK), jnp.float32),
        grid=grid,
        in_specs=[
            pl.BlockSpec((r_rows, 4 * PACK), lambda i: (i, 0)),  # packed x (pipelined)
            pl.BlockSpec(w0p.shape, const),                      # W0p  (4 MiB, resident)
            pl.BlockSpec(b0p.shape, const),                      # b0p
            pl.BlockSpec(w13p.shape, const),                     # W13p (2 MiB, resident)
            pl.BlockSpec(b13p.shape, const),                     # b13p
        ],
        out_specs=pl.BlockSpec((r_rows, 2 * PACK), lambda i: (i, 0)),
        compiler_params=pltpu.CompilerParams(
            dimension_semantics=("parallel",),
            # ~16 MiB actually used at the default tile (12 MiB double-buffered weights
            # + ~3 MiB streaming x/out + ~1 MiB hidden sub-block); 32 MiB fits every
            # generation (v7x has 64 MiB physical VMEM, v5e's default scope is 16 MiB).
            vmem_limit_bytes=32 * 1024 * 1024,
        ),
    )(xp, w0p, b0p, w13p, b13p)

    # Reshape back to row-per-batch layout BEFORE slicing off padding rows.
    return out_p.reshape(b_pad, 2)[:B]


def init_params(key):
    """Deterministic init mirroring torch.nn.Linear default (U(-1/sqrt(fan_in), ...)).
    Weights stored as (in, out) = PyTorch weight.T."""
    def linear(key, fan_in, fan_out):
        kw, kb = jax.random.split(key)
        bound = 1.0 / jnp.sqrt(fan_in)
        w = jax.random.uniform(kw, (fan_in, fan_out), jnp.float32, -bound, bound)
        b = jax.random.uniform(kb, (1, fan_out), jnp.float32, -bound, bound)
        return w, b

    k0, k1, k3 = jax.random.split(key, 3)
    w0, b0 = linear(k0, 4, 64)    # fc0: Linear(4, 64)
    w1, b1 = linear(k1, 64, 64)   # fc1: Linear(64, 64)
    w3, b3 = linear(k3, 64, 2)    # fc3: Linear(64, 2)
    return (w0, b0, w1, b1, w3, b3)


def reference(x, params):
    # Unfused reference path (matches the PyTorch module op-for-op).
    w0, b0, w1, b1, w3, b3 = params
    h = jnp.maximum(x @ w0 + b0, 0.0)
    h = h @ w1 + b1
    return h @ w3 + b3


if __name__ == "__main__":
    key = jax.random.PRNGKey(0)
    params = init_params(key)

    # 1) Pallas path at a small batch (forces the kernel; exercises tail padding).
    B1 = 192
    x1 = jax.random.uniform(jax.random.PRNGKey(1), (B1, 4), jnp.float32)
    x1 = x1.at[0].set(jnp.array([0.5, 0.1, 0.2, 0.8], jnp.float32))  # torch script input
    out1 = jax.block_until_ready(my_adder_net(x1, params, use_pallas=True))
    ref1 = reference(x1, params)
    assert out1.shape == (B1, 2)
    assert jnp.allclose(out1, ref1, atol=1e-4, rtol=1e-4)

    # 2) Multi-step grid path (several tiles + padding).
    B2 = 1100
    x2 = jax.random.uniform(jax.random.PRNGKey(2), (B2, 4), jnp.float32)
    out2 = jax.block_until_ready(my_adder_net(x2, params, tile_b=512, use_pallas=True))
    ref2 = reference(x2, params)
    assert out2.shape == (B2, 2)
    assert jnp.allclose(out2, ref2, atol=1e-4, rtol=1e-4)

    # 3) Small-batch fast path (plain fused XLA, no pallas_call).
    B3 = 8
    x3 = jax.random.uniform(jax.random.PRNGKey(3), (B3, 4), jnp.float32)
    out3 = jax.block_until_ready(my_adder_net(x3, params))
    ref3 = reference(x3, params)
    assert out3.shape == (B3, 2)
    assert jnp.allclose(out3, ref3, atol=1e-4, rtol=1e-4)

    print("KERNEL_OK")
</pallas_src>

<mosaic_0001>
module attributes {stable_mosaic.version = 11 : i64} {
  func.func @kernel(%arg0: i32, %arg1: memref<8x256xf32, #tpu.memory_space<vmem>>, %arg2: memref<256x4096xf32, #tpu.memory_space<vmem>>, %arg3: memref<1x4096xf32, #tpu.memory_space<vmem>>, %arg4: memref<4096x128xf32, #tpu.memory_space<vmem>>, %arg5: memref<1x128xf32, #tpu.memory_space<vmem>>, %arg6: memref<8x128xf32, #tpu.memory_space<vmem>>) attributes {dimension_semantics = [#tpu.dimension_semantics<parallel>], iteration_bounds = array<i64: 1>, scalar_prefetch = 0 : i64, scratch_operands = 0 : i64, tpu.core_type = #tpu.core_type<tc>, window_params = [{transform_indices = @transform_0, window_bounds = array<i64: 8, 256>}, {pipeline_mode = #tpu.pipeline_mode<synchronous>, transform_indices = @transform_1, window_bounds = array<i64: 256, 4096>}, {pipeline_mode = #tpu.pipeline_mode<synchronous>, transform_indices = @transform_2, window_bounds = array<i64: 1, 4096>}, {pipeline_mode = #tpu.pipeline_mode<synchronous>, transform_indices = @transform_3, window_bounds = array<i64: 4096, 128>}, {pipeline_mode = #tpu.pipeline_mode<synchronous>, transform_indices = @transform_4, window_bounds = array<i64: 1, 128>}, {transform_indices = @transform_5, window_bounds = array<i64: 8, 128>}]} {
    %c0 = arith.constant 0 : index
    %c0_0 = arith.constant 0 : index
    %0 = vector.load %arg1[%c0, %c0_0] : memref<8x256xf32, #tpu.memory_space<vmem>>, vector<8x256xf32>
    %c0_1 = arith.constant 0 : index
    %c0_2 = arith.constant 0 : index
    %1 = vector.load %arg2[%c0_1, %c0_2] : memref<256x4096xf32, #tpu.memory_space<vmem>>, vector<256x4096xf32>
    %cst = arith.constant dense<0.000000e+00> : vector<8x4096xf32>
    %2 = tpu.matmul %0, %1, %cst {dimension_numbers = #tpu.dot_dimension_numbers<[1], [0], [0], [1], [0, 0, 1, 1], [], []>} : vector<8x256xf32>, vector<256x4096xf32>, vector<8x4096xf32> -> vector<8x4096xf32>
    %c0_3 = arith.constant 0 : index
    %c0_4 = arith.constant 0 : index
    %3 = vector.load %arg3[%c0_3, %c0_4] : memref<1x4096xf32, #tpu.memory_space<vmem>>, vector<1x4096xf32>
    %4 = vector.broadcast %3 : vector<1x4096xf32> to vector<8x4096xf32>
    %5 = arith.addf %2, %4 : vector<8x4096xf32>
    %cst_5 = arith.constant 0.000000e+00 : f32
    %6 = vector.broadcast %cst_5 : f32 to vector<8x4096xf32>
    %7 = arith.maximumf %5, %6 : vector<8x4096xf32>
    %c0_6 = arith.constant 0 : index
    %c0_7 = arith.constant 0 : index
    %8 = vector.load %arg4[%c0_6, %c0_7] : memref<4096x128xf32, #tpu.memory_space<vmem>>, vector<4096x128xf32>
    %cst_8 = arith.constant dense<0.000000e+00> : vector<8x128xf32>
    %9 = tpu.matmul %7, %8, %cst_8 {dimension_numbers = #tpu.dot_dimension_numbers<[1], [0], [0], [1], [0, 0, 1, 1], [], []>} : vector<8x4096xf32>, vector<4096x128xf32>, vector<8x128xf32> -> vector<8x128xf32>
    %c0_9 = arith.constant 0 : index
    %c0_10 = arith.constant 0 : index
    %10 = vector.load %arg5[%c0_9, %c0_10] : memref<1x128xf32, #tpu.memory_space<vmem>>, vector<1x128xf32>
    %11 = vector.broadcast %10 : vector<1x128xf32> to vector<8x128xf32>
    %12 = arith.addf %9, %11 : vector<8x128xf32>
    %c0_11 = arith.constant 0 : index
    %c0_12 = arith.constant 0 : index
    %13 = vector.load %arg6[%c0_11, %c0_12] : memref<8x128xf32, #tpu.memory_space<vmem>>, vector<8x128xf32>
    tpu.vector_store %arg6[%c0_11, %c0_12], %12 {strides = array<i32>} : memref<8x128xf32, #tpu.memory_space<vmem>>, vector<8x128xf32>,
    return
  }
  func.func @transform_0(%arg0: i32) -> (i32, i32) {
    %c0_i32 = arith.constant 0 : i32
    %c0_i32_0 = arith.constant 0 : i32
    return %arg0, %c0_i32 : i32, i32
  }
  func.func @transform_1(%arg0: i32) -> (i32, i32) {
    %c0_i32 = arith.constant 0 : i32
    %c0_i32_0 = arith.constant 0 : i32
    %c0_i32_1 = arith.constant 0 : i32
    return %c0_i32, %c0_i32_0 : i32, i32
  }
  func.func @transform_2(%arg0: i32) -> (i32, i32) {
    %c0_i32 = arith.constant 0 : i32
    %c0_i32_0 = arith.constant 0 : i32
    %c0_i32_1 = arith.constant 0 : i32
    return %c0_i32, %c0_i32_0 : i32, i32
  }
  func.func @transform_3(%arg0: i32) -> (i32, i32) {
    %c0_i32 = arith.constant 0 : i32
    %c0_i32_0 = arith.constant 0 : i32
    %c0_i32_1 = arith.constant 0 : i32
    return %c0_i32, %c0_i32_0 : i32, i32
  }
  func.func @transform_4(%arg0: i32) -> (i32, i32) {
    %c0_i32 = arith.constant 0 : i32
    %c0_i32_0 = arith.constant 0 : i32
    %c0_i32_1 = arith.constant 0 : i32
    return %c0_i32, %c0_i32_0 : i32, i32
  }
  func.func @transform_5(%arg0: i32) -> (i32, i32) {
    %c0_i32 = arith.constant 0 : i32
    %c0_i32_0 = arith.constant 0 : i32
    return %arg0, %c0_i32 : i32, i32
  }
}

</mosaic_0001>

<bundles_post_ra>
// kernel: tpu_custom_call.1
= control target key start
LH: loop header
LB: loop body
LE: loop exit
PB: predicated region body
PF: predicated region fallthrough
CT: control target
= control target key end

     0   :  { %10 = vsyncpa [#allocation3], 0  ;;  %s4026_s0 = inlined_call_operand.hbm [shape: f32[8,256], index: 0, kind: input, shape index: {}]   ;;  %s4027_s1 = inlined_call_operand.hbm [shape: f32[256,4096], index: 1, kind: input, shape index: {}]   ;;  %s4028_s2 = inlined_call_operand.hbm [shape: f32[1,4096], index: 2, kind: input, shape index: {}]   ;;  %s4029_s3 = inlined_call_operand.hbm [shape: f32[4096,128], index: 3, kind: input, shape index: {}]   ;;  %s4030_s4 = inlined_call_operand.hbm [shape: f32[1,128], index: 4, kind: input, shape index: {}]   ;;  %s4031_s5 = inlined_call_operand.hbm [shape: f32[8,128], index: 5, kind: output, shape index: {}]  }
   0x1   :  { %11 = vsyncpa [#allocation6], 0 }
   0x2   :  { %12 = vsyncpa [#allocation9], 0  ;;  %s29_s20 = sshll.u32 %s4027_s1, 4  ;;  %s30_s20 = int_to_ptr.hbm [resolvable:$true] %s29_s20 }
   0x3   :  { %13 = vsyncpa [#allocation4], 0  ;;  %s3848_s21 = smov [#allocation5]   ;;  %s53_s25 = sshll.u32 %s4029_s3, 4  ;;  %s54_s25 = int_to_ptr.hbm [resolvable:$true] %s53_s25 }
   0x4   :  { %s31_s22 = sshll.u32 %s3848_s21, 4  ;;  %s3849_s26 = smov 4096   ;;  %s32_s22 = int_to_ptr.vmem [resolvable:$true] %s31_s22 }
   0x5   :  { %s3850_s27 = smov 256   ;;  %s3851_s28 = smov [#allocation8]  }
   0x6   :  { %37 = dma.hbm_to_vmem [thread:$0]  %s30_s20, 131072, %s32_s22, [#allocation6], %s3849_s26, %s3849_s26, %s3850_s27  }
   0x7   :  { %s55_s29 = sshll.u32 %s3851_s28, 4  ;;  %s3852_s30 = smov 128   ;;  %s56_s29 = int_to_ptr.vmem [resolvable:$true] %s55_s29 }
   0x8   :  { %s3853_s6 = smov 8   ;;  %s19_s8 = sshll.u32 %s4026_s0, 4  ;;  %s20_s8 = int_to_ptr.hbm [resolvable:$true] %s19_s8 }
   0x9   :  { %61 = dma.hbm_to_vmem [thread:$0]  %s54_s25, 65536, %s56_s29, [#allocation9], %s3852_s30, %s3852_s30, %s3853_s6  }
   0xa   :  { %s3854_s9 = smov [#allocation2]   ;;  %s43_s12 = sshll.u32 %s4028_s2, 4  ;;  %s44_s12 = int_to_ptr.hbm [resolvable:$true] %s43_s12 }
   0xb   :  { %s21_s10 = sshll.u32 %s3854_s9, 4  ;;  %s3855_s13 = smov [#allocation7]   ;;  %s22_s10 = int_to_ptr.vmem [resolvable:$true] %s21_s10 }
   0xc   :  { %24 = dma.hbm_to_vmem [thread:$0]  %s20_s8, 256, %s22_s10, [#allocation3]  }
   0xd   :  { %s45_s14 = sshll.u32 %s3855_s13, 4  ;;  %s67_s17 = sshll.u32 %s4030_s4, 4  ;;  %s46_s14 = int_to_ptr.vmem [resolvable:$true] %s45_s14  ;;  %s68_s17 = int_to_ptr.hbm [resolvable:$true] %s67_s17 }
   0xe   :  { %48 = dma.hbm_to_vmem [thread:$0]  %s44_s12, 512, %s46_s14, [#allocation6]  }
   0xf   :  { %s3856_s0 = smov [#allocation10]  }
  0x10   :  { %s69_s18 = sshll.u32 %s3856_s0, 4  ;;  %s70_s18 = int_to_ptr.vmem [resolvable:$true] %s69_s18 }
  0x11   :  { %72 = dma.hbm_to_vmem [thread:$0]  %s68_s17, 16, %s70_s18, [#allocation9]  }
  0x12   :  { %3840 = dma.done.wait [#allocation3], 256  }
  0x13   :  { %3841 = vsyncadd [#allocation3], 4294967040 }
  0x14   :  { %3842 = dma.done.wait [#allocation6], 131584  }
  0x15   :  { %3843 = vsyncadd [#allocation6], 4294835712 }
  0x16   :  { %3844 = dma.done.wait [#allocation9], 65552  }
  0x17   :  { %3845 = vsyncadd [#allocation9], 4294901744  ;;  %v575_v0 = vld [vmem:[#allocation5 + $0xf00] sm:$0xff]  ;;  %v576_v2 = vld [vmem:[#allocation5 + $0xf08] sm:$0xff]  ;;  %s3857_s2 = smov [#allocation11]   ;;  %s3667_s21 = sshll.u32 %s4031_s5, 4  ;;  %s3668_s21 = int_to_ptr.hbm [resolvable:$true] %s3667_s21 }
  0x18   :  { %v1087_v1 = vld [vmem:[#allocation5 + $0x1f00] sm:$0xff]  ;;  %1191 = vmatpush.msra.mxu0 %v575_v0  ;;  %v1088_v3 = vld [vmem:[#allocation5 + $0x1f08] sm:$0xff]  ;;  %1231 = vmatpush.msra.mxu2 %v576_v2  ;;  %v577_v0 = vld [vmem:[#allocation5 + $0xf10] sm:$0xff]  ;;  %s3665_s4 = sshll.u32 %s3857_s2, 4  ;;  %s3666_s4 = int_to_ptr.vmem [resolvable:$true] %s3665_s4 }
  0x19   :  { %1211 = vmatpush.msra.mxu1 %v1087_v1  ;;  %v543_v4 = vld [vmem:[#allocation5 + $0xe00] sm:$0xff]  ;;  %1251 = vmatpush.msra.mxu3 %v1088_v3  ;;  %v544_v6 = vld [vmem:[#allocation5 + $0xe08] sm:$0xff]  ;;  %v1089_v1 = vld [vmem:[#allocation5 + $0x1f10] sm:$0xff] }
  0x1a   :  { %v1055_v5 = vld [vmem:[#allocation5 + $0x1e00] sm:$0xff]  ;;  %v1056_v7 = vld [vmem:[#allocation5 + $0x1e08] sm:$0xff]  ;;  %1192 = vmatpush.msra.mxu0 %v543_v4  ;;  %1232 = vmatpush.msra.mxu2 %v544_v6  ;;  %v578_v2 = vld [vmem:[#allocation5 + $0xf18] sm:$0xff] }
  0x1b   :  { %v511_v8 = vld [vmem:[#allocation5 + $0xd00] sm:$0xff]  ;;  %1212 = vmatpush.msra.mxu1 %v1055_v5  ;;  %v512_v10 = vld [vmem:[#allocation5 + $0xd08] sm:$0xff]  ;;  %1252 = vmatpush.msra.mxu3 %v1056_v7  ;;  %v1090_v3 = vld [vmem:[#allocation5 + $0x1f18] sm:$0xff] }
  0x1c   :  { %v1023_v9 = vld [vmem:[#allocation5 + $0x1d00] sm:$0xff]  ;;  %v1024_v11 = vld [vmem:[#allocation5 + $0x1d08] sm:$0xff]  ;;  %1193 = vmatpush.msra.mxu0 %v511_v8  ;;  %1233 = vmatpush.msra.mxu2 %v512_v10  ;;  %v545_v4 = vld [vmem:[#allocation5 + $0xe10] sm:$0xff] }
  0x1d   :  { %v479_v12 = vld [vmem:[#allocation5 + $0xc00] sm:$0xff]  ;;  %1213 = vmatpush.msra.mxu1 %v1023_v9  ;;  %v480_v14 = vld [vmem:[#allocation5 + $0xc08] sm:$0xff]  ;;  %1253 = vmatpush.msra.mxu3 %v1024_v11  ;;  %v1057_v5 = vld [vmem:[#allocation5 + $0x1e10] sm:$0xff] }
  0x1e   :  { %v991_v13 = vld [vmem:[#allocation5 + $0x1c00] sm:$0xff]  ;;  %v992_v15 = vld [vmem:[#allocation5 + $0x1c08] sm:$0xff]  ;;  %1194 = vmatpush.msra.mxu0 %v479_v12  ;;  %1234 = vmatpush.msra.mxu2 %v480_v14  ;;  %v546_v6 = vld [vmem:[#allocation5 + $0xe18] sm:$0xff] }
  0x1f   :  { %v447_v16 = vld [vmem:[#allocation5 + $0xb00] sm:$0xff]  ;;  %1214 = vmatpush.msra.mxu1 %v991_v13  ;;  %v448_v18 = vld [vmem:[#allocation5 + $0xb08] sm:$0xff]  ;;  %1254 = vmatpush.msra.mxu3 %v992_v15  ;;  %v1058_v7 = vld [vmem:[#allocation5 + $0x1e18] sm:$0xff] }
  0x20   :  { %v959_v17 = vld [vmem:[#allocation5 + $0x1b00] sm:$0xff]  ;;  %v960_v19 = vld [vmem:[#allocation5 + $0x1b08] sm:$0xff]  ;;  %1195 = vmatpush.msra.mxu0 %v447_v16  ;;  %1235 = vmatpush.msra.mxu2 %v448_v18  ;;  %v513_v8 = vld [vmem:[#allocation5 + $0xd10] sm:$0xff] }
  0x21   :  { %v415_v20 = vld [vmem:[#allocation5 + $0xa00] sm:$0xff]  ;;  %1215 = vmatpush.msra.mxu1 %v959_v17  ;;  %v416_v22 = vld [vmem:[#allocation5 + $0xa08] sm:$0xff]  ;;  %1255 = vmatpush.msra.mxu3 %v960_v19  ;;  %v1025_v9 = vld [vmem:[#allocation5 + $0x1d10] sm:$0xff] }
  0x22   :  { %v927_v21 = vld [vmem:[#allocation5 + $0x1a00] sm:$0xff]  ;;  %v928_v23 = vld [vmem:[#allocation5 + $0x1a08] sm:$0xff]  ;;  %1196 = vmatpush.msra.mxu0 %v415_v20  ;;  %1236 = vmatpush.msra.mxu2 %v416_v22  ;;  %v514_v10 = vld [vmem:[#allocation5 + $0xd18] sm:$0xff] }
  0x23   :  { %v383_v24 = vld [vmem:[#allocation5 + $0x900] sm:$0xff]  ;;  %1216 = vmatpush.msra.mxu1 %v927_v21  ;;  %v384_v26 = vld [vmem:[#allocation5 + $0x908] sm:$0xff]  ;;  %1256 = vmatpush.msra.mxu3 %v928_v23  ;;  %v1026_v11 = vld [vmem:[#allocation5 + $0x1d18] sm:$0xff] }
  0x24   :  { %v895_v25 = vld [vmem:[#allocation5 + $0x1900] sm:$0xff]  ;;  %v896_v27 = vld [vmem:[#allocation5 + $0x1908] sm:$0xff]  ;;  %1197 = vmatpush.msra.mxu0 %v383_v24  ;;  %1237 = vmatpush.msra.mxu2 %v384_v26  ;;  %v481_v12 = vld [vmem:[#allocation5 + $0xc10] sm:$0xff] }
  0x25   :  { %v351_v28 = vld [vmem:[#allocation5 + $0x800] sm:$0xff]  ;;  %1217 = vmatpush.msra.mxu1 %v895_v25  ;;  %v352_v30 = vld [vmem:[#allocation5 + $0x808] sm:$0xff]  ;;  %1257 = vmatpush.msra.mxu3 %v896_v27  ;;  %v993_v13 = vld [vmem:[#allocation5 + $0x1c10] sm:$0xff] }
  0x26   :  { %v863_v29 = vld [vmem:[#allocation5 + $0x1800] sm:$0xff]  ;;  %v864_v31 = vld [vmem:[#allocation5 + $0x1808] sm:$0xff]  ;;  %1198 = vmatpush.msra.mxu0 %v351_v28  ;;  %1238 = vmatpush.msra.mxu2 %v352_v30  ;;  %v482_v14 = vld [vmem:[#allocation5 + $0xc18] sm:$0xff] }
  0x27   :  { %v319_v32 = vld [vmem:[#allocation5 + $0x700] sm:$0xff]  ;;  %1218 = vmatpush.msra.mxu1 %v863_v29  ;;  %v320_v34 = vld [vmem:[#allocation5 + $0x708] sm:$0xff]  ;;  %1258 = vmatpush.msra.mxu3 %v864_v31  ;;  %v994_v15 = vld [vmem:[#allocation5 + $0x1c18] sm:$0xff] }
  0x28   :  { %v831_v33 = vld [vmem:[#allocation5 + $0x1700] sm:$0xff]  ;;  %v832_v35 = vld [vmem:[#allocation5 + $0x1708] sm:$0xff]  ;;  %1199 = vmatpush.msra.mxu0 %v319_v32  ;;  %1239 = vmatpush.msra.mxu2 %v320_v34  ;;  %v449_v16 = vld [vmem:[#allocation5 + $0xb10] sm:$0xff] }
  0x29   :  { %v287_v36 = vld [vmem:[#allocation5 + $0x600] sm:$0xff]  ;;  %1219 = vmatpush.msra.mxu1 %v831_v33  ;;  %v288_v38 = vld [vmem:[#allocation5 + $0x608] sm:$0xff]  ;;  %1259 = vmatpush.msra.mxu3 %v832_v35  ;;  %v961_v17 = vld [vmem:[#allocation5 + $0x1b10] sm:$0xff] }
  0x2a   :  { %v799_v37 = vld [vmem:[#allocation5 + $0x1600] sm:$0xff]  ;;  %v800_v39 = vld [vmem:[#allocation5 + $0x1608] sm:$0xff]  ;;  %1200 = vmatpush.msra.mxu0 %v287_v36  ;;  %1240 = vmatpush.msra.mxu2 %v288_v38  ;;  %v450_v18 = vld [vmem:[#allocation5 + $0xb18] sm:$0xff] }
  0x2b   :  { %v255_v40 = vld [vmem:[#allocation5 + $0x500] sm:$0xff]  ;;  %1220 = vmatpush.msra.mxu1 %v799_v37  ;;  %v256_v42 = vld [vmem:[#allocation5 + $0x508] sm:$0xff]  ;;  %1260 = vmatpush.msra.mxu3 %v800_v39  ;;  %v962_v19 = vld [vmem:[#allocation5 + $0x1b18] sm:$0xff] }
  0x2c   :  { %v767_v41 = vld [vmem:[#allocation5 + $0x1500] sm:$0xff]  ;;  %v768_v43 = vld [vmem:[#allocation5 + $0x1508] sm:$0xff]  ;;  %1201 = vmatpush.msra.mxu0 %v255_v40  ;;  %1241 = vmatpush.msra.mxu2 %v256_v42  ;;  %v417_v20 = vld [vmem:[#allocation5 + $0xa10] sm:$0xff] }
  0x2d   :  { %v223_v44 = vld [vmem:[#allocation5 + $0x400] sm:$0xff]  ;;  %1221 = vmatpush.msra.mxu1 %v767_v41  ;;  %v224_v46 = vld [vmem:[#allocation5 + $0x408] sm:$0xff]  ;;  %1261 = vmatpush.msra.mxu3 %v768_v43  ;;  %v929_v21 = vld [vmem:[#allocation5 + $0x1a10] sm:$0xff] }
  0x2e   :  { %v735_v45 = vld [vmem:[#allocation5 + $0x1400] sm:$0xff]  ;;  %v736_v47 = vld [vmem:[#allocation5 + $0x1408] sm:$0xff]  ;;  %1202 = vmatpush.msra.mxu0 %v223_v44  ;;  %1242 = vmatpush.msra.mxu2 %v224_v46  ;;  %v418_v22 = vld [vmem:[#allocation5 + $0xa18] sm:$0xff] }
  0x2f   :  { %v191_v48 = vld [vmem:[#allocation5 + $0x300] sm:$0xff]  ;;  %1222 = vmatpush.msra.mxu1 %v735_v45  ;;  %v192_v50 = vld [vmem:[#allocation5 + $0x308] sm:$0xff]  ;;  %1262 = vmatpush.msra.mxu3 %v736_v47  ;;  %v930_v23 = vld [vmem:[#allocation5 + $0x1a18] sm:$0xff] }
  0x30   :  { %v703_v49 = vld [vmem:[#allocation5 + $0x1300] sm:$0xff]  ;;  %v704_v51 = vld [vmem:[#allocation5 + $0x1308] sm:$0xff]  ;;  %1203 = vmatpush.msra.mxu0 %v191_v48  ;;  %1243 = vmatpush.msra.mxu2 %v192_v50  ;;  %v385_v24 = vld [vmem:[#allocation5 + $0x910] sm:$0xff] }
  0x31   :  { %v159_v52 = vld [vmem:[#allocation5 + $0x200] sm:$0xff]  ;;  %1223 = vmatpush.msra.mxu1 %v703_v49  ;;  %v160_v54 = vld [vmem:[#allocation5 + $0x208] sm:$0xff]  ;;  %1263 = vmatpush.msra.mxu3 %v704_v51  ;;  %v897_v25 = vld [vmem:[#allocation5 + $0x1910] sm:$0xff] }
  0x32   :  { %v671_v53 = vld [vmem:[#allocation5 + $0x1200] sm:$0xff]  ;;  %v672_v55 = vld [vmem:[#allocation5 + $0x1208] sm:$0xff]  ;;  %1204 = vmatpush.msra.mxu0 %v159_v52  ;;  %1244 = vmatpush.msra.mxu2 %v160_v54  ;;  %v386_v26 = vld [vmem:[#allocation5 + $0x918] sm:$0xff] }
  0x33   :  { %v127_v56 = vld [vmem:[#allocation5 + $0x100] sm:$0xff]  ;;  %1224 = vmatpush.msra.mxu1 %v671_v53  ;;  %v128_v58 = vld [vmem:[#allocation5 + $0x108] sm:$0xff]  ;;  %1264 = vmatpush.msra.mxu3 %v672_v55  ;;  %v898_v27 = vld [vmem:[#allocation5 + $0x1918] sm:$0xff] }
  0x34   :  { %v639_v57 = vld [vmem:[#allocation5 + $0x1100] sm:$0xff]  ;;  %v640_v59 = vld [vmem:[#allocation5 + $0x1108] sm:$0xff]  ;;  %1205 = vmatpush.msra.mxu0 %v127_v56  ;;  %1245 = vmatpush.msra.mxu2 %v128_v58  ;;  %v353_v28 = vld [vmem:[#allocation5 + $0x810] sm:$0xff] }
  0x35   :  { %v95_v60 = vld [vmem:[#allocation5] sm:$0xff]  ;;  %1225 = vmatpush.msra.mxu1 %v639_v57  ;;  %v96_v62 = vld [vmem:[#allocation5 + $0x8] sm:$0xff]  ;;  %1265 = vmatpush.msra.mxu3 %v640_v59  ;;  %v865_v29 = vld [vmem:[#allocation5 + $0x1810] sm:$0xff] }
  0x36   :  { %v607_v61 = vld [vmem:[#allocation5 + $0x1000] sm:$0xff]  ;;  %v608_v63 = vld [vmem:[#allocation5 + $0x1008] sm:$0xff]  ;;  %1206 = vmatpush.msra.mxu0 %v95_v60  ;;  %1246 = vmatpush.msra.mxu2 %v96_v62  ;;  %v354_v30 = vld [vmem:[#allocation5 + $0x818] sm:$0xff] }
  0x37   :  { %1226 = vmatpush.msra.mxu1 %v607_v61  ;;  %1266 = vmatpush.msra.mxu3 %v608_v63  ;;  %v866_v31 = vld [vmem:[#allocation5 + $0x1818] sm:$0xff]  ;;  %v321_v32 = vld [vmem:[#allocation5 + $0x710] sm:$0xff] }
  0x38   :  { %1271 = vmatpush.msrb.mxu0 %v577_v0  ;;  %1311 = vmatpush.msrb.mxu2 %v578_v2  ;;  %v833_v33 = vld [vmem:[#allocation5 + $0x1710] sm:$0xff]  ;;  %v322_v34 = vld [vmem:[#allocation5 + $0x718] sm:$0xff]  ;;  %v579_v2 = vld [vmem:[#allocation5 + $0xf20] sm:$0xff] }
  0x39   :  { %1291 = vmatpush.msrb.mxu1 %v1089_v1  ;;  %1331 = vmatpush.msrb.mxu3 %v1090_v3  ;;  %v834_v35 = vld [vmem:[#allocation5 + $0x1718] sm:$0xff]  ;;  %v289_v36 = vld [vmem:[#allocation5 + $0x610] sm:$0xff]  ;;  %v1091_v3 = vld [vmem:[#allocation5 + $0x1f20] sm:$0xff] }
  0x3a   :  { %1272 = vmatpush.msrb.mxu0 %v545_v4  ;;  %1312 = vmatpush.msrb.mxu2 %v546_v6  ;;  %v801_v37 = vld [vmem:[#allocation5 + $0x1610] sm:$0xff]  ;;  %v290_v38 = vld [vmem:[#allocation5 + $0x618] sm:$0xff]  ;;  %v580_v4 = vld [vmem:[#allocation5 + $0xf28] sm:$0xff] }
  0x3b   :  { %1292 = vmatpush.msrb.mxu1 %v1057_v5  ;;  %1332 = vmatpush.msrb.mxu3 %v1058_v7  ;;  %v802_v39 = vld [vmem:[#allocation5 + $0x1618] sm:$0xff]  ;;  %v257_v40 = vld [vmem:[#allocation5 + $0x510] sm:$0xff]  ;;  %v1092_v5 = vld [vmem:[#allocation5 + $0x1f28] sm:$0xff] }
  0x3c   :  { %1273 = vmatpush.msrb.mxu0 %v513_v8  ;;  %1313 = vmatpush.msrb.mxu2 %v514_v10  ;;  %v769_v41 = vld [vmem:[#allocation5 + $0x1510] sm:$0xff]  ;;  %v258_v42 = vld [vmem:[#allocation5 + $0x518] sm:$0xff]  ;;  %v547_v6 = vld [vmem:[#allocation5 + $0xe20] sm:$0xff] }
  0x3d   :  { %1293 = vmatpush.msrb.mxu1 %v1025_v9  ;;  %1333 = vmatpush.msrb.mxu3 %v1026_v11  ;;  %v770_v43 = vld [vmem:[#allocation5 + $0x1518] sm:$0xff]  ;;  %v225_v44 = vld [vmem:[#allocation5 + $0x410] sm:$0xff]  ;;  %v1059_v7 = vld [vmem:[#allocation5 + $0x1e20] sm:$0xff] }
  0x3e   :  { %1274 = vmatpush.msrb.mxu0 %v481_v12  ;;  %1314 = vmatpush.msrb.mxu2 %v482_v14  ;;  %v737_v45 = vld [vmem:[#allocation5 + $0x1410] sm:$0xff]  ;;  %v226_v46 = vld [vmem:[#allocation5 + $0x418] sm:$0xff]  ;;  %v548_v8 = vld [vmem:[#allocation5 + $0xe28] sm:$0xff] }
  0x3f   :  { %1294 = vmatpush.msrb.mxu1 %v993_v13  ;;  %1334 = vmatpush.msrb.mxu3 %v994_v15  ;;  %v738_v47 = vld [vmem:[#allocation5 + $0x1418] sm:$0xff]  ;;  %v193_v48 = vld [vmem:[#allocation5 + $0x310] sm:$0xff]  ;;  %v1060_v9 = vld [vmem:[#allocation5 + $0x1e28] sm:$0xff] }
  0x40   :  { %1275 = vmatpush.msrb.mxu0 %v449_v16  ;;  %1315 = vmatpush.msrb.mxu2 %v450_v18  ;;  %v705_v49 = vld [vmem:[#allocation5 + $0x1310] sm:$0xff]  ;;  %v194_v50 = vld [vmem:[#allocation5 + $0x318] sm:$0xff]  ;;  %v515_v10 = vld [vmem:[#allocation5 + $0xd20] sm:$0xff] }
  0x41   :  { %1295 = vmatpush.msrb.mxu1 %v961_v17  ;;  %1335 = vmatpush.msrb.mxu3 %v962_v19  ;;  %v706_v51 = vld [vmem:[#allocation5 + $0x1318] sm:$0xff]  ;;  %v161_v52 = vld [vmem:[#allocation5 + $0x210] sm:$0xff]  ;;  %v1027_v11 = vld [vmem:[#allocation5 + $0x1d20] sm:$0xff] }
  0x42   :  { %1276 = vmatpush.msrb.mxu0 %v417_v20  ;;  %1316 = vmatpush.msrb.mxu2 %v418_v22  ;;  %v673_v53 = vld [vmem:[#allocation5 + $0x1210] sm:$0xff]  ;;  %v162_v54 = vld [vmem:[#allocation5 + $0x218] sm:$0xff]  ;;  %v516_v12 = vld [vmem:[#allocation5 + $0xd28] sm:$0xff] }
  0x43   :  { %1296 = vmatpush.msrb.mxu1 %v929_v21  ;;  %1336 = vmatpush.msrb.mxu3 %v930_v23  ;;  %v674_v55 = vld [vmem:[#allocation5 + $0x1218] sm:$0xff]  ;;  %v129_v56 = vld [vmem:[#allocation5 + $0x110] sm:$0xff]  ;;  %v1028_v13 = vld [vmem:[#allocation5 + $0x1d28] sm:$0xff] }
  0x44   :  { %1277 = vmatpush.msrb.mxu0 %v385_v24  ;;  %1317 = vmatpush.msrb.mxu2 %v386_v26  ;;  %v641_v57 = vld [vmem:[#allocation5 + $0x1110] sm:$0xff]  ;;  %v130_v58 = vld [vmem:[#allocation5 + $0x118] sm:$0xff]  ;;  %v483_v14 = vld [vmem:[#allocation5 + $0xc20] sm:$0xff] }
  0x45   :  { %1297 = vmatpush.msrb.mxu1 %v897_v25  ;;  %1337 = vmatpush.msrb.mxu3 %v898_v27  ;;  %v642_v59 = vld [vmem:[#allocation5 + $0x1118] sm:$0xff]  ;;  %v97_v60 = vld [vmem:[#allocation5 + $0x10] sm:$0xff]  ;;  %v995_v15 = vld [vmem:[#allocation5 + $0x1c20] sm:$0xff] }
  0x46   :  { %1278 = vmatpush.msrb.mxu0 %v353_v28  ;;  %1318 = vmatpush.msrb.mxu2 %v354_v30  ;;  %v609_v61 = vld [vmem:[#allocation5 + $0x1010] sm:$0xff]  ;;  %v98_v62 = vld [vmem:[#allocation5 + $0x18] sm:$0xff]  ;;  %v484_v16 = vld [vmem:[#allocation5 + $0xc28] sm:$0xff] }
  0x47   :  { %1298 = vmatpush.msrb.mxu1 %v865_v29  ;;  %1338 = vmatpush.msrb.mxu3 %v866_v31  ;;  %v610_v63 = vld [vmem:[#allocation5 + $0x1018] sm:$0xff]  ;;  %v3903_v0 = vld [vmem:[#allocation2] sm:$0xff]  ;;  %v996_v17 = vld [vmem:[#allocation5 + $0x1c28] sm:$0xff] }
  0x48   :  { %1279 = vmatpush.msrb.mxu0 %v321_v32  ;;  %1319 = vmatpush.msrb.mxu2 %v322_v34  ;;  %v3905_v1 = vld [vmem:[#allocation2 + $0x8] sm:$0xff]  ;;  %v451_v18 = vld [vmem:[#allocation5 + $0xb20] sm:$0xff]  ;;  %v452_v20 = vld [vmem:[#allocation5 + $0xb28] sm:$0xff] }
  0x49   :  { %1299 = vmatpush.msrb.mxu1 %v833_v33  ;;  %1339 = vmatpush.msrb.mxu3 %v834_v35  ;;  %v963_v19 = vld [vmem:[#allocation5 + $0x1b20] sm:$0xff]  ;;  %v964_v21 = vld [vmem:[#allocation5 + $0x1b28] sm:$0xff] }
  0x4a   :  { %1280 = vmatpush.msrb.mxu0 %v289_v36  ;;  %1320 = vmatpush.msrb.mxu2 %v290_v38  ;;  %v419_v22 = vld [vmem:[#allocation5 + $0xa20] sm:$0xff]  ;;  %v420_v24 = vld [vmem:[#allocation5 + $0xa28] sm:$0xff] }
  0x4b   :  { %1300 = vmatpush.msrb.mxu1 %v801_v37  ;;  %1340 = vmatpush.msrb.mxu3 %v802_v39  ;;  %v931_v23 = vld [vmem:[#allocation5 + $0x1a20] sm:$0xff]  ;;  %v932_v25 = vld [vmem:[#allocation5 + $0x1a28] sm:$0xff] }
  0x4c   :  { %1281 = vmatpush.msrb.mxu0 %v257_v40  ;;  %1321 = vmatpush.msrb.mxu2 %v258_v42  ;;  %v387_v26 = vld [vmem:[#allocation5 + $0x920] sm:$0xff]  ;;  %v388_v28 = vld [vmem:[#allocation5 + $0x928] sm:$0xff] }
  0x4d   :  { %1301 = vmatpush.msrb.mxu1 %v769_v41  ;;  %1341 = vmatpush.msrb.mxu3 %v770_v43  ;;  %v899_v27 = vld [vmem:[#allocation5 + $0x1920] sm:$0xff]  ;;  %v900_v29 = vld [vmem:[#allocation5 + $0x1928] sm:$0xff] }
  0x4e   :  { %1282 = vmatpush.msrb.mxu0 %v225_v44  ;;  %1322 = vmatpush.msrb.mxu2 %v226_v46  ;;  %v355_v30 = vld [vmem:[#allocation5 + $0x820] sm:$0xff]  ;;  %v356_v32 = vld [vmem:[#allocation5 + $0x828] sm:$0xff] }
  0x4f   :  { %1302 = vmatpush.msrb.mxu1 %v737_v45  ;;  %1342 = vmatpush.msrb.mxu3 %v738_v47  ;;  %v867_v31 = vld [vmem:[#allocation5 + $0x1820] sm:$0xff]  ;;  %v868_v33 = vld [vmem:[#allocation5 + $0x1828] sm:$0xff] }
  0x50   :  { %1283 = vmatpush.msrb.mxu0 %v193_v48  ;;  %1323 = vmatpush.msrb.mxu2 %v194_v50  ;;  %v323_v34 = vld [vmem:[#allocation5 + $0x720] sm:$0xff]  ;;  %v324_v36 = vld [vmem:[#allocation5 + $0x728] sm:$0xff] }
  0x51   :  { %1303 = vmatpush.msrb.mxu1 %v705_v49  ;;  %1343 = vmatpush.msrb.mxu3 %v706_v51  ;;  %v835_v35 = vld [vmem:[#allocation5 + $0x1720] sm:$0xff]  ;;  %v836_v37 = vld [vmem:[#allocation5 + $0x1728] sm:$0xff] }
  0x52   :  { %1284 = vmatpush.msrb.mxu0 %v161_v52  ;;  %1324 = vmatpush.msrb.mxu2 %v162_v54  ;;  %v291_v38 = vld [vmem:[#allocation5 + $0x620] sm:$0xff]  ;;  %v292_v40 = vld [vmem:[#allocation5 + $0x628] sm:$0xff] }
  0x53   :  { %1304 = vmatpush.msrb.mxu1 %v673_v53  ;;  %1344 = vmatpush.msrb.mxu3 %v674_v55  ;;  %v803_v39 = vld [vmem:[#allocation5 + $0x1620] sm:$0xff]  ;;  %v804_v41 = vld [vmem:[#allocation5 + $0x1628] sm:$0xff] }
  0x54   :  { %1285 = vmatpush.msrb.mxu0 %v129_v56  ;;  %1325 = vmatpush.msrb.mxu2 %v130_v58  ;;  %v259_v42 = vld [vmem:[#allocation5 + $0x520] sm:$0xff]  ;;  %v260_v44 = vld [vmem:[#allocation5 + $0x528] sm:$0xff] }
  0x55   :  { %1305 = vmatpush.msrb.mxu1 %v641_v57  ;;  %1345 = vmatpush.msrb.mxu3 %v642_v59  ;;  %v771_v43 = vld [vmem:[#allocation5 + $0x1520] sm:$0xff]  ;;  %v772_v45 = vld [vmem:[#allocation5 + $0x1528] sm:$0xff] }
  0x56   :  { %1286 = vmatpush.msrb.mxu0 %v97_v60  ;;  %1326 = vmatpush.msrb.mxu2 %v98_v62  ;;  %v227_v46 = vld [vmem:[#allocation5 + $0x420] sm:$0xff]  ;;  %v228_v48 = vld [vmem:[#allocation5 + $0x428] sm:$0xff] }
  0x57   :  { %1306 = vmatpush.msrb.mxu1 %v609_v61  ;;  %1346 = vmatpush.msrb.mxu3 %v610_v63  ;;  %v739_v47 = vld [vmem:[#allocation5 + $0x1420] sm:$0xff]  ;;  %v740_v49 = vld [vmem:[#allocation5 + $0x1428] sm:$0xff] }
  0x58   :  { %1207 = vmatmul.f32.vlgmr.msra.gmra.mxu0 %v3903_v0  ;;  %1227 = vmatmul.f32.vlgmr.msra.gmra.mxu1 %v3905_v1  ;;  %v195_v50 = vld [vmem:[#allocation5 + $0x320] sm:$0xff]  ;;  %v196_v52 = vld [vmem:[#allocation5 + $0x328] sm:$0xff] }
  0x59   :  { %1247 = vmatmul.f32.vlgmr.msra.gmra.mxu2 %v3903_v0  ;;  %1267 = vmatmul.f32.vlgmr.msra.gmra.mxu3 %v3905_v1  ;;  %v707_v51 = vld [vmem:[#allocation5 + $0x1320] sm:$0xff]  ;;  %v708_v53 = vld [vmem:[#allocation5 + $0x1328] sm:$0xff] }
  0x5a   :  { %1351 = vmatpush.msra.mxu0 %v579_v2  ;;  %1371 = vmatpush.msra.mxu1 %v1091_v3  ;;  %v163_v54 = vld [vmem:[#allocation5 + $0x220] sm:$0xff]  ;;  %v164_v56 = vld [vmem:[#allocation5 + $0x228] sm:$0xff] }
  0x5b   :  { %1391 = vmatpush.msra.mxu2 %v580_v4  ;;  %1411 = vmatpush.msra.mxu3 %v1092_v5  ;;  %v675_v55 = vld [vmem:[#allocation5 + $0x1220] sm:$0xff]  ;;  %v676_v57 = vld [vmem:[#allocation5 + $0x1228] sm:$0xff]  ;;  %v581_v4 = vld [vmem:[#allocation5 + $0xf30] sm:$0xff] }
  0x5c   :  { %1352 = vmatpush.msra.mxu0 %v547_v6  ;;  %1372 = vmatpush.msra.mxu1 %v1059_v7  ;;  %v131_v58 = vld [vmem:[#allocation5 + $0x120] sm:$0xff]  ;;  %v132_v60 = vld [vmem:[#allocation5 + $0x128] sm:$0xff]  ;;  %v1093_v5 = vld [vmem:[#allocation5 + $0x1f30] sm:$0xff] }
  0x5d   :  { %1392 = vmatpush.msra.mxu2 %v548_v8  ;;  %1412 = vmatpush.msra.mxu3 %v1060_v9  ;;  %v643_v59 = vld [vmem:[#allocation5 + $0x1120] sm:$0xff]  ;;  %v644_v61 = vld [vmem:[#allocation5 + $0x1128] sm:$0xff]  ;;  %v582_v6 = vld [vmem:[#allocation5 + $0xf38] sm:$0xff] }
  0x5e   :  { %1353 = vmatpush.msra.mxu0 %v515_v10  ;;  %1373 = vmatpush.msra.mxu1 %v1027_v11  ;;  %v99_v62 = vld [vmem:[#allocation5 + $0x20] sm:$0xff]  ;;  %v100_v2 = vld [vmem:[#allocation5 + $0x28] sm:$0xff]  ;;  %v1094_v7 = vld [vmem:[#allocation5 + $0x1f38] sm:$0xff] }
  0x5f   :  { %1393 = vmatpush.msra.mxu2 %v516_v12  ;;  %1413 = vmatpush.msra.mxu3 %v1028_v13  ;;  %v611_v63 = vld [vmem:[#allocation5 + $0x1020] sm:$0xff]  ;;  %v612_v3 = vld [vmem:[#allocation5 + $0x1028] sm:$0xff]  ;;  %v549_v8 = vld [vmem:[#allocation5 + $0xe30] sm:$0xff] }
  0x60   :  { %1354 = vmatpush.msra.mxu0 %v483_v14  ;;  %1374 = vmatpush.msra.mxu1 %v995_v15  ;;  %v1061_v9 = vld [vmem:[#allocation5 + $0x1e30] sm:$0xff]  ;;  %v550_v10 = vld [vmem:[#allocation5 + $0xe38] sm:$0xff] }
  0x61   :  { %1394 = vmatpush.msra.mxu2 %v484_v16  ;;  %1414 = vmatpush.msra.mxu3 %v996_v17  ;;  %v1062_v11 = vld [vmem:[#allocation5 + $0x1e38] sm:$0xff]  ;;  %v517_v12 = vld [vmem:[#allocation5 + $0xd30] sm:$0xff] }
  0x62   :  { %1355 = vmatpush.msra.mxu0 %v451_v18  ;;  %1375 = vmatpush.msra.mxu1 %v963_v19  ;;  %v1029_v13 = vld [vmem:[#allocation5 + $0x1d30] sm:$0xff]  ;;  %v518_v14 = vld [vmem:[#allocation5 + $0xd38] sm:$0xff] }
  0x63   :  { %1395 = vmatpush.msra.mxu2 %v452_v20  ;;  %1415 = vmatpush.msra.mxu3 %v964_v21  ;;  %v1030_v15 = vld [vmem:[#allocation5 + $0x1d38] sm:$0xff]  ;;  %v485_v16 = vld [vmem:[#allocation5 + $0xc30] sm:$0xff] }
  0x64   :  { %1356 = vmatpush.msra.mxu0 %v419_v22  ;;  %1376 = vmatpush.msra.mxu1 %v931_v23  ;;  %v997_v17 = vld [vmem:[#allocation5 + $0x1c30] sm:$0xff]  ;;  %v486_v18 = vld [vmem:[#allocation5 + $0xc38] sm:$0xff] }
  0x65   :  { %1396 = vmatpush.msra.mxu2 %v420_v24  ;;  %1416 = vmatpush.msra.mxu3 %v932_v25  ;;  %v998_v19 = vld [vmem:[#allocation5 + $0x1c38] sm:$0xff]  ;;  %v453_v20 = vld [vmem:[#allocation5 + $0xb30] sm:$0xff] }
  0x66   :  { %1357 = vmatpush.msra.mxu0 %v387_v26  ;;  %1377 = vmatpush.msra.mxu1 %v899_v27  ;;  %v965_v21 = vld [vmem:[#allocation5 + $0x1b30] sm:$0xff]  ;;  %v454_v22 = vld [vmem:[#allocation5 + $0xb38] sm:$0xff] }
  0x67   :  { %1397 = vmatpush.msra.mxu2 %v388_v28  ;;  %1417 = vmatpush.msra.mxu3 %v900_v29  ;;  %v966_v23 = vld [vmem:[#allocation5 + $0x1b38] sm:$0xff]  ;;  %v421_v24 = vld [vmem:[#allocation5 + $0xa30] sm:$0xff] }
  0x68   :  { %1358 = vmatpush.msra.mxu0 %v355_v30  ;;  %1378 = vmatpush.msra.mxu1 %v867_v31  ;;  %v933_v25 = vld [vmem:[#allocation5 + $0x1a30] sm:$0xff]  ;;  %v422_v26 = vld [vmem:[#allocation5 + $0xa38] sm:$0xff] }
  0x69   :  { %1398 = vmatpush.msra.mxu2 %v356_v32  ;;  %1418 = vmatpush.msra.mxu3 %v868_v33  ;;  %v934_v27 = vld [vmem:[#allocation5 + $0x1a38] sm:$0xff]  ;;  %v389_v28 = vld [vmem:[#allocation5 + $0x930] sm:$0xff] }
  0x6a   :  { %1359 = vmatpush.msra.mxu0 %v323_v34  ;;  %1379 = vmatpush.msra.mxu1 %v835_v35  ;;  %v901_v29 = vld [vmem:[#allocation5 + $0x1930] sm:$0xff]  ;;  %v390_v30 = vld [vmem:[#allocation5 + $0x938] sm:$0xff] }
  0x6b   :  { %1399 = vmatpush.msra.mxu2 %v324_v36  ;;  %1419 = vmatpush.msra.mxu3 %v836_v37  ;;  %v902_v31 = vld [vmem:[#allocation5 + $0x1938] sm:$0xff]  ;;  %v357_v32 = vld [vmem:[#allocation5 + $0x830] sm:$0xff] }
  0x6c   :  { %1360 = vmatpush.msra.mxu0 %v291_v38  ;;  %1380 = vmatpush.msra.mxu1 %v803_v39  ;;  %v869_v33 = vld [vmem:[#allocation5 + $0x1830] sm:$0xff]  ;;  %v358_v34 = vld [vmem:[#allocation5 + $0x838] sm:$0xff] }
  0x6d   :  { %1400 = vmatpush.msra.mxu2 %v292_v40  ;;  %1420 = vmatpush.msra.mxu3 %v804_v41  ;;  %v870_v35 = vld [vmem:[#allocation5 + $0x1838] sm:$0xff]  ;;  %v325_v36 = vld [vmem:[#allocation5 + $0x730] sm:$0xff] }
  0x6e   :  { %1361 = vmatpush.msra.mxu0 %v259_v42  ;;  %1381 = vmatpush.msra.mxu1 %v771_v43  ;;  %v837_v37 = vld [vmem:[#allocation5 + $0x1730] sm:$0xff]  ;;  %v326_v38 = vld [vmem:[#allocation5 + $0x738] sm:$0xff] }
  0x6f   :  { %1401 = vmatpush.msra.mxu2 %v260_v44  ;;  %1421 = vmatpush.msra.mxu3 %v772_v45  ;;  %v838_v39 = vld [vmem:[#allocation5 + $0x1738] sm:$0xff]  ;;  %v293_v40 = vld [vmem:[#allocation5 + $0x630] sm:$0xff] }
  0x70   :  { %1362 = vmatpush.msra.mxu0 %v227_v46  ;;  %1382 = vmatpush.msra.mxu1 %v739_v47  ;;  %v805_v41 = vld [vmem:[#allocation5 + $0x1630] sm:$0xff]  ;;  %v294_v42 = vld [vmem:[#allocation5 + $0x638] sm:$0xff] }
  0x71   :  { %1402 = vmatpush.msra.mxu2 %v228_v48  ;;  %1422 = vmatpush.msra.mxu3 %v740_v49  ;;  %v806_v43 = vld [vmem:[#allocation5 + $0x1638] sm:$0xff]  ;;  %v261_v44 = vld [vmem:[#allocation5 + $0x530] sm:$0xff] }
  0x72   :  { %1363 = vmatpush.msra.mxu0 %v195_v50  ;;  %1383 = vmatpush.msra.mxu1 %v707_v51  ;;  %v773_v45 = vld [vmem:[#allocation5 + $0x1530] sm:$0xff]  ;;  %v262_v46 = vld [vmem:[#allocation5 + $0x538] sm:$0xff] }
  0x73   :  { %1403 = vmatpush.msra.mxu2 %v196_v52  ;;  %1423 = vmatpush.msra.mxu3 %v708_v53  ;;  %v774_v47 = vld [vmem:[#allocation5 + $0x1538] sm:$0xff]  ;;  %v229_v48 = vld [vmem:[#allocation5 + $0x430] sm:$0xff] }
  0x74   :  { %1364 = vmatpush.msra.mxu0 %v163_v54  ;;  %1384 = vmatpush.msra.mxu1 %v675_v55  ;;  %v741_v49 = vld [vmem:[#allocation5 + $0x1430] sm:$0xff]  ;;  %v230_v50 = vld [vmem:[#allocation5 + $0x438] sm:$0xff] }
  0x75   :  { %1404 = vmatpush.msra.mxu2 %v164_v56  ;;  %1424 = vmatpush.msra.mxu3 %v676_v57  ;;  %v742_v51 = vld [vmem:[#allocation5 + $0x1438] sm:$0xff]  ;;  %v197_v52 = vld [vmem:[#allocation5 + $0x330] sm:$0xff] }
  0x76   :  { %1365 = vmatpush.msra.mxu0 %v131_v58  ;;  %1385 = vmatpush.msra.mxu1 %v643_v59  ;;  %v709_v53 = vld [vmem:[#allocation5 + $0x1330] sm:$0xff]  ;;  %v198_v54 = vld [vmem:[#allocation5 + $0x338] sm:$0xff] }
  0x77   :  { %1405 = vmatpush.msra.mxu2 %v132_v60  ;;  %1425 = vmatpush.msra.mxu3 %v644_v61  ;;  %v710_v55 = vld [vmem:[#allocation5 + $0x1338] sm:$0xff]  ;;  %v165_v56 = vld [vmem:[#allocation5 + $0x230] sm:$0xff] }
  0x78   :  { %1366 = vmatpush.msra.mxu0 %v99_v62  ;;  %1386 = vmatpush.msra.mxu1 %v611_v63  ;;  %v677_v57 = vld [vmem:[#allocation5 + $0x1230] sm:$0xff]  ;;  %v166_v58 = vld [vmem:[#allocation5 + $0x238] sm:$0xff] }
  0x79   :  { %1406 = vmatpush.msra.mxu2 %v100_v2  ;;  %1426 = vmatpush.msra.mxu3 %v612_v3  ;;  %v678_v59 = vld [vmem:[#allocation5 + $0x1238] sm:$0xff]  ;;  %v133_v60 = vld [vmem:[#allocation5 + $0x130] sm:$0xff] }
  0x7a   :  { %1287 = vmatmul.f32.vlgmr.msrb.gmra.mxu0 %v3903_v0  ;;  %1307 = vmatmul.f32.vlgmr.msrb.gmra.mxu1 %v3905_v1  ;;  %v645_v61 = vld [vmem:[#allocation5 + $0x1130] sm:$0xff]  ;;  %v134_v62 = vld [vmem:[#allocation5 + $0x138] sm:$0xff] }
  0x7b   :  { %1327 = vmatmul.f32.vlgmr.msrb.gmra.mxu2 %v3903_v0  ;;  %1347 = vmatmul.f32.vlgmr.msrb.gmra.mxu3 %v3905_v1  ;;  %v646_v63 = vld [vmem:[#allocation5 + $0x1138] sm:$0xff]  ;;  %v101_v2 = vld [vmem:[#allocation5 + $0x30] sm:$0xff] }
  0x7c   :  { %1431 = vmatpush.msrb.mxu0 %v581_v4  ;;  %1451 = vmatpush.msrb.mxu1 %v1093_v5  ;;  %v613_v3 = vld [vmem:[#allocation5 + $0x1030] sm:$0xff]  ;;  %v102_v4 = vld [vmem:[#allocation5 + $0x38] sm:$0xff] }
  0x7d   :  { %1471 = vmatpush.msrb.mxu2 %v582_v6  ;;  %1491 = vmatpush.msrb.mxu3 %v1094_v7  ;;  %v614_v5 = vld [vmem:[#allocation5 + $0x1038] sm:$0xff]  ;;  %v583_v6 = vld [vmem:[#allocation5 + $0xf40] sm:$0xff] }
  0x7e   :  { %1432 = vmatpush.msrb.mxu0 %v549_v8  ;;  %1452 = vmatpush.msrb.mxu1 %v1061_v9  ;;  %v1095_v7 = vld [vmem:[#allocation5 + $0x1f40] sm:$0xff]  ;;  %v584_v8 = vld [vmem:[#allocation5 + $0xf48] sm:$0xff] }
  0x7f   :  { %1472 = vmatpush.msrb.mxu2 %v550_v10  ;;  %1492 = vmatpush.msrb.mxu3 %v1062_v11  ;;  %v1096_v9 = vld [vmem:[#allocation5 + $0x1f48] sm:$0xff]  ;;  %v551_v10 = vld [vmem:[#allocation5 + $0xe40] sm:$0xff] }
  0x80   :  { %1433 = vmatpush.msrb.mxu0 %v517_v12  ;;  %1453 = vmatpush.msrb.mxu1 %v1029_v13  ;;  %v1063_v11 = vld [vmem:[#allocation5 + $0x1e40] sm:$0xff]  ;;  %v552_v12 = vld [vmem:[#allocation5 + $0xe48] sm:$0xff] }
  0x81   :  { %1473 = vmatpush.msrb.mxu2 %v518_v14  ;;  %1493 = vmatpush.msrb.mxu3 %v1030_v15  ;;  %v1064_v13 = vld [vmem:[#allocation5 + $0x1e48] sm:$0xff]  ;;  %v519_v14 = vld [vmem:[#allocation5 + $0xd40] sm:$0xff] }
  0x82   :  { %1434 = vmatpush.msrb.mxu0 %v485_v16  ;;  %1454 = vmatpush.msrb.mxu1 %v997_v17  ;;  %v1031_v15 = vld [vmem:[#allocation5 + $0x1d40] sm:$0xff]  ;;  %v520_v16 = vld [vmem:[#allocation5 + $0xd48] sm:$0xff] }
  0x83   :  { %1474 = vmatpush.msrb.mxu2 %v486_v18  ;;  %1494 = vmatpush.msrb.mxu3 %v998_v19  ;;  %v1032_v17 = vld [vmem:[#allocation5 + $0x1d48] sm:$0xff]  ;;  %v487_v18 = vld [vmem:[#allocation5 + $0xc40] sm:$0xff] }
  0x84   :  { %1435 = vmatpush.msrb.mxu0 %v453_v20  ;;  %1455 = vmatpush.msrb.mxu1 %v965_v21  ;;  %v999_v19 = vld [vmem:[#allocation5 + $0x1c40] sm:$0xff]  ;;  %v488_v20 = vld [vmem:[#allocation5 + $0xc48] sm:$0xff] }
  0x85   :  { %1475 = vmatpush.msrb.mxu2 %v454_v22  ;;  %1495 = vmatpush.msrb.mxu3 %v966_v23  ;;  %v1000_v21 = vld [vmem:[#allocation5 + $0x1c48] sm:$0xff]  ;;  %v455_v22 = vld [vmem:[#allocation5 + $0xb40] sm:$0xff] }
  0x86   :  { %1436 = vmatpush.msrb.mxu0 %v421_v24  ;;  %1456 = vmatpush.msrb.mxu1 %v933_v25  ;;  %v967_v23 = vld [vmem:[#allocation5 + $0x1b40] sm:$0xff]  ;;  %v456_v24 = vld [vmem:[#allocation5 + $0xb48] sm:$0xff] }
  0x87   :  { %1476 = vmatpush.msrb.mxu2 %v422_v26  ;;  %1496 = vmatpush.msrb.mxu3 %v934_v27  ;;  %v968_v25 = vld [vmem:[#allocation5 + $0x1b48] sm:$0xff]  ;;  %v423_v26 = vld [vmem:[#allocation5 + $0xa40] sm:$0xff] }
  0x88   :  { %1437 = vmatpush.msrb.mxu0 %v389_v28  ;;  %1457 = vmatpush.msrb.mxu1 %v901_v29  ;;  %v935_v27 = vld [vmem:[#allocation5 + $0x1a40] sm:$0xff]  ;;  %v424_v28 = vld [vmem:[#allocation5 + $0xa48] sm:$0xff] }
  0x89   :  { %1477 = vmatpush.msrb.mxu2 %v390_v30  ;;  %1497 = vmatpush.msrb.mxu3 %v902_v31  ;;  %v936_v29 = vld [vmem:[#allocation5 + $0x1a48] sm:$0xff]  ;;  %v391_v30 = vld [vmem:[#allocation5 + $0x940] sm:$0xff] }
  0x8a   :  { %1438 = vmatpush.msrb.mxu0 %v357_v32  ;;  %1458 = vmatpush.msrb.mxu1 %v869_v33  ;;  %v903_v31 = vld [vmem:[#allocation5 + $0x1940] sm:$0xff]  ;;  %v392_v32 = vld [vmem:[#allocation5 + $0x948] sm:$0xff] }
  0x8b   :  { %1478 = vmatpush.msrb.mxu2 %v358_v34  ;;  %1498 = vmatpush.msrb.mxu3 %v870_v35  ;;  %v904_v33 = vld [vmem:[#allocation5 + $0x1948] sm:$0xff]  ;;  %v359_v34 = vld [vmem:[#allocation5 + $0x840] sm:$0xff] }
  0x8c   :  { %1439 = vmatpush.msrb.mxu0 %v325_v36  ;;  %1459 = vmatpush.msrb.mxu1 %v837_v37  ;;  %v871_v35 = vld [vmem:[#allocation5 + $0x1840] sm:$0xff]  ;;  %v360_v36 = vld [vmem:[#allocation5 + $0x848] sm:$0xff] }
  0x8d   :  { %1479 = vmatpush.msrb.mxu2 %v326_v38  ;;  %1499 = vmatpush.msrb.mxu3 %v838_v39  ;;  %v872_v37 = vld [vmem:[#allocation5 + $0x1848] sm:$0xff]  ;;  %v327_v38 = vld [vmem:[#allocation5 + $0x740] sm:$0xff] }
  0x8e   :  { %1440 = vmatpush.msrb.mxu0 %v293_v40  ;;  %1460 = vmatpush.msrb.mxu1 %v805_v41  ;;  %v839_v39 = vld [vmem:[#allocation5 + $0x1740] sm:$0xff]  ;;  %v328_v40 = vld [vmem:[#allocation5 + $0x748] sm:$0xff] }
  0x8f   :  { %1480 = vmatpush.msrb.mxu2 %v294_v42  ;;  %1500 = vmatpush.msrb.mxu3 %v806_v43  ;;  %v840_v41 = vld [vmem:[#allocation5 + $0x1748] sm:$0xff]  ;;  %v295_v42 = vld [vmem:[#allocation5 + $0x640] sm:$0xff] }
  0x90   :  { %1441 = vmatpush.msrb.mxu0 %v261_v44  ;;  %1461 = vmatpush.msrb.mxu1 %v773_v45  ;;  %v807_v43 = vld [vmem:[#allocation5 + $0x1640] sm:$0xff]  ;;  %v296_v44 = vld [vmem:[#allocation5 + $0x648] sm:$0xff] }
  0x91   :  { %1481 = vmatpush.msrb.mxu2 %v262_v46  ;;  %1501 = vmatpush.msrb.mxu3 %v774_v47  ;;  %v808_v45 = vld [vmem:[#allocation5 + $0x1648] sm:$0xff]  ;;  %v263_v46 = vld [vmem:[#allocation5 + $0x540] sm:$0xff] }
  0x92   :  { %1442 = vmatpush.msrb.mxu0 %v229_v48  ;;  %1462 = vmatpush.msrb.mxu1 %v741_v49  ;;  %v775_v47 = vld [vmem:[#allocation5 + $0x1540] sm:$0xff]  ;;  %v264_v48 = vld [vmem:[#allocation5 + $0x548] sm:$0xff] }
  0x93   :  { %1482 = vmatpush.msrb.mxu2 %v230_v50  ;;  %1502 = vmatpush.msrb.mxu3 %v742_v51  ;;  %v776_v49 = vld [vmem:[#allocation5 + $0x1548] sm:$0xff]  ;;  %v231_v50 = vld [vmem:[#allocation5 + $0x440] sm:$0xff] }
  0x94   :  { %1443 = vmatpush.msrb.mxu0 %v197_v52  ;;  %1463 = vmatpush.msrb.mxu1 %v709_v53  ;;  %v743_v51 = vld [vmem:[#allocation5 + $0x1440] sm:$0xff]  ;;  %v232_v52 = vld [vmem:[#allocation5 + $0x448] sm:$0xff] }
  0x95   :  { %1483 = vmatpush.msrb.mxu2 %v198_v54  ;;  %1503 = vmatpush.msrb.mxu3 %v710_v55  ;;  %v744_v53 = vld [vmem:[#allocation5 + $0x1448] sm:$0xff]  ;;  %v199_v54 = vld [vmem:[#allocation5 + $0x340] sm:$0xff] }
  0x96   :  { %1444 = vmatpush.msrb.mxu0 %v165_v56  ;;  %1464 = vmatpush.msrb.mxu1 %v677_v57  ;;  %v711_v55 = vld [vmem:[#allocation5 + $0x1340] sm:$0xff]  ;;  %v200_v56 = vld [vmem:[#allocation5 + $0x348] sm:$0xff] }
  0x97   :  { %1484 = vmatpush.msrb.mxu2 %v166_v58  ;;  %1504 = vmatpush.msrb.mxu3 %v678_v59  ;;  %v712_v57 = vld [vmem:[#allocation5 + $0x1348] sm:$0xff]  ;;  %v167_v58 = vld [vmem:[#allocation5 + $0x240] sm:$0xff] }
  0x98   :  { %1445 = vmatpush.msrb.mxu0 %v133_v60  ;;  %1465 = vmatpush.msrb.mxu1 %v645_v61  ;;  %v679_v59 = vld [vmem:[#allocation5 + $0x1240] sm:$0xff]  ;;  %v168_v60 = vld [vmem:[#allocation5 + $0x248] sm:$0xff] }
  0x99   :  { %1485 = vmatpush.msrb.mxu2 %v134_v62  ;;  %1505 = vmatpush.msrb.mxu3 %v646_v63  ;;  %v680_v61 = vld [vmem:[#allocation5 + $0x1248] sm:$0xff]  ;;  %v135_v62 = vld [vmem:[#allocation5 + $0x140] sm:$0xff] }
  0x9a   :  { %1446 = vmatpush.msrb.mxu0 %v101_v2  ;;  %1466 = vmatpush.msrb.mxu1 %v613_v3  ;;  %v647_v63 = vld [vmem:[#allocation5 + $0x1140] sm:$0xff]  ;;  %v136_v2 = vld [vmem:[#allocation5 + $0x148] sm:$0xff] }
  0x9b   :  { %1486 = vmatpush.msrb.mxu2 %v102_v4  ;;  %1506 = vmatpush.msrb.mxu3 %v614_v5  ;;  %v648_v3 = vld [vmem:[#allocation5 + $0x1148] sm:$0xff]  ;;  %v103_v4 = vld [vmem:[#allocation5 + $0x40] sm:$0xff] }
  0x9c   :  { %1367 = vmatmul.f32.vlgmr.msra.gmra.mxu0 %v3903_v0  ;;  %1387 = vmatmul.f32.vlgmr.msra.gmra.mxu1 %v3905_v1  ;;  %v615_v5 = vld [vmem:[#allocation5 + $0x1040] sm:$0xff] }
  0x9d   :  { %1407 = vmatmul.f32.vlgmr.msra.gmra.mxu2 %v3903_v0  ;;  %1427 = vmatmul.f32.vlgmr.msra.gmra.mxu3 %v3905_v1 }
  0x9e   :  { %1511 = vmatpush.msra.mxu0 %v583_v6  ;;  %1531 = vmatpush.msra.mxu1 %v1095_v7  ;;  %v104_v6 = vld [vmem:[#allocation5 + $0x48] sm:$0xff] }
  0x9f   :  { %1551 = vmatpush.msra.mxu2 %v584_v8  ;;  %1571 = vmatpush.msra.mxu3 %v1096_v9  ;;  %v616_v7 = vld [vmem:[#allocation5 + $0x1048] sm:$0xff]  ;;  %v585_v8 = vld [vmem:[#allocation5 + $0xf50] sm:$0xff] }
  0xa0   :  { %1512 = vmatpush.msra.mxu0 %v551_v10  ;;  %1532 = vmatpush.msra.mxu1 %v1063_v11  ;;  %v1097_v9 = vld [vmem:[#allocation5 + $0x1f50] sm:$0xff]  ;;  %v586_v10 = vld [vmem:[#allocation5 + $0xf58] sm:$0xff] }
  0xa1   :  { %1552 = vmatpush.msra.mxu2 %v552_v12  ;;  %1572 = vmatpush.msra.mxu3 %v1064_v13  ;;  %v1098_v11 = vld [vmem:[#allocation5 + $0x1f58] sm:$0xff]  ;;  %v553_v12 = vld [vmem:[#allocation5 + $0xe50] sm:$0xff] }
  0xa2   :  { %1513 = vmatpush.msra.mxu0 %v519_v14  ;;  %1533 = vmatpush.msra.mxu1 %v1031_v15  ;;  %v1065_v13 = vld [vmem:[#allocation5 + $0x1e50] sm:$0xff]  ;;  %v554_v14 = vld [vmem:[#allocation5 + $0xe58] sm:$0xff] }
  0xa3   :  { %1553 = vmatpush.msra.mxu2 %v520_v16  ;;  %1573 = vmatpush.msra.mxu3 %v1032_v17  ;;  %v1066_v15 = vld [vmem:[#allocation5 + $0x1e58] sm:$0xff]  ;;  %v521_v16 = vld [vmem:[#allocation5 + $0xd50] sm:$0xff] }
  0xa4   :  { %1514 = vmatpush.msra.mxu0 %v487_v18  ;;  %1534 = vmatpush.msra.mxu1 %v999_v19  ;;  %v1033_v17 = vld [vmem:[#allocation5 + $0x1d50] sm:$0xff]  ;;  %v522_v18 = vld [vmem:[#allocation5 + $0xd58] sm:$0xff] }
  0xa5   :  { %1554 = vmatpush.msra.mxu2 %v488_v20  ;;  %1574 = vmatpush.msra.mxu3 %v1000_v21  ;;  %v1034_v19 = vld [vmem:[#allocation5 + $0x1d58] sm:$0xff]  ;;  %v489_v20 = vld [vmem:[#allocation5 + $0xc50] sm:$0xff] }
  0xa6   :  { %1515 = vmatpush.msra.mxu0 %v455_v22  ;;  %1535 = vmatpush.msra.mxu1 %v967_v23  ;;  %v1002_v21 = vld [vmem:[#allocation5 + $0x1c58] sm:$0xff]  ;;  %v457_v22 = vld [vmem:[#allocation5 + $0xb50] sm:$0xff] }
  0xa7   :  { %1555 = vmatpush.msra.mxu2 %v456_v24  ;;  %1575 = vmatpush.msra.mxu3 %v968_v25  ;;  %v969_v23 = vld [vmem:[#allocation5 + $0x1b50] sm:$0xff]  ;;  %v458_v24 = vld [vmem:[#allocation5 + $0xb58] sm:$0xff] }
  0xa8   :  { %1516 = vmatpush.msra.mxu0 %v423_v26  ;;  %1536 = vmatpush.msra.mxu1 %v935_v27  ;;  %v970_v25 = vld [vmem:[#allocation5 + $0x1b58] sm:$0xff]  ;;  %v425_v26 = vld [vmem:[#allocation5 + $0xa50] sm:$0xff] }
  0xa9   :  { %1556 = vmatpush.msra.mxu2 %v424_v28  ;;  %1576 = vmatpush.msra.mxu3 %v936_v29  ;;  %v937_v27 = vld [vmem:[#allocation5 + $0x1a50] sm:$0xff]  ;;  %v426_v28 = vld [vmem:[#allocation5 + $0xa58] sm:$0xff] }
  0xaa   :  { %1517 = vmatpush.msra.mxu0 %v391_v30  ;;  %1537 = vmatpush.msra.mxu1 %v903_v31  ;;  %v938_v29 = vld [vmem:[#allocation5 + $0x1a58] sm:$0xff]  ;;  %v393_v30 = vld [vmem:[#allocation5 + $0x950] sm:$0xff] }
  0xab   :  { %1557 = vmatpush.msra.mxu2 %v392_v32  ;;  %1577 = vmatpush.msra.mxu3 %v904_v33  ;;  %v905_v31 = vld [vmem:[#allocation5 + $0x1950] sm:$0xff]  ;;  %v394_v32 = vld [vmem:[#allocation5 + $0x958] sm:$0xff] }
  0xac   :  { %1518 = vmatpush.msra.mxu0 %v359_v34  ;;  %1538 = vmatpush.msra.mxu1 %v871_v35  ;;  %v906_v33 = vld [vmem:[#allocation5 + $0x1958] sm:$0xff]  ;;  %v361_v34 = vld [vmem:[#allocation5 + $0x850] sm:$0xff] }
  0xad   :  { %1558 = vmatpush.msra.mxu2 %v360_v36  ;;  %1578 = vmatpush.msra.mxu3 %v872_v37  ;;  %v873_v35 = vld [vmem:[#allocation5 + $0x1850] sm:$0xff]  ;;  %v362_v36 = vld [vmem:[#allocation5 + $0x858] sm:$0xff] }
  0xae   :  { %1519 = vmatpush.msra.mxu0 %v327_v38  ;;  %1539 = vmatpush.msra.mxu1 %v839_v39  ;;  %v874_v37 = vld [vmem:[#allocation5 + $0x1858] sm:$0xff]  ;;  %v329_v38 = vld [vmem:[#allocation5 + $0x750] sm:$0xff] }
  0xaf   :  { %1559 = vmatpush.msra.mxu2 %v328_v40  ;;  %1579 = vmatpush.msra.mxu3 %v840_v41  ;;  %v841_v39 = vld [vmem:[#allocation5 + $0x1750] sm:$0xff]  ;;  %v330_v40 = vld [vmem:[#allocation5 + $0x758] sm:$0xff] }
  0xb0   :  { %1520 = vmatpush.msra.mxu0 %v295_v42  ;;  %1540 = vmatpush.msra.mxu1 %v807_v43  ;;  %v842_v41 = vld [vmem:[#allocation5 + $0x1758] sm:$0xff]  ;;  %v297_v42 = vld [vmem:[#allocation5 + $0x650] sm:$0xff] }
  0xb1   :  { %1560 = vmatpush.msra.mxu2 %v296_v44  ;;  %1580 = vmatpush.msra.mxu3 %v808_v45  ;;  %v809_v43 = vld [vmem:[#allocation5 + $0x1650] sm:$0xff]  ;;  %v298_v44 = vld [vmem:[#allocation5 + $0x658] sm:$0xff] }
  0xb2   :  { %1521 = vmatpush.msra.mxu0 %v263_v46  ;;  %1541 = vmatpush.msra.mxu1 %v775_v47  ;;  %v810_v45 = vld [vmem:[#allocation5 + $0x1658] sm:$0xff]  ;;  %v265_v46 = vld [vmem:[#allocation5 + $0x550] sm:$0xff] }
  0xb3   :  { %1561 = vmatpush.msra.mxu2 %v264_v48  ;;  %1581 = vmatpush.msra.mxu3 %v776_v49  ;;  %v777_v47 = vld [vmem:[#allocation5 + $0x1550] sm:$0xff]  ;;  %v266_v48 = vld [vmem:[#allocation5 + $0x558] sm:$0xff] }
  0xb4   :  { %1522 = vmatpush.msra.mxu0 %v231_v50  ;;  %1542 = vmatpush.msra.mxu1 %v743_v51  ;;  %v778_v49 = vld [vmem:[#allocation5 + $0x1558] sm:$0xff]  ;;  %v233_v50 = vld [vmem:[#allocation5 + $0x450] sm:$0xff] }
  0xb5   :  { %1562 = vmatpush.msra.mxu2 %v232_v52  ;;  %1582 = vmatpush.msra.mxu3 %v744_v53  ;;  %v745_v51 = vld [vmem:[#allocation5 + $0x1450] sm:$0xff]  ;;  %v234_v52 = vld [vmem:[#allocation5 + $0x458] sm:$0xff] }
  0xb6   :  { %1523 = vmatpush.msra.mxu0 %v199_v54  ;;  %1543 = vmatpush.msra.mxu1 %v711_v55  ;;  %v746_v53 = vld [vmem:[#allocation5 + $0x1458] sm:$0xff]  ;;  %v201_v54 = vld [vmem:[#allocation5 + $0x350] sm:$0xff] }
  0xb7   :  { %1563 = vmatpush.msra.mxu2 %v200_v56  ;;  %1583 = vmatpush.msra.mxu3 %v712_v57  ;;  %v713_v55 = vld [vmem:[#allocation5 + $0x1350] sm:$0xff]  ;;  %v202_v56 = vld [vmem:[#allocation5 + $0x358] sm:$0xff] }
  0xb8   :  { %1524 = vmatpush.msra.mxu0 %v167_v58  ;;  %1544 = vmatpush.msra.mxu1 %v679_v59  ;;  %v714_v57 = vld [vmem:[#allocation5 + $0x1358] sm:$0xff]  ;;  %v169_v58 = vld [vmem:[#allocation5 + $0x250] sm:$0xff] }
  0xb9   :  { %1564 = vmatpush.msra.mxu2 %v168_v60  ;;  %1584 = vmatpush.msra.mxu3 %v680_v61  ;;  %v681_v59 = vld [vmem:[#allocation5 + $0x1250] sm:$0xff]  ;;  %v170_v60 = vld [vmem:[#allocation5 + $0x258] sm:$0xff] }
  0xba   :  { %1525 = vmatpush.msra.mxu0 %v135_v62  ;;  %1545 = vmatpush.msra.mxu1 %v647_v63  ;;  %v682_v61 = vld [vmem:[#allocation5 + $0x1258] sm:$0xff]  ;;  %v137_v62 = vld [vmem:[#allocation5 + $0x150] sm:$0xff] }
  0xbb   :  { %1565 = vmatpush.msra.mxu2 %v136_v2  ;;  %1585 = vmatpush.msra.mxu3 %v648_v3  ;;  %v649_v63 = vld [vmem:[#allocation5 + $0x1150] sm:$0xff]  ;;  %v138_v2 = vld [vmem:[#allocation5 + $0x158] sm:$0xff] }
  0xbc   :  { %1526 = vmatpush.msra.mxu0 %v103_v4  ;;  %1546 = vmatpush.msra.mxu1 %v615_v5  ;;  %v650_v3 = vld [vmem:[#allocation5 + $0x1158] sm:$0xff]  ;;  %v105_v4 = vld [vmem:[#allocation5 + $0x50] sm:$0xff] }
  0xbd   :  { %1566 = vmatpush.msra.mxu2 %v104_v6  ;;  %1586 = vmatpush.msra.mxu3 %v616_v7  ;;  %v617_v5 = vld [vmem:[#allocation5 + $0x1050] sm:$0xff]  ;;  %v106_v6 = vld [vmem:[#allocation5 + $0x58] sm:$0xff] }
  0xbe   :  { %1447 = vmatmul.f32.vlgmr.msrb.gmra.mxu0 %v3903_v0  ;;  %1467 = vmatmul.f32.vlgmr.msrb.gmra.mxu1 %v3905_v1  ;;  %v618_v7 = vld [vmem:[#allocation5 + $0x1058] sm:$0xff] }
  0xbf   :  { %1487 = vmatmul.f32.vlgmr.msrb.gmra.mxu2 %v3903_v0  ;;  %1507 = vmatmul.f32.vlgmr.msrb.gmra.mxu3 %v3905_v1  ;;  %v1001_v0 = vld [vmem:[#allocation5 + $0x1c50] sm:$0xff]  ;;  %v490_v1 = vld [vmem:[#allocation5 + $0xc58] sm:$0xff] }
  0xc0   :  { %1591 = vmatpush.msrb.mxu0 %v585_v8  ;;  %1611 = vmatpush.msrb.mxu1 %v1097_v9  ;;  %v587_v8 = vld [vmem:[#allocation5 + $0xf60] sm:$0xff] }
  0xc1   :  { %1631 = vmatpush.msrb.mxu2 %v586_v10  ;;  %1651 = vmatpush.msrb.mxu3 %v1098_v11  ;;  %v1099_v9 = vld [vmem:[#allocation5 + $0x1f60] sm:$0xff]  ;;  %v3923_v10 = vld [vmem:[#allocation2] sm:$0xff]  ;;  %v3926_v11 = vld [vmem:[#allocation2 + $0x8] sm:$0xff] }
  0xc2   :  { %1592 = vmatpush.msrb.mxu0 %v553_v12  ;;  %1612 = vmatpush.msrb.mxu1 %v1065_v13  ;;  %v588_v12 = vld [vmem:[#allocation5 + $0xf68] sm:$0xff] }
  0xc3   :  { %1632 = vmatpush.msrb.mxu2 %v554_v14  ;;  %1652 = vmatpush.msrb.mxu3 %v1066_v15  ;;  %v1100_v13 = vld [vmem:[#allocation5 + $0x1f68] sm:$0xff]  ;;  %v555_v14 = vld [vmem:[#allocation5 + $0xe60] sm:$0xff] }
  0xc4   :  { %1593 = vmatpush.msrb.mxu0 %v521_v16  ;;  %1613 = vmatpush.msrb.mxu1 %v1033_v17  ;;  %v1067_v15 = vld [vmem:[#allocation5 + $0x1e60] sm:$0xff]  ;;  %v556_v16 = vld [vmem:[#allocation5 + $0xe68] sm:$0xff] }
  0xc5   :  { %1633 = vmatpush.msrb.mxu2 %v522_v18  ;;  %1653 = vmatpush.msrb.mxu3 %v1034_v19  ;;  %v1068_v17 = vld [vmem:[#allocation5 + $0x1e68] sm:$0xff]  ;;  %v523_v18 = vld [vmem:[#allocation5 + $0xd60] sm:$0xff] }
  0xc6   :  { %1594 = vmatpush.msrb.mxu0 %v489_v20  ;;  %1614 = vmatpush.msrb.mxu1 %v1001_v0  ;;  %v1035_v19 = vld [vmem:[#allocation5 + $0x1d60] sm:$0xff]  ;;  %v524_v20 = vld [vmem:[#allocation5 + $0xd68] sm:$0xff] }
  0xc7   :  { %1634 = vmatpush.msrb.mxu2 %v490_v1  ;;  %1654 = vmatpush.msrb.mxu3 %v1002_v21  ;;  %v1036_v0 = vld [vmem:[#allocation5 + $0x1d68] sm:$0xff]  ;;  %v491_v1 = vld [vmem:[#allocation5 + $0xc60] sm:$0xff] }
  0xc8   :  { %1595 = vmatpush.msrb.mxu0 %v457_v22  ;;  %1615 = vmatpush.msrb.mxu1 %v969_v23  ;;  %v1003_v21 = vld [vmem:[#allocation5 + $0x1c60] sm:$0xff]  ;;  %v492_v22 = vld [vmem:[#allocation5 + $0xc68] sm:$0xff] }
  0xc9   :  { %1635 = vmatpush.msrb.mxu2 %v458_v24  ;;  %1655 = vmatpush.msrb.mxu3 %v970_v25  ;;  %v1004_v23 = vld [vmem:[#allocation5 + $0x1c68] sm:$0xff]  ;;  %v459_v24 = vld [vmem:[#allocation5 + $0xb60] sm:$0xff] }
  0xca   :  { %1596 = vmatpush.msrb.mxu0 %v425_v26  ;;  %1616 = vmatpush.msrb.mxu1 %v937_v27  ;;  %v971_v25 = vld [vmem:[#allocation5 + $0x1b60] sm:$0xff]  ;;  %v460_v26 = vld [vmem:[#allocation5 + $0xb68] sm:$0xff] }
  0xcb   :  { %1636 = vmatpush.msrb.mxu2 %v426_v28  ;;  %1656 = vmatpush.msrb.mxu3 %v938_v29  ;;  %v972_v27 = vld [vmem:[#allocation5 + $0x1b68] sm:$0xff]  ;;  %v427_v28 = vld [vmem:[#allocation5 + $0xa60] sm:$0xff] }
  0xcc   :  { %1597 = vmatpush.msrb.mxu0 %v393_v30  ;;  %1617 = vmatpush.msrb.mxu1 %v905_v31  ;;  %v939_v29 = vld [vmem:[#allocation5 + $0x1a60] sm:$0xff]  ;;  %v428_v30 = vld [vmem:[#allocation5 + $0xa68] sm:$0xff] }
  0xcd   :  { %1637 = vmatpush.msrb.mxu2 %v394_v32  ;;  %1657 = vmatpush.msrb.mxu3 %v906_v33  ;;  %v940_v31 = vld [vmem:[#allocation5 + $0x1a68] sm:$0xff]  ;;  %v395_v32 = vld [vmem:[#allocation5 + $0x960] sm:$0xff] }
  0xce   :  { %1598 = vmatpush.msrb.mxu0 %v361_v34  ;;  %1618 = vmatpush.msrb.mxu1 %v873_v35  ;;  %v907_v33 = vld [vmem:[#allocation5 + $0x1960] sm:$0xff]  ;;  %v396_v34 = vld [vmem:[#allocation5 + $0x968] sm:$0xff] }
  0xcf   :  { %1638 = vmatpush.msrb.mxu2 %v362_v36  ;;  %1658 = vmatpush.msrb.mxu3 %v874_v37  ;;  %v908_v35 = vld [vmem:[#allocation5 + $0x1968] sm:$0xff]  ;;  %v363_v36 = vld [vmem:[#allocation5 + $0x860] sm:$0xff] }
  0xd0   :  { %1599 = vmatpush.msrb.mxu0 %v329_v38  ;;  %1619 = vmatpush.msrb.mxu1 %v841_v39  ;;  %v875_v37 = vld [vmem:[#allocation5 + $0x1860] sm:$0xff]  ;;  %v364_v38 = vld [vmem:[#allocation5 + $0x868] sm:$0xff] }
  0xd1   :  { %1639 = vmatpush.msrb.mxu2 %v330_v40  ;;  %1659 = vmatpush.msrb.mxu3 %v842_v41  ;;  %v876_v39 = vld [vmem:[#allocation5 + $0x1868] sm:$0xff]  ;;  %v331_v40 = vld [vmem:[#allocation5 + $0x760] sm:$0xff] }
  0xd2   :  { %1600 = vmatpush.msrb.mxu0 %v297_v42  ;;  %1620 = vmatpush.msrb.mxu1 %v809_v43  ;;  %v843_v41 = vld [vmem:[#allocation5 + $0x1760] sm:$0xff]  ;;  %v332_v42 = vld [vmem:[#allocation5 + $0x768] sm:$0xff] }
  0xd3   :  { %1640 = vmatpush.msrb.mxu2 %v298_v44  ;;  %1660 = vmatpush.msrb.mxu3 %v810_v45  ;;  %v844_v43 = vld [vmem:[#allocation5 + $0x1768] sm:$0xff]  ;;  %v299_v44 = vld [vmem:[#allocation5 + $0x660] sm:$0xff] }
  0xd4   :  { %1601 = vmatpush.msrb.mxu0 %v265_v46  ;;  %1621 = vmatpush.msrb.mxu1 %v777_v47  ;;  %v811_v45 = vld [vmem:[#allocation5 + $0x1660] sm:$0xff]  ;;  %v300_v46 = vld [vmem:[#allocation5 + $0x668] sm:$0xff] }
  0xd5   :  { %1641 = vmatpush.msrb.mxu2 %v266_v48  ;;  %1661 = vmatpush.msrb.mxu3 %v778_v49  ;;  %v812_v47 = vld [vmem:[#allocation5 + $0x1668] sm:$0xff]  ;;  %v267_v48 = vld [vmem:[#allocation5 + $0x560] sm:$0xff] }
  0xd6   :  { %1602 = vmatpush.msrb.mxu0 %v233_v50  ;;  %1622 = vmatpush.msrb.mxu1 %v745_v51  ;;  %v779_v49 = vld [vmem:[#allocation5 + $0x1560] sm:$0xff]  ;;  %v268_v50 = vld [vmem:[#allocation5 + $0x568] sm:$0xff] }
  0xd7   :  { %1642 = vmatpush.msrb.mxu2 %v234_v52  ;;  %1662 = vmatpush.msrb.mxu3 %v746_v53  ;;  %v780_v51 = vld [vmem:[#allocation5 + $0x1568] sm:$0xff]  ;;  %v235_v52 = vld [vmem:[#allocation5 + $0x460] sm:$0xff] }
  0xd8   :  { %1603 = vmatpush.msrb.mxu0 %v201_v54  ;;  %1623 = vmatpush.msrb.mxu1 %v713_v55  ;;  %v747_v53 = vld [vmem:[#allocation5 + $0x1460] sm:$0xff]  ;;  %v236_v54 = vld [vmem:[#allocation5 + $0x468] sm:$0xff] }
  0xd9   :  { %1643 = vmatpush.msrb.mxu2 %v202_v56  ;;  %1663 = vmatpush.msrb.mxu3 %v714_v57  ;;  %v748_v55 = vld [vmem:[#allocation5 + $0x1468] sm:$0xff]  ;;  %v203_v56 = vld [vmem:[#allocation5 + $0x360] sm:$0xff] }
  0xda   :  { %1604 = vmatpush.msrb.mxu0 %v169_v58  ;;  %1624 = vmatpush.msrb.mxu1 %v681_v59  ;;  %v715_v57 = vld [vmem:[#allocation5 + $0x1360] sm:$0xff]  ;;  %v204_v58 = vld [vmem:[#allocation5 + $0x368] sm:$0xff] }
  0xdb   :  { %1644 = vmatpush.msrb.mxu2 %v170_v60  ;;  %1664 = vmatpush.msrb.mxu3 %v682_v61  ;;  %v716_v59 = vld [vmem:[#allocation5 + $0x1368] sm:$0xff]  ;;  %v171_v60 = vld [vmem:[#allocation5 + $0x260] sm:$0xff] }
  0xdc   :  { %1605 = vmatpush.msrb.mxu0 %v137_v62  ;;  %1625 = vmatpush.msrb.mxu1 %v649_v63  ;;  %v683_v61 = vld [vmem:[#allocation5 + $0x1260] sm:$0xff]  ;;  %v172_v62 = vld [vmem:[#allocation5 + $0x268] sm:$0xff] }
  0xdd   :  { %1645 = vmatpush.msrb.mxu2 %v138_v2  ;;  %1665 = vmatpush.msrb.mxu3 %v650_v3  ;;  %v684_v63 = vld [vmem:[#allocation5 + $0x1268] sm:$0xff]  ;;  %v139_v2 = vld [vmem:[#allocation5 + $0x160] sm:$0xff] }
  0xde   :  { %1606 = vmatpush.msrb.mxu0 %v105_v4  ;;  %1626 = vmatpush.msrb.mxu1 %v617_v5  ;;  %v651_v3 = vld [vmem:[#allocation5 + $0x1160] sm:$0xff]  ;;  %v140_v4 = vld [vmem:[#allocation5 + $0x168] sm:$0xff] }
  0xdf   :  { %1646 = vmatpush.msrb.mxu2 %v106_v6  ;;  %1666 = vmatpush.msrb.mxu3 %v618_v7  ;;  %v652_v5 = vld [vmem:[#allocation5 + $0x1168] sm:$0xff]  ;;  %v107_v6 = vld [vmem:[#allocation5 + $0x60] sm:$0xff] }
  0xe0   :  { %1527 = vmatmul.f32.vlgmr.msra.gmra.mxu0 %v3923_v10  ;;  %1547 = vmatmul.f32.vlgmr.msra.gmra.mxu1 %v3926_v11  ;;  %v619_v7 = vld [vmem:[#allocation5 + $0x1060] sm:$0xff] }
  0xe1   :  { %1567 = vmatmul.f32.vlgmr.msra.gmra.mxu2 %v3923_v10  ;;  %1587 = vmatmul.f32.vlgmr.msra.gmra.mxu3 %v3926_v11 }
  0xe2   :  { %1671 = vmatpush.msra.mxu0 %v587_v8  ;;  %1691 = vmatpush.msra.mxu1 %v1099_v9  ;;  %v108_v8 = vld [vmem:[#allocation5 + $0x68] sm:$0xff] }
  0xe3   :  { %1711 = vmatpush.msra.mxu2 %v588_v12  ;;  %1731 = vmatpush.msra.mxu3 %v1100_v13  ;;  %v620_v9 = vld [vmem:[#allocation5 + $0x1068] sm:$0xff]  ;;  %v589_v12 = vld [vmem:[#allocation5 + $0xf70] sm:$0xff] }
  0xe4   :  { %1672 = vmatpush.msra.mxu0 %v555_v14  ;;  %1692 = vmatpush.msra.mxu1 %v1067_v15  ;;  %v1101_v13 = vld [vmem:[#allocation5 + $0x1f70] sm:$0xff]  ;;  %v590_v14 = vld [vmem:[#allocation5 + $0xf78] sm:$0xff] }
  0xe5   :  { %1712 = vmatpush.msra.mxu2 %v556_v16  ;;  %1732 = vmatpush.msra.mxu3 %v1068_v17  ;;  %v1102_v15 = vld [vmem:[#allocation5 + $0x1f78] sm:$0xff]  ;;  %v557_v16 = vld [vmem:[#allocation5 + $0xe70] sm:$0xff] }
  0xe6   :  { %1673 = vmatpush.msra.mxu0 %v523_v18  ;;  %1693 = vmatpush.msra.mxu1 %v1035_v19  ;;  %v1069_v17 = vld [vmem:[#allocation5 + $0x1e70] sm:$0xff]  ;;  %v558_v18 = vld [vmem:[#allocation5 + $0xe78] sm:$0xff] }
  0xe7   :  { %1713 = vmatpush.msra.mxu2 %v524_v20  ;;  %1733 = vmatpush.msra.mxu3 %v1036_v0  ;;  %v1070_v19 = vld [vmem:[#allocation5 + $0x1e78] sm:$0xff]  ;;  %v525_v20 = vld [vmem:[#allocation5 + $0xd70] sm:$0xff] }
  0xe8   :  { %1674 = vmatpush.msra.mxu0 %v491_v1  ;;  %1694 = vmatpush.msra.mxu1 %v1003_v21  ;;  %v1037_v0 = vld [vmem:[#allocation5 + $0x1d70] sm:$0xff]  ;;  %v526_v1 = vld [vmem:[#allocation5 + $0xd78] sm:$0xff] }
  0xe9   :  { %1714 = vmatpush.msra.mxu2 %v492_v22  ;;  %1734 = vmatpush.msra.mxu3 %v1004_v23  ;;  %v1038_v21 = vld [vmem:[#allocation5 + $0x1d78] sm:$0xff]  ;;  %v493_v22 = vld [vmem:[#allocation5 + $0xc70] sm:$0xff] }
  0xea   :  { %1675 = vmatpush.msra.mxu0 %v459_v24  ;;  %1695 = vmatpush.msra.mxu1 %v971_v25  ;;  %v1005_v23 = vld [vmem:[#allocation5 + $0x1c70] sm:$0xff]  ;;  %v494_v24 = vld [vmem:[#allocation5 + $0xc78] sm:$0xff] }
  0xeb   :  { %1715 = vmatpush.msra.mxu2 %v460_v26  ;;  %1735 = vmatpush.msra.mxu3 %v972_v27  ;;  %v1006_v25 = vld [vmem:[#allocation5 + $0x1c78] sm:$0xff]  ;;  %v461_v26 = vld [vmem:[#allocation5 + $0xb70] sm:$0xff] }
  0xec   :  { %1676 = vmatpush.msra.mxu0 %v427_v28  ;;  %1696 = vmatpush.msra.mxu1 %v939_v29  ;;  %v973_v27 = vld [vmem:[#allocation5 + $0x1b70] sm:$0xff]  ;;  %v462_v28 = vld [vmem:[#allocation5 + $0xb78] sm:$0xff] }
  0xed   :  { %1716 = vmatpush.msra.mxu2 %v428_v30  ;;  %1736 = vmatpush.msra.mxu3 %v940_v31  ;;  %v974_v29 = vld [vmem:[#allocation5 + $0x1b78] sm:$0xff]  ;;  %v429_v30 = vld [vmem:[#allocation5 + $0xa70] sm:$0xff] }
  0xee   :  { %1677 = vmatpush.msra.mxu0 %v395_v32  ;;  %1697 = vmatpush.msra.mxu1 %v907_v33  ;;  %v941_v31 = vld [vmem:[#allocation5 + $0x1a70] sm:$0xff]  ;;  %v430_v32 = vld [vmem:[#allocation5 + $0xa78] sm:$0xff] }
  0xef   :  { %1717 = vmatpush.msra.mxu2 %v396_v34  ;;  %1737 = vmatpush.msra.mxu3 %v908_v35  ;;  %v942_v33 = vld [vmem:[#allocation5 + $0x1a78] sm:$0xff]  ;;  %v397_v34 = vld [vmem:[#allocation5 + $0x970] sm:$0xff] }
  0xf0   :  { %1678 = vmatpush.msra.mxu0 %v363_v36  ;;  %1698 = vmatpush.msra.mxu1 %v875_v37  ;;  %v909_v35 = vld [vmem:[#allocation5 + $0x1970] sm:$0xff]  ;;  %v398_v36 = vld [vmem:[#allocation5 + $0x978] sm:$0xff] }
  0xf1   :  { %1718 = vmatpush.msra.mxu2 %v364_v38  ;;  %1738 = vmatpush.msra.mxu3 %v876_v39  ;;  %v910_v37 = vld [vmem:[#allocation5 + $0x1978] sm:$0xff]  ;;  %v365_v38 = vld [vmem:[#allocation5 + $0x870] sm:$0xff] }
  0xf2   :  { %1679 = vmatpush.msra.mxu0 %v331_v40  ;;  %1699 = vmatpush.msra.mxu1 %v843_v41  ;;  %v877_v39 = vld [vmem:[#allocation5 + $0x1870] sm:$0xff]  ;;  %v366_v40 = vld [vmem:[#allocation5 + $0x878] sm:$0xff] }
  0xf3   :  { %1719 = vmatpush.msra.mxu2 %v332_v42  ;;  %1739 = vmatpush.msra.mxu3 %v844_v43  ;;  %v878_v41 = vld [vmem:[#allocation5 + $0x1878] sm:$0xff]  ;;  %v333_v42 = vld [vmem:[#allocation5 + $0x770] sm:$0xff] }
  0xf4   :  { %1680 = vmatpush.msra.mxu0 %v299_v44  ;;  %1700 = vmatpush.msra.mxu1 %v811_v45  ;;  %v845_v43 = vld [vmem:[#allocation5 + $0x1770] sm:$0xff]  ;;  %v334_v44 = vld [vmem:[#allocation5 + $0x778] sm:$0xff] }
  0xf5   :  { %1720 = vmatpush.msra.mxu2 %v300_v46  ;;  %1740 = vmatpush.msra.mxu3 %v812_v47  ;;  %v846_v45 = vld [vmem:[#allocation5 + $0x1778] sm:$0xff]  ;;  %v301_v46 = vld [vmem:[#allocation5 + $0x670] sm:$0xff] }
  0xf6   :  { %1681 = vmatpush.msra.mxu0 %v267_v48  ;;  %1701 = vmatpush.msra.mxu1 %v779_v49  ;;  %v813_v47 = vld [vmem:[#allocation5 + $0x1670] sm:$0xff]  ;;  %v302_v48 = vld [vmem:[#allocation5 + $0x678] sm:$0xff] }
  0xf7   :  { %1721 = vmatpush.msra.mxu2 %v268_v50  ;;  %1741 = vmatpush.msra.mxu3 %v780_v51  ;;  %v814_v49 = vld [vmem:[#allocation5 + $0x1678] sm:$0xff]  ;;  %v269_v50 = vld [vmem:[#allocation5 + $0x570] sm:$0xff] }
  0xf8   :  { %1682 = vmatpush.msra.mxu0 %v235_v52  ;;  %1702 = vmatpush.msra.mxu1 %v747_v53  ;;  %v781_v51 = vld [vmem:[#allocation5 + $0x1570] sm:$0xff]  ;;  %v270_v52 = vld [vmem:[#allocation5 + $0x578] sm:$0xff] }
  0xf9   :  { %1722 = vmatpush.msra.mxu2 %v236_v54  ;;  %1742 = vmatpush.msra.mxu3 %v748_v55  ;;  %v782_v53 = vld [vmem:[#allocation5 + $0x1578] sm:$0xff]  ;;  %v237_v54 = vld [vmem:[#allocation5 + $0x470] sm:$0xff] }
  0xfa   :  { %1683 = vmatpush.msra.mxu0 %v203_v56  ;;  %1703 = vmatpush.msra.mxu1 %v715_v57  ;;  %v749_v55 = vld [vmem:[#allocation5 + $0x1470] sm:$0xff]  ;;  %v238_v56 = vld [vmem:[#allocation5 + $0x478] sm:$0xff] }
  0xfb   :  { %1723 = vmatpush.msra.mxu2 %v204_v58  ;;  %1743 = vmatpush.msra.mxu3 %v716_v59  ;;  %v750_v57 = vld [vmem:[#allocation5 + $0x1478] sm:$0xff]  ;;  %v205_v58 = vld [vmem:[#allocation5 + $0x370] sm:$0xff] }
  0xfc   :  { %1684 = vmatpush.msra.mxu0 %v171_v60  ;;  %1704 = vmatpush.msra.mxu1 %v683_v61  ;;  %v717_v59 = vld [vmem:[#allocation5 + $0x1370] sm:$0xff]  ;;  %v206_v60 = vld [vmem:[#allocation5 + $0x378] sm:$0xff] }
  0xfd   :  { %1724 = vmatpush.msra.mxu2 %v172_v62  ;;  %1744 = vmatpush.msra.mxu3 %v684_v63  ;;  %v718_v61 = vld [vmem:[#allocation5 + $0x1378] sm:$0xff]  ;;  %v173_v62 = vld [vmem:[#allocation5 + $0x270] sm:$0xff] }
  0xfe   :  { %1685 = vmatpush.msra.mxu0 %v139_v2  ;;  %1705 = vmatpush.msra.mxu1 %v651_v3  ;;  %v685_v63 = vld [vmem:[#allocation5 + $0x1270] sm:$0xff]  ;;  %v174_v2 = vld [vmem:[#allocation5 + $0x278] sm:$0xff] }
  0xff   :  { %1725 = vmatpush.msra.mxu2 %v140_v4  ;;  %1745 = vmatpush.msra.mxu3 %v652_v5  ;;  %v686_v3 = vld [vmem:[#allocation5 + $0x1278] sm:$0xff]  ;;  %v141_v4 = vld [vmem:[#allocation5 + $0x170] sm:$0xff] }
 0x100   :  { %1686 = vmatpush.msra.mxu0 %v107_v6  ;;  %1706 = vmatpush.msra.mxu1 %v619_v7  ;;  %v653_v5 = vld [vmem:[#allocation5 + $0x1170] sm:$0xff]  ;;  %v142_v6 = vld [vmem:[#allocation5 + $0x178] sm:$0xff] }
 0x101   :  { %1726 = vmatpush.msra.mxu2 %v108_v8  ;;  %1746 = vmatpush.msra.mxu3 %v620_v9  ;;  %v654_v7 = vld [vmem:[#allocation5 + $0x1178] sm:$0xff]  ;;  %v109_v8 = vld [vmem:[#allocation5 + $0x70] sm:$0xff] }
 0x102   :  { %1607 = vmatmul.f32.vlgmr.msrb.gmra.mxu0 %v3923_v10  ;;  %1627 = vmatmul.f32.vlgmr.msrb.gmra.mxu1 %v3926_v11  ;;  %v621_v9 = vld [vmem:[#allocation5 + $0x1070] sm:$0xff] }
 0x103   :  { %1647 = vmatmul.f32.vlgmr.msrb.gmra.mxu2 %v3923_v10  ;;  %1667 = vmatmul.f32.vlgmr.msrb.gmra.mxu3 %v3926_v11 }
 0x104   :  { %1751 = vmatpush.msrb.mxu0 %v589_v12  ;;  %1771 = vmatpush.msrb.mxu1 %v1101_v13  ;;  %v110_v12 = vld [vmem:[#allocation5 + $0x78] sm:$0xff] }
 0x105   :  { %1791 = vmatpush.msrb.mxu2 %v590_v14  ;;  %1811 = vmatpush.msrb.mxu3 %v1102_v15  ;;  %v622_v13 = vld [vmem:[#allocation5 + $0x1078] sm:$0xff]  ;;  %v591_v14 = vld [vmem:[#allocation5 + $0xf80] sm:$0xff] }
 0x106   :  { %1752 = vmatpush.msrb.mxu0 %v557_v16  ;;  %1772 = vmatpush.msrb.mxu1 %v1069_v17  ;;  %v1103_v15 = vld [vmem:[#allocation5 + $0x1f80] sm:$0xff]  ;;  %v592_v16 = vld [vmem:[#allocation5 + $0xf88] sm:$0xff] }
 0x107   :  { %1792 = vmatpush.msrb.mxu2 %v558_v18  ;;  %1812 = vmatpush.msrb.mxu3 %v1070_v19  ;;  %v1104_v17 = vld [vmem:[#allocation5 + $0x1f88] sm:$0xff]  ;;  %v559_v18 = vld [vmem:[#allocation5 + $0xe80] sm:$0xff] }
 0x108   :  { %1753 = vmatpush.msrb.mxu0 %v525_v20  ;;  %1773 = vmatpush.msrb.mxu1 %v1037_v0  ;;  %v1071_v19 = vld [vmem:[#allocation5 + $0x1e80] sm:$0xff]  ;;  %v560_v20 = vld [vmem:[#allocation5 + $0xe88] sm:$0xff] }
 0x109   :  { %1793 = vmatpush.msrb.mxu2 %v526_v1  ;;  %1813 = vmatpush.msrb.mxu3 %v1038_v21  ;;  %v1072_v0 = vld [vmem:[#allocation5 + $0x1e88] sm:$0xff]  ;;  %v527_v1 = vld [vmem:[#allocation5 + $0xd80] sm:$0xff] }
 0x10a   :  { %1754 = vmatpush.msrb.mxu0 %v493_v22  ;;  %1774 = vmatpush.msrb.mxu1 %v1005_v23  ;;  %v1039_v21 = vld [vmem:[#allocation5 + $0x1d80] sm:$0xff]  ;;  %v528_v22 = vld [vmem:[#allocation5 + $0xd88] sm:$0xff] }
 0x10b   :  { %1794 = vmatpush.msrb.mxu2 %v494_v24  ;;  %1814 = vmatpush.msrb.mxu3 %v1006_v25  ;;  %v1040_v23 = vld [vmem:[#allocation5 + $0x1d88] sm:$0xff]  ;;  %v495_v24 = vld [vmem:[#allocation5 + $0xc80] sm:$0xff] }
 0x10c   :  { %1755 = vmatpush.msrb.mxu0 %v461_v26  ;;  %1775 = vmatpush.msrb.mxu1 %v973_v27  ;;  %v1007_v25 = vld [vmem:[#allocation5 + $0x1c80] sm:$0xff]  ;;  %v496_v26 = vld [vmem:[#allocation5 + $0xc88] sm:$0xff] }
 0x10d   :  { %1795 = vmatpush.msrb.mxu2 %v462_v28  ;;  %1815 = vmatpush.msrb.mxu3 %v974_v29  ;;  %v1008_v27 = vld [vmem:[#allocation5 + $0x1c88] sm:$0xff]  ;;  %v463_v28 = vld [vmem:[#allocation5 + $0xb80] sm:$0xff] }
 0x10e   :  { %1756 = vmatpush.msrb.mxu0 %v429_v30  ;;  %1776 = vmatpush.msrb.mxu1 %v941_v31  ;;  %v975_v29 = vld [vmem:[#allocation5 + $0x1b80] sm:$0xff]  ;;  %v464_v30 = vld [vmem:[#allocation5 + $0xb88] sm:$0xff] }
 0x10f   :  { %1796 = vmatpush.msrb.mxu2 %v430_v32  ;;  %1816 = vmatpush.msrb.mxu3 %v942_v33  ;;  %v976_v31 = vld [vmem:[#allocation5 + $0x1b88] sm:$0xff]  ;;  %v431_v32 = vld [vmem:[#allocation5 + $0xa80] sm:$0xff] }
 0x110   :  { %1757 = vmatpush.msrb.mxu0 %v397_v34  ;;  %1777 = vmatpush.msrb.mxu1 %v909_v35  ;;  %v943_v33 = vld [vmem:[#allocation5 + $0x1a80] sm:$0xff]  ;;  %v432_v34 = vld [vmem:[#allocation5 + $0xa88] sm:$0xff] }
 0x111   :  { %1797 = vmatpush.msrb.mxu2 %v398_v36  ;;  %1817 = vmatpush.msrb.mxu3 %v910_v37  ;;  %v944_v35 = vld [vmem:[#allocation5 + $0x1a88] sm:$0xff]  ;;  %v399_v36 = vld [vmem:[#allocation5 + $0x980] sm:$0xff] }
 0x112   :  { %1758 = vmatpush.msrb.mxu0 %v365_v38  ;;  %1778 = vmatpush.msrb.mxu1 %v877_v39  ;;  %v911_v37 = vld [vmem:[#allocation5 + $0x1980] sm:$0xff]  ;;  %v400_v38 = vld [vmem:[#allocation5 + $0x988] sm:$0xff] }
 0x113   :  { %1798 = vmatpush.msrb.mxu2 %v366_v40  ;;  %1818 = vmatpush.msrb.mxu3 %v878_v41  ;;  %v912_v39 = vld [vmem:[#allocation5 + $0x1988] sm:$0xff]  ;;  %v367_v40 = vld [vmem:[#allocation5 + $0x880] sm:$0xff] }
 0x114   :  { %1759 = vmatpush.msrb.mxu0 %v333_v42  ;;  %1779 = vmatpush.msrb.mxu1 %v845_v43  ;;  %v879_v41 = vld [vmem:[#allocation5 + $0x1880] sm:$0xff]  ;;  %v368_v42 = vld [vmem:[#allocation5 + $0x888] sm:$0xff] }
 0x115   :  { %1799 = vmatpush.msrb.mxu2 %v334_v44  ;;  %1819 = vmatpush.msrb.mxu3 %v846_v45  ;;  %v880_v43 = vld [vmem:[#allocation5 + $0x1888] sm:$0xff]  ;;  %v335_v44 = vld [vmem:[#allocation5 + $0x780] sm:$0xff] }
 0x116   :  { %1760 = vmatpush.msrb.mxu0 %v301_v46  ;;  %1780 = vmatpush.msrb.mxu1 %v813_v47  ;;  %v847_v45 = vld [vmem:[#allocation5 + $0x1780] sm:$0xff]  ;;  %v336_v46 = vld [vmem:[#allocation5 + $0x788] sm:$0xff] }
 0x117   :  { %1800 = vmatpush.msrb.mxu2 %v302_v48  ;;  %1820 = vmatpush.msrb.mxu3 %v814_v49  ;;  %v848_v47 = vld [vmem:[#allocation5 + $0x1788] sm:$0xff]  ;;  %v303_v48 = vld [vmem:[#allocation5 + $0x680] sm:$0xff] }
 0x118   :  { %1761 = vmatpush.msrb.mxu0 %v269_v50  ;;  %1781 = vmatpush.msrb.mxu1 %v781_v51  ;;  %v815_v49 = vld [vmem:[#allocation5 + $0x1680] sm:$0xff]  ;;  %v304_v50 = vld [vmem:[#allocation5 + $0x688] sm:$0xff] }
 0x119   :  { %1801 = vmatpush.msrb.mxu2 %v270_v52  ;;  %1821 = vmatpush.msrb.mxu3 %v782_v53  ;;  %v816_v51 = vld [vmem:[#allocation5 + $0x1688] sm:$0xff]  ;;  %v271_v52 = vld [vmem:[#allocation5 + $0x580] sm:$0xff] }
 0x11a   :  { %1762 = vmatpush.msrb.mxu0 %v237_v54  ;;  %1782 = vmatpush.msrb.mxu1 %v749_v55  ;;  %v783_v53 = vld [vmem:[#allocation5 + $0x1580] sm:$0xff]  ;;  %v272_v54 = vld [vmem:[#allocation5 + $0x588] sm:$0xff] }
 0x11b   :  { %1802 = vmatpush.msrb.mxu2 %v238_v56  ;;  %1822 = vmatpush.msrb.mxu3 %v750_v57  ;;  %v784_v55 = vld [vmem:[#allocation5 + $0x1588] sm:$0xff]  ;;  %v239_v56 = vld [vmem:[#allocation5 + $0x480] sm:$0xff] }
 0x11c   :  { %1763 = vmatpush.msrb.mxu0 %v205_v58  ;;  %1783 = vmatpush.msrb.mxu1 %v717_v59  ;;  %v751_v57 = vld [vmem:[#allocation5 + $0x1480] sm:$0xff]  ;;  %v240_v58 = vld [vmem:[#allocation5 + $0x488] sm:$0xff] }
 0x11d   :  { %1803 = vmatpush.msrb.mxu2 %v206_v60  ;;  %1823 = vmatpush.msrb.mxu3 %v718_v61  ;;  %v752_v59 = vld [vmem:[#allocation5 + $0x1488] sm:$0xff]  ;;  %v207_v60 = vld [vmem:[#allocation5 + $0x380] sm:$0xff] }
 0x11e   :  { %1764 = vmatpush.msrb.mxu0 %v173_v62  ;;  %1784 = vmatpush.msrb.mxu1 %v685_v63  ;;  %v719_v61 = vld [vmem:[#allocation5 + $0x1380] sm:$0xff]  ;;  %v208_v62 = vld [vmem:[#allocation5 + $0x388] sm:$0xff] }
 0x11f   :  { %1804 = vmatpush.msrb.mxu2 %v174_v2  ;;  %1824 = vmatpush.msrb.mxu3 %v686_v3  ;;  %v720_v63 = vld [vmem:[#allocation5 + $0x1388] sm:$0xff]  ;;  %v175_v2 = vld [vmem:[#allocation5 + $0x280] sm:$0xff] }
 0x120   :  { %1765 = vmatpush.msrb.mxu0 %v141_v4  ;;  %1785 = vmatpush.msrb.mxu1 %v653_v5  ;;  %v687_v3 = vld [vmem:[#allocation5 + $0x1280] sm:$0xff]  ;;  %v176_v4 = vld [vmem:[#allocation5 + $0x288] sm:$0xff] }
 0x121   :  { %1805 = vmatpush.msrb.mxu2 %v142_v6  ;;  %1825 = vmatpush.msrb.mxu3 %v654_v7  ;;  %v688_v5 = vld [vmem:[#allocation5 + $0x1288] sm:$0xff]  ;;  %v143_v6 = vld [vmem:[#allocation5 + $0x180] sm:$0xff] }
 0x122   :  { %1766 = vmatpush.msrb.mxu0 %v109_v8  ;;  %1786 = vmatpush.msrb.mxu1 %v621_v9  ;;  %v655_v7 = vld [vmem:[#allocation5 + $0x1180] sm:$0xff]  ;;  %v144_v8 = vld [vmem:[#allocation5 + $0x188] sm:$0xff] }
 0x123   :  { %1806 = vmatpush.msrb.mxu2 %v110_v12  ;;  %1826 = vmatpush.msrb.mxu3 %v622_v13  ;;  %v656_v9 = vld [vmem:[#allocation5 + $0x1188] sm:$0xff]  ;;  %v111_v12 = vld [vmem:[#allocation5 + $0x80] sm:$0xff] }
 0x124   :  { %1687 = vmatmul.f32.vlgmr.msra.gmra.mxu0 %v3923_v10  ;;  %1707 = vmatmul.f32.vlgmr.msra.gmra.mxu1 %v3926_v11  ;;  %v623_v13 = vld [vmem:[#allocation5 + $0x1080] sm:$0xff] }
 0x125   :  { %1727 = vmatmul.f32.vlgmr.msra.gmra.mxu2 %v3923_v10  ;;  %1747 = vmatmul.f32.vlgmr.msra.gmra.mxu3 %v3926_v11 }
 0x126   :  { %1831 = vmatpush.msra.mxu0 %v591_v14  ;;  %1851 = vmatpush.msra.mxu1 %v1103_v15  ;;  %v112_v14 = vld [vmem:[#allocation5 + $0x88] sm:$0xff] }
 0x127   :  { %1871 = vmatpush.msra.mxu2 %v592_v16  ;;  %1891 = vmatpush.msra.mxu3 %v1104_v17  ;;  %v624_v15 = vld [vmem:[#allocation5 + $0x1088] sm:$0xff]  ;;  %v593_v16 = vld [vmem:[#allocation5 + $0xf90] sm:$0xff] }
 0x128   :  { %1832 = vmatpush.msra.mxu0 %v559_v18  ;;  %1852 = vmatpush.msra.mxu1 %v1071_v19  ;;  %v1105_v17 = vld [vmem:[#allocation5 + $0x1f90] sm:$0xff]  ;;  %v594_v18 = vld [vmem:[#allocation5 + $0xf98] sm:$0xff] }
 0x129   :  { %1872 = vmatpush.msra.mxu2 %v560_v20  ;;  %1892 = vmatpush.msra.mxu3 %v1072_v0  ;;  %v1106_v19 = vld [vmem:[#allocation5 + $0x1f98] sm:$0xff]  ;;  %v561_v20 = vld [vmem:[#allocation5 + $0xe90] sm:$0xff] }
 0x12a   :  { %1833 = vmatpush.msra.mxu0 %v527_v1  ;;  %1853 = vmatpush.msra.mxu1 %v1039_v21  ;;  %v1073_v0 = vld [vmem:[#allocation5 + $0x1e90] sm:$0xff]  ;;  %v562_v1 = vld [vmem:[#allocation5 + $0xe98] sm:$0xff] }
 0x12b   :  { %1873 = vmatpush.msra.mxu2 %v528_v22  ;;  %1893 = vmatpush.msra.mxu3 %v1040_v23  ;;  %v1074_v21 = vld [vmem:[#allocation5 + $0x1e98] sm:$0xff]  ;;  %v529_v22 = vld [vmem:[#allocation5 + $0xd90] sm:$0xff] }
 0x12c   :  { %1834 = vmatpush.msra.mxu0 %v495_v24  ;;  %1854 = vmatpush.msra.mxu1 %v1007_v25  ;;  %v1041_v23 = vld [vmem:[#allocation5 + $0x1d90] sm:$0xff]  ;;  %v530_v24 = vld [vmem:[#allocation5 + $0xd98] sm:$0xff] }
 0x12d   :  { %1874 = vmatpush.msra.mxu2 %v496_v26  ;;  %1894 = vmatpush.msra.mxu3 %v1008_v27  ;;  %v1042_v25 = vld [vmem:[#allocation5 + $0x1d98] sm:$0xff]  ;;  %v497_v26 = vld [vmem:[#allocation5 + $0xc90] sm:$0xff] }
 0x12e   :  { %1835 = vmatpush.msra.mxu0 %v463_v28  ;;  %1855 = vmatpush.msra.mxu1 %v975_v29  ;;  %v1010_v27 = vld [vmem:[#allocation5 + $0x1c98] sm:$0xff]  ;;  %v465_v28 = vld [vmem:[#allocation5 + $0xb90] sm:$0xff] }
 0x12f   :  { %1875 = vmatpush.msra.mxu2 %v464_v30  ;;  %1895 = vmatpush.msra.mxu3 %v976_v31  ;;  %v977_v29 = vld [vmem:[#allocation5 + $0x1b90] sm:$0xff]  ;;  %v466_v30 = vld [vmem:[#allocation5 + $0xb98] sm:$0xff] }
 0x130   :  { %1836 = vmatpush.msra.mxu0 %v431_v32  ;;  %1856 = vmatpush.msra.mxu1 %v943_v33  ;;  %v978_v31 = vld [vmem:[#allocation5 + $0x1b98] sm:$0xff]  ;;  %v433_v32 = vld [vmem:[#allocation5 + $0xa90] sm:$0xff] }
 0x131   :  { %1876 = vmatpush.msra.mxu2 %v432_v34  ;;  %1896 = vmatpush.msra.mxu3 %v944_v35  ;;  %v945_v33 = vld [vmem:[#allocation5 + $0x1a90] sm:$0xff]  ;;  %v434_v34 = vld [vmem:[#allocation5 + $0xa98] sm:$0xff] }
 0x132   :  { %1837 = vmatpush.msra.mxu0 %v399_v36  ;;  %1857 = vmatpush.msra.mxu1 %v911_v37  ;;  %v946_v35 = vld [vmem:[#allocation5 + $0x1a98] sm:$0xff]  ;;  %v401_v36 = vld [vmem:[#allocation5 + $0x990] sm:$0xff] }
 0x133   :  { %1877 = vmatpush.msra.mxu2 %v400_v38  ;;  %1897 = vmatpush.msra.mxu3 %v912_v39  ;;  %v913_v37 = vld [vmem:[#allocation5 + $0x1990] sm:$0xff]  ;;  %v402_v38 = vld [vmem:[#allocation5 + $0x998] sm:$0xff] }
 0x134   :  { %1838 = vmatpush.msra.mxu0 %v367_v40  ;;  %1858 = vmatpush.msra.mxu1 %v879_v41  ;;  %v914_v39 = vld [vmem:[#allocation5 + $0x1998] sm:$0xff]  ;;  %v369_v40 = vld [vmem:[#allocation5 + $0x890] sm:$0xff] }
 0x135   :  { %1878 = vmatpush.msra.mxu2 %v368_v42  ;;  %1898 = vmatpush.msra.mxu3 %v880_v43  ;;  %v881_v41 = vld [vmem:[#allocation5 + $0x1890] sm:$0xff]  ;;  %v370_v42 = vld [vmem:[#allocation5 + $0x898] sm:$0xff] }
 0x136   :  { %1839 = vmatpush.msra.mxu0 %v335_v44  ;;  %1859 = vmatpush.msra.mxu1 %v847_v45  ;;  %v882_v43 = vld [vmem:[#allocation5 + $0x1898] sm:$0xff]  ;;  %v337_v44 = vld [vmem:[#allocation5 + $0x790] sm:$0xff] }
 0x137   :  { %1879 = vmatpush.msra.mxu2 %v336_v46  ;;  %1899 = vmatpush.msra.mxu3 %v848_v47  ;;  %v849_v45 = vld [vmem:[#allocation5 + $0x1790] sm:$0xff]  ;;  %v338_v46 = vld [vmem:[#allocation5 + $0x798] sm:$0xff] }
 0x138   :  { %1840 = vmatpush.msra.mxu0 %v303_v48  ;;  %1860 = vmatpush.msra.mxu1 %v815_v49  ;;  %v850_v47 = vld [vmem:[#allocation5 + $0x1798] sm:$0xff]  ;;  %v305_v48 = vld [vmem:[#allocation5 + $0x690] sm:$0xff] }
 0x139   :  { %1880 = vmatpush.msra.mxu2 %v304_v50  ;;  %1900 = vmatpush.msra.mxu3 %v816_v51  ;;  %v817_v49 = vld [vmem:[#allocation5 + $0x1690] sm:$0xff]  ;;  %v306_v50 = vld [vmem:[#allocation5 + $0x698] sm:$0xff] }
 0x13a   :  { %1841 = vmatpush.msra.mxu0 %v271_v52  ;;  %1861 = vmatpush.msra.mxu1 %v783_v53  ;;  %v818_v51 = vld [vmem:[#allocation5 + $0x1698] sm:$0xff]  ;;  %v273_v52 = vld [vmem:[#allocation5 + $0x590] sm:$0xff] }
 0x13b   :  { %1881 = vmatpush.msra.mxu2 %v272_v54  ;;  %1901 = vmatpush.msra.mxu3 %v784_v55  ;;  %v785_v53 = vld [vmem:[#allocation5 + $0x1590] sm:$0xff]  ;;  %v274_v54 = vld [vmem:[#allocation5 + $0x598] sm:$0xff] }
 0x13c   :  { %1842 = vmatpush.msra.mxu0 %v239_v56  ;;  %1862 = vmatpush.msra.mxu1 %v751_v57  ;;  %v786_v55 = vld [vmem:[#allocation5 + $0x1598] sm:$0xff]  ;;  %v241_v56 = vld [vmem:[#allocation5 + $0x490] sm:$0xff] }
 0x13d   :  { %1882 = vmatpush.msra.mxu2 %v240_v58  ;;  %1902 = vmatpush.msra.mxu3 %v752_v59  ;;  %v753_v57 = vld [vmem:[#allocation5 + $0x1490] sm:$0xff]  ;;  %v242_v58 = vld [vmem:[#allocation5 + $0x498] sm:$0xff] }
 0x13e   :  { %1843 = vmatpush.msra.mxu0 %v207_v60  ;;  %1863 = vmatpush.msra.mxu1 %v719_v61  ;;  %v754_v59 = vld [vmem:[#allocation5 + $0x1498] sm:$0xff]  ;;  %v209_v60 = vld [vmem:[#allocation5 + $0x390] sm:$0xff] }
 0x13f   :  { %1883 = vmatpush.msra.mxu2 %v208_v62  ;;  %1903 = vmatpush.msra.mxu3 %v720_v63  ;;  %v721_v61 = vld [vmem:[#allocation5 + $0x1390] sm:$0xff]  ;;  %v210_v62 = vld [vmem:[#allocation5 + $0x398] sm:$0xff] }
 0x140   :  { %1844 = vmatpush.msra.mxu0 %v175_v2  ;;  %1864 = vmatpush.msra.mxu1 %v687_v3  ;;  %v722_v63 = vld [vmem:[#allocation5 + $0x1398] sm:$0xff]  ;;  %v177_v2 = vld [vmem:[#allocation5 + $0x290] sm:$0xff] }
 0x141   :  { %1884 = vmatpush.msra.mxu2 %v176_v4  ;;  %1904 = vmatpush.msra.mxu3 %v688_v5  ;;  %v689_v3 = vld [vmem:[#allocation5 + $0x1290] sm:$0xff]  ;;  %v178_v4 = vld [vmem:[#allocation5 + $0x298] sm:$0xff] }
 0x142   :  { %1845 = vmatpush.msra.mxu0 %v143_v6  ;;  %1865 = vmatpush.msra.mxu1 %v655_v7  ;;  %v690_v5 = vld [vmem:[#allocation5 + $0x1298] sm:$0xff]  ;;  %v145_v6 = vld [vmem:[#allocation5 + $0x190] sm:$0xff] }
 0x143   :  { %1885 = vmatpush.msra.mxu2 %v144_v8  ;;  %1905 = vmatpush.msra.mxu3 %v656_v9  ;;  %v657_v7 = vld [vmem:[#allocation5 + $0x1190] sm:$0xff]  ;;  %v146_v8 = vld [vmem:[#allocation5 + $0x198] sm:$0xff] }
 0x144   :  { %1846 = vmatpush.msra.mxu0 %v111_v12  ;;  %1866 = vmatpush.msra.mxu1 %v623_v13  ;;  %v658_v9 = vld [vmem:[#allocation5 + $0x1198] sm:$0xff]  ;;  %v113_v12 = vld [vmem:[#allocation5 + $0x90] sm:$0xff] }
 0x145   :  { %1886 = vmatpush.msra.mxu2 %v112_v14  ;;  %1906 = vmatpush.msra.mxu3 %v624_v15  ;;  %v625_v13 = vld [vmem:[#allocation5 + $0x1090] sm:$0xff]  ;;  %v114_v14 = vld [vmem:[#allocation5 + $0x98] sm:$0xff] }
 0x146   :  { %1767 = vmatmul.f32.vlgmr.msrb.gmra.mxu0 %v3923_v10  ;;  %1787 = vmatmul.f32.vlgmr.msrb.gmra.mxu1 %v3926_v11  ;;  %v626_v15 = vld [vmem:[#allocation5 + $0x1098] sm:$0xff] }
 0x147   :  { %1807 = vmatmul.f32.vlgmr.msrb.gmra.mxu2 %v3923_v10  ;;  %1827 = vmatmul.f32.vlgmr.msrb.gmra.mxu3 %v3926_v11  ;;  %v1009_v10 = vld [vmem:[#allocation5 + $0x1c90] sm:$0xff]  ;;  %v498_v11 = vld [vmem:[#allocation5 + $0xc98] sm:$0xff] }
 0x148   :  { %1911 = vmatpush.msrb.mxu0 %v593_v16  ;;  %1931 = vmatpush.msrb.mxu1 %v1105_v17  ;;  %v595_v16 = vld [vmem:[#allocation5 + $0xfa0] sm:$0xff] }
 0x149   :  { %1951 = vmatpush.msrb.mxu2 %v594_v18  ;;  %1971 = vmatpush.msrb.mxu3 %v1106_v19  ;;  %v1107_v17 = vld [vmem:[#allocation5 + $0x1fa0] sm:$0xff]  ;;  %v3943_v18 = vld [vmem:[#allocation2] sm:$0xff]  ;;  %v3946_v19 = vld [vmem:[#allocation2 + $0x8] sm:$0xff] }
 0x14a   :  { %1912 = vmatpush.msrb.mxu0 %v561_v20  ;;  %1932 = vmatpush.msrb.mxu1 %v1073_v0  ;;  %v596_v20 = vld [vmem:[#allocation5 + $0xfa8] sm:$0xff] }
 0x14b   :  { %1952 = vmatpush.msrb.mxu2 %v562_v1  ;;  %1972 = vmatpush.msrb.mxu3 %v1074_v21  ;;  %v1108_v0 = vld [vmem:[#allocation5 + $0x1fa8] sm:$0xff]  ;;  %v563_v1 = vld [vmem:[#allocation5 + $0xea0] sm:$0xff] }
 0x14c   :  { %1913 = vmatpush.msrb.mxu0 %v529_v22  ;;  %1933 = vmatpush.msrb.mxu1 %v1041_v23  ;;  %v1075_v21 = vld [vmem:[#allocation5 + $0x1ea0] sm:$0xff]  ;;  %v564_v22 = vld [vmem:[#allocation5 + $0xea8] sm:$0xff] }
 0x14d   :  { %1953 = vmatpush.msrb.mxu2 %v530_v24  ;;  %1973 = vmatpush.msrb.mxu3 %v1042_v25  ;;  %v1076_v23 = vld [vmem:[#allocation5 + $0x1ea8] sm:$0xff]  ;;  %v531_v24 = vld [vmem:[#allocation5 + $0xda0] sm:$0xff] }
 0x14e   :  { %1914 = vmatpush.msrb.mxu0 %v497_v26  ;;  %1934 = vmatpush.msrb.mxu1 %v1009_v10  ;;  %v1043_v25 = vld [vmem:[#allocation5 + $0x1da0] sm:$0xff]  ;;  %v532_v26 = vld [vmem:[#allocation5 + $0xda8] sm:$0xff] }
 0x14f   :  { %1954 = vmatpush.msrb.mxu2 %v498_v11  ;;  %1974 = vmatpush.msrb.mxu3 %v1010_v27  ;;  %v1044_v10 = vld [vmem:[#allocation5 + $0x1da8] sm:$0xff]  ;;  %v499_v11 = vld [vmem:[#allocation5 + $0xca0] sm:$0xff] }
 0x150   :  { %1915 = vmatpush.msrb.mxu0 %v465_v28  ;;  %1935 = vmatpush.msrb.mxu1 %v977_v29  ;;  %v1011_v27 = vld [vmem:[#allocation5 + $0x1ca0] sm:$0xff]  ;;  %v500_v28 = vld [vmem:[#allocation5 + $0xca8] sm:$0xff] }
 0x151   :  { %1955 = vmatpush.msrb.mxu2 %v466_v30  ;;  %1975 = vmatpush.msrb.mxu3 %v978_v31  ;;  %v1012_v29 = vld [vmem:[#allocation5 + $0x1ca8] sm:$0xff]  ;;  %v467_v30 = vld [vmem:[#allocation5 + $0xba0] sm:$0xff] }
 0x152   :  { %1916 = vmatpush.msrb.mxu0 %v433_v32  ;;  %1936 = vmatpush.msrb.mxu1 %v945_v33  ;;  %v979_v31 = vld [vmem:[#allocation5 + $0x1ba0] sm:$0xff]  ;;  %v468_v32 = vld [vmem:[#allocation5 + $0xba8] sm:$0xff] }
 0x153   :  { %1956 = vmatpush.msrb.mxu2 %v434_v34  ;;  %1976 = vmatpush.msrb.mxu3 %v946_v35  ;;  %v980_v33 = vld [vmem:[#allocation5 + $0x1ba8] sm:$0xff]  ;;  %v435_v34 = vld [vmem:[#allocation5 + $0xaa0] sm:$0xff] }
 0x154   :  { %1917 = vmatpush.msrb.mxu0 %v401_v36  ;;  %1937 = vmatpush.msrb.mxu1 %v913_v37  ;;  %v947_v35 = vld [vmem:[#allocation5 + $0x1aa0] sm:$0xff]  ;;  %v436_v36 = vld [vmem:[#allocation5 + $0xaa8] sm:$0xff] }
 0x155   :  { %1957 = vmatpush.msrb.mxu2 %v402_v38  ;;  %1977 = vmatpush.msrb.mxu3 %v914_v39  ;;  %v948_v37 = vld [vmem:[#allocation5 + $0x1aa8] sm:$0xff]  ;;  %v403_v38 = vld [vmem:[#allocation5 + $0x9a0] sm:$0xff] }
 0x156   :  { %1918 = vmatpush.msrb.mxu0 %v369_v40  ;;  %1938 = vmatpush.msrb.mxu1 %v881_v41  ;;  %v915_v39 = vld [vmem:[#allocation5 + $0x19a0] sm:$0xff]  ;;  %v404_v40 = vld [vmem:[#allocation5 + $0x9a8] sm:$0xff] }
 0x157   :  { %1958 = vmatpush.msrb.mxu2 %v370_v42  ;;  %1978 = vmatpush.msrb.mxu3 %v882_v43  ;;  %v916_v41 = vld [vmem:[#allocation5 + $0x19a8] sm:$0xff]  ;;  %v371_v42 = vld [vmem:[#allocation5 + $0x8a0] sm:$0xff] }
 0x158   :  { %1919 = vmatpush.msrb.mxu0 %v337_v44  ;;  %1939 = vmatpush.msrb.mxu1 %v849_v45  ;;  %v883_v43 = vld [vmem:[#allocation5 + $0x18a0] sm:$0xff]  ;;  %v372_v44 = vld [vmem:[#allocation5 + $0x8a8] sm:$0xff] }
 0x159   :  { %1959 = vmatpush.msrb.mxu2 %v338_v46  ;;  %1979 = vmatpush.msrb.mxu3 %v850_v47  ;;  %v884_v45 = vld [vmem:[#allocation5 + $0x18a8] sm:$0xff]  ;;  %v339_v46 = vld [vmem:[#allocation5 + $0x7a0] sm:$0xff] }
 0x15a   :  { %1920 = vmatpush.msrb.mxu0 %v305_v48  ;;  %1940 = vmatpush.msrb.mxu1 %v817_v49  ;;  %v851_v47 = vld [vmem:[#allocation5 + $0x17a0] sm:$0xff]  ;;  %v340_v48 = vld [vmem:[#allocation5 + $0x7a8] sm:$0xff] }
 0x15b   :  { %1960 = vmatpush.msrb.mxu2 %v306_v50  ;;  %1980 = vmatpush.msrb.mxu3 %v818_v51  ;;  %v852_v49 = vld [vmem:[#allocation5 + $0x17a8] sm:$0xff]  ;;  %v307_v50 = vld [vmem:[#allocation5 + $0x6a0] sm:$0xff] }
 0x15c   :  { %1921 = vmatpush.msrb.mxu0 %v273_v52  ;;  %1941 = vmatpush.msrb.mxu1 %v785_v53  ;;  %v819_v51 = vld [vmem:[#allocation5 + $0x16a0] sm:$0xff]  ;;  %v308_v52 = vld [vmem:[#allocation5 + $0x6a8] sm:$0xff] }
 0x15d   :  { %1961 = vmatpush.msrb.mxu2 %v274_v54  ;;  %1981 = vmatpush.msrb.mxu3 %v786_v55  ;;  %v820_v53 = vld [vmem:[#allocation5 + $0x16a8] sm:$0xff]  ;;  %v275_v54 = vld [vmem:[#allocation5 + $0x5a0] sm:$0xff] }
 0x15e   :  { %1922 = vmatpush.msrb.mxu0 %v241_v56  ;;  %1942 = vmatpush.msrb.mxu1 %v753_v57  ;;  %v787_v55 = vld [vmem:[#allocation5 + $0x15a0] sm:$0xff]  ;;  %v276_v56 = vld [vmem:[#allocation5 + $0x5a8] sm:$0xff] }
 0x15f   :  { %1962 = vmatpush.msrb.mxu2 %v242_v58  ;;  %1982 = vmatpush.msrb.mxu3 %v754_v59  ;;  %v788_v57 = vld [vmem:[#allocation5 + $0x15a8] sm:$0xff]  ;;  %v243_v58 = vld [vmem:[#allocation5 + $0x4a0] sm:$0xff] }
 0x160   :  { %1923 = vmatpush.msrb.mxu0 %v209_v60  ;;  %1943 = vmatpush.msrb.mxu1 %v721_v61  ;;  %v755_v59 = vld [vmem:[#allocation5 + $0x14a0] sm:$0xff]  ;;  %v244_v60 = vld [vmem:[#allocation5 + $0x4a8] sm:$0xff] }
 0x161   :  { %1963 = vmatpush.msrb.mxu2 %v210_v62  ;;  %1983 = vmatpush.msrb.mxu3 %v722_v63  ;;  %v756_v61 = vld [vmem:[#allocation5 + $0x14a8] sm:$0xff]  ;;  %v211_v62 = vld [vmem:[#allocation5 + $0x3a0] sm:$0xff] }
 0x162   :  { %1924 = vmatpush.msrb.mxu0 %v177_v2  ;;  %1944 = vmatpush.msrb.mxu1 %v689_v3  ;;  %v723_v63 = vld [vmem:[#allocation5 + $0x13a0] sm:$0xff]  ;;  %v212_v2 = vld [vmem:[#allocation5 + $0x3a8] sm:$0xff] }
 0x163   :  { %1964 = vmatpush.msrb.mxu2 %v178_v4  ;;  %1984 = vmatpush.msrb.mxu3 %v690_v5  ;;  %v724_v3 = vld [vmem:[#allocation5 + $0x13a8] sm:$0xff]  ;;  %v179_v4 = vld [vmem:[#allocation5 + $0x2a0] sm:$0xff] }
 0x164   :  { %1925 = vmatpush.msrb.mxu0 %v145_v6  ;;  %1945 = vmatpush.msrb.mxu1 %v657_v7  ;;  %v691_v5 = vld [vmem:[#allocation5 + $0x12a0] sm:$0xff]  ;;  %v180_v6 = vld [vmem:[#allocation5 + $0x2a8] sm:$0xff] }
 0x165   :  { %1965 = vmatpush.msrb.mxu2 %v146_v8  ;;  %1985 = vmatpush.msrb.mxu3 %v658_v9  ;;  %v692_v7 = vld [vmem:[#allocation5 + $0x12a8] sm:$0xff]  ;;  %v147_v8 = vld [vmem:[#allocation5 + $0x1a0] sm:$0xff] }
 0x166   :  { %1926 = vmatpush.msrb.mxu0 %v113_v12  ;;  %1946 = vmatpush.msrb.mxu1 %v625_v13  ;;  %v659_v9 = vld [vmem:[#allocation5 + $0x11a0] sm:$0xff]  ;;  %v148_v12 = vld [vmem:[#allocation5 + $0x1a8] sm:$0xff] }
 0x167   :  { %1966 = vmatpush.msrb.mxu2 %v114_v14  ;;  %1986 = vmatpush.msrb.mxu3 %v626_v15  ;;  %v660_v13 = vld [vmem:[#allocation5 + $0x11a8] sm:$0xff]  ;;  %v115_v14 = vld [vmem:[#allocation5 + $0xa0] sm:$0xff] }
 0x168   :  { %1847 = vmatmul.f32.vlgmr.msra.gmra.mxu0 %v3943_v18  ;;  %1867 = vmatmul.f32.vlgmr.msra.gmra.mxu1 %v3946_v19  ;;  %v627_v15 = vld [vmem:[#allocation5 + $0x10a0] sm:$0xff] }
 0x169   :  { %1887 = vmatmul.f32.vlgmr.msra.gmra.mxu2 %v3943_v18  ;;  %1907 = vmatmul.f32.vlgmr.msra.gmra.mxu3 %v3946_v19 }
 0x16a   :  { %1991 = vmatpush.msra.mxu0 %v595_v16  ;;  %2011 = vmatpush.msra.mxu1 %v1107_v17  ;;  %v116_v16 = vld [vmem:[#allocation5 + $0xa8] sm:$0xff] }
 0x16b   :  { %2031 = vmatpush.msra.mxu2 %v596_v20  ;;  %2051 = vmatpush.msra.mxu3 %v1108_v0  ;;  %v628_v17 = vld [vmem:[#allocation5 + $0x10a8] sm:$0xff]  ;;  %v597_v20 = vld [vmem:[#allocation5 + $0xfb0] sm:$0xff] }
 0x16c   :  { %1992 = vmatpush.msra.mxu0 %v563_v1  ;;  %2012 = vmatpush.msra.mxu1 %v1075_v21  ;;  %v1109_v0 = vld [vmem:[#allocation5 + $0x1fb0] sm:$0xff]  ;;  %v598_v1 = vld [vmem:[#allocation5 + $0xfb8] sm:$0xff] }
 0x16d   :  { %2032 = vmatpush.msra.mxu2 %v564_v22  ;;  %2052 = vmatpush.msra.mxu3 %v1076_v23  ;;  %v1110_v21 = vld [vmem:[#allocation5 + $0x1fb8] sm:$0xff]  ;;  %v565_v22 = vld [vmem:[#allocation5 + $0xeb0] sm:$0xff] }
 0x16e   :  { %1993 = vmatpush.msra.mxu0 %v531_v24  ;;  %2013 = vmatpush.msra.mxu1 %v1043_v25  ;;  %v1077_v23 = vld [vmem:[#allocation5 + $0x1eb0] sm:$0xff]  ;;  %v566_v24 = vld [vmem:[#allocation5 + $0xeb8] sm:$0xff] }
 0x16f   :  { %2033 = vmatpush.msra.mxu2 %v532_v26  ;;  %2053 = vmatpush.msra.mxu3 %v1044_v10  ;;  %v1078_v25 = vld [vmem:[#allocation5 + $0x1eb8] sm:$0xff]  ;;  %v533_v26 = vld [vmem:[#allocation5 + $0xdb0] sm:$0xff] }
 0x170   :  { %1994 = vmatpush.msra.mxu0 %v499_v11  ;;  %2014 = vmatpush.msra.mxu1 %v1011_v27  ;;  %v1045_v10 = vld [vmem:[#allocation5 + $0x1db0] sm:$0xff]  ;;  %v534_v11 = vld [vmem:[#allocation5 + $0xdb8] sm:$0xff] }
 0x171   :  { %2034 = vmatpush.msra.mxu2 %v500_v28  ;;  %2054 = vmatpush.msra.mxu3 %v1012_v29  ;;  %v1046_v27 = vld [vmem:[#allocation5 + $0x1db8] sm:$0xff]  ;;  %v501_v28 = vld [vmem:[#allocation5 + $0xcb0] sm:$0xff] }
 0x172   :  { %1995 = vmatpush.msra.mxu0 %v467_v30  ;;  %2015 = vmatpush.msra.mxu1 %v979_v31  ;;  %v1013_v29 = vld [vmem:[#allocation5 + $0x1cb0] sm:$0xff]  ;;  %v502_v30 = vld [vmem:[#allocation5 + $0xcb8] sm:$0xff] }
 0x173   :  { %2035 = vmatpush.msra.mxu2 %v468_v32  ;;  %2055 = vmatpush.msra.mxu3 %v980_v33  ;;  %v1014_v31 = vld [vmem:[#allocation5 + $0x1cb8] sm:$0xff]  ;;  %v469_v32 = vld [vmem:[#allocation5 + $0xbb0] sm:$0xff] }
 0x174   :  { %1996 = vmatpush.msra.mxu0 %v435_v34  ;;  %2016 = vmatpush.msra.mxu1 %v947_v35  ;;  %v981_v33 = vld [vmem:[#allocation5 + $0x1bb0] sm:$0xff]  ;;  %v470_v34 = vld [vmem:[#allocation5 + $0xbb8] sm:$0xff] }
 0x175   :  { %2036 = vmatpush.msra.mxu2 %v436_v36  ;;  %2056 = vmatpush.msra.mxu3 %v948_v37  ;;  %v982_v35 = vld [vmem:[#allocation5 + $0x1bb8] sm:$0xff]  ;;  %v437_v36 = vld [vmem:[#allocation5 + $0xab0] sm:$0xff] }
 0x176   :  { %1997 = vmatpush.msra.mxu0 %v403_v38  ;;  %2017 = vmatpush.msra.mxu1 %v915_v39  ;;  %v949_v37 = vld [vmem:[#allocation5 + $0x1ab0] sm:$0xff]  ;;  %v438_v38 = vld [vmem:[#allocation5 + $0xab8] sm:$0xff] }
 0x177   :  { %2037 = vmatpush.msra.mxu2 %v404_v40  ;;  %2057 = vmatpush.msra.mxu3 %v916_v41  ;;  %v950_v39 = vld [vmem:[#allocation5 + $0x1ab8] sm:$0xff]  ;;  %v405_v40 = vld [vmem:[#allocation5 + $0x9b0] sm:$0xff] }
 0x178   :  { %1998 = vmatpush.msra.mxu0 %v371_v42  ;;  %2018 = vmatpush.msra.mxu1 %v883_v43  ;;  %v917_v41 = vld [vmem:[#allocation5 + $0x19b0] sm:$0xff]  ;;  %v406_v42 = vld [vmem:[#allocation5 + $0x9b8] sm:$0xff] }
 0x179   :  { %2038 = vmatpush.msra.mxu2 %v372_v44  ;;  %2058 = vmatpush.msra.mxu3 %v884_v45  ;;  %v918_v43 = vld [vmem:[#allocation5 + $0x19b8] sm:$0xff]  ;;  %v373_v44 = vld [vmem:[#allocation5 + $0x8b0] sm:$0xff] }
 0x17a   :  { %1999 = vmatpush.msra.mxu0 %v339_v46  ;;  %2019 = vmatpush.msra.mxu1 %v851_v47  ;;  %v885_v45 = vld [vmem:[#allocation5 + $0x18b0] sm:$0xff]  ;;  %v374_v46 = vld [vmem:[#allocation5 + $0x8b8] sm:$0xff] }
 0x17b   :  { %2039 = vmatpush.msra.mxu2 %v340_v48  ;;  %2059 = vmatpush.msra.mxu3 %v852_v49  ;;  %v886_v47 = vld [vmem:[#allocation5 + $0x18b8] sm:$0xff]  ;;  %v341_v48 = vld [vmem:[#allocation5 + $0x7b0] sm:$0xff] }
 0x17c   :  { %2000 = vmatpush.msra.mxu0 %v307_v50  ;;  %2020 = vmatpush.msra.mxu1 %v819_v51  ;;  %v853_v49 = vld [vmem:[#allocation5 + $0x17b0] sm:$0xff]  ;;  %v342_v50 = vld [vmem:[#allocation5 + $0x7b8] sm:$0xff] }
 0x17d   :  { %2040 = vmatpush.msra.mxu2 %v308_v52  ;;  %2060 = vmatpush.msra.mxu3 %v820_v53  ;;  %v854_v51 = vld [vmem:[#allocation5 + $0x17b8] sm:$0xff]  ;;  %v309_v52 = vld [vmem:[#allocation5 + $0x6b0] sm:$0xff] }
 0x17e   :  { %2001 = vmatpush.msra.mxu0 %v275_v54  ;;  %2021 = vmatpush.msra.mxu1 %v787_v55  ;;  %v821_v53 = vld [vmem:[#allocation5 + $0x16b0] sm:$0xff]  ;;  %v310_v54 = vld [vmem:[#allocation5 + $0x6b8] sm:$0xff] }
 0x17f   :  { %2041 = vmatpush.msra.mxu2 %v276_v56  ;;  %2061 = vmatpush.msra.mxu3 %v788_v57  ;;  %v822_v55 = vld [vmem:[#allocation5 + $0x16b8] sm:$0xff]  ;;  %v277_v56 = vld [vmem:[#allocation5 + $0x5b0] sm:$0xff] }
 0x180   :  { %2002 = vmatpush.msra.mxu0 %v243_v58  ;;  %2022 = vmatpush.msra.mxu1 %v755_v59  ;;  %v789_v57 = vld [vmem:[#allocation5 + $0x15b0] sm:$0xff]  ;;  %v278_v58 = vld [vmem:[#allocation5 + $0x5b8] sm:$0xff] }
 0x181   :  { %2042 = vmatpush.msra.mxu2 %v244_v60  ;;  %2062 = vmatpush.msra.mxu3 %v756_v61  ;;  %v790_v59 = vld [vmem:[#allocation5 + $0x15b8] sm:$0xff]  ;;  %v245_v60 = vld [vmem:[#allocation5 + $0x4b0] sm:$0xff] }
 0x182   :  { %2003 = vmatpush.msra.mxu0 %v211_v62  ;;  %2023 = vmatpush.msra.mxu1 %v723_v63  ;;  %v757_v61 = vld [vmem:[#allocation5 + $0x14b0] sm:$0xff]  ;;  %v246_v62 = vld [vmem:[#allocation5 + $0x4b8] sm:$0xff] }
 0x183   :  { %2043 = vmatpush.msra.mxu2 %v212_v2  ;;  %2063 = vmatpush.msra.mxu3 %v724_v3  ;;  %v758_v63 = vld [vmem:[#allocation5 + $0x14b8] sm:$0xff]  ;;  %v213_v2 = vld [vmem:[#allocation5 + $0x3b0] sm:$0xff] }
 0x184   :  { %2004 = vmatpush.msra.mxu0 %v179_v4  ;;  %2024 = vmatpush.msra.mxu1 %v691_v5  ;;  %v725_v3 = vld [vmem:[#allocation5 + $0x13b0] sm:$0xff]  ;;  %v214_v4 = vld [vmem:[#allocation5 + $0x3b8] sm:$0xff] }
 0x185   :  { %2044 = vmatpush.msra.mxu2 %v180_v6  ;;  %2064 = vmatpush.msra.mxu3 %v692_v7  ;;  %v726_v5 = vld [vmem:[#allocation5 + $0x13b8] sm:$0xff]  ;;  %v181_v6 = vld [vmem:[#allocation5 + $0x2b0] sm:$0xff] }
 0x186   :  { %2005 = vmatpush.msra.mxu0 %v147_v8  ;;  %2025 = vmatpush.msra.mxu1 %v659_v9  ;;  %v693_v7 = vld [vmem:[#allocation5 + $0x12b0] sm:$0xff]  ;;  %v182_v8 = vld [vmem:[#allocation5 + $0x2b8] sm:$0xff] }
 0x187   :  { %2045 = vmatpush.msra.mxu2 %v148_v12  ;;  %2065 = vmatpush.msra.mxu3 %v660_v13  ;;  %v694_v9 = vld [vmem:[#allocation5 + $0x12b8] sm:$0xff]  ;;  %v149_v12 = vld [vmem:[#allocation5 + $0x1b0] sm:$0xff] }
 0x188   :  { %2006 = vmatpush.msra.mxu0 %v115_v14  ;;  %2026 = vmatpush.msra.mxu1 %v627_v15  ;;  %v661_v13 = vld [vmem:[#allocation5 + $0x11b0] sm:$0xff]  ;;  %v150_v14 = vld [vmem:[#allocation5 + $0x1b8] sm:$0xff] }
 0x189   :  { %2046 = vmatpush.msra.mxu2 %v116_v16  ;;  %2066 = vmatpush.msra.mxu3 %v628_v17  ;;  %v662_v15 = vld [vmem:[#allocation5 + $0x11b8] sm:$0xff]  ;;  %v117_v16 = vld [vmem:[#allocation5 + $0xb0] sm:$0xff] }
 0x18a   :  { %1927 = vmatmul.f32.vlgmr.msrb.gmra.mxu0 %v3943_v18  ;;  %1947 = vmatmul.f32.vlgmr.msrb.gmra.mxu1 %v3946_v19  ;;  %v629_v17 = vld [vmem:[#allocation5 + $0x10b0] sm:$0xff] }
 0x18b   :  { %1967 = vmatmul.f32.vlgmr.msrb.gmra.mxu2 %v3943_v18  ;;  %1987 = vmatmul.f32.vlgmr.msrb.gmra.mxu3 %v3946_v19 }
 0x18c   :  { %2071 = vmatpush.msrb.mxu0 %v597_v20  ;;  %2091 = vmatpush.msrb.mxu1 %v1109_v0  ;;  %v118_v20 = vld [vmem:[#allocation5 + $0xb8] sm:$0xff] }
 0x18d   :  { %2111 = vmatpush.msrb.mxu2 %v598_v1  ;;  %2131 = vmatpush.msrb.mxu3 %v1110_v21  ;;  %v630_v0 = vld [vmem:[#allocation5 + $0x10b8] sm:$0xff]  ;;  %v599_v1 = vld [vmem:[#allocation5 + $0xfc0] sm:$0xff] }
 0x18e   :  { %2072 = vmatpush.msrb.mxu0 %v565_v22  ;;  %2092 = vmatpush.msrb.mxu1 %v1077_v23  ;;  %v1111_v21 = vld [vmem:[#allocation5 + $0x1fc0] sm:$0xff]  ;;  %v600_v22 = vld [vmem:[#allocation5 + $0xfc8] sm:$0xff] }
 0x18f   :  { %2112 = vmatpush.msrb.mxu2 %v566_v24  ;;  %2132 = vmatpush.msrb.mxu3 %v1078_v25  ;;  %v1112_v23 = vld [vmem:[#allocation5 + $0x1fc8] sm:$0xff]  ;;  %v567_v24 = vld [vmem:[#allocation5 + $0xec0] sm:$0xff] }
 0x190   :  { %2073 = vmatpush.msrb.mxu0 %v533_v26  ;;  %2093 = vmatpush.msrb.mxu1 %v1045_v10  ;;  %v1079_v25 = vld [vmem:[#allocation5 + $0x1ec0] sm:$0xff]  ;;  %v568_v26 = vld [vmem:[#allocation5 + $0xec8] sm:$0xff] }
 0x191   :  { %2113 = vmatpush.msrb.mxu2 %v534_v11  ;;  %2133 = vmatpush.msrb.mxu3 %v1046_v27  ;;  %v1080_v10 = vld [vmem:[#allocation5 + $0x1ec8] sm:$0xff]  ;;  %v535_v11 = vld [vmem:[#allocation5 + $0xdc0] sm:$0xff] }
 0x192   :  { %2074 = vmatpush.msrb.mxu0 %v501_v28  ;;  %2094 = vmatpush.msrb.mxu1 %v1013_v29  ;;  %v1047_v27 = vld [vmem:[#allocation5 + $0x1dc0] sm:$0xff]  ;;  %v536_v28 = vld [vmem:[#allocation5 + $0xdc8] sm:$0xff] }
 0x193   :  { %2114 = vmatpush.msrb.mxu2 %v502_v30  ;;  %2134 = vmatpush.msrb.mxu3 %v1014_v31  ;;  %v1048_v29 = vld [vmem:[#allocation5 + $0x1dc8] sm:$0xff]  ;;  %v503_v30 = vld [vmem:[#allocation5 + $0xcc0] sm:$0xff] }
 0x194   :  { %2075 = vmatpush.msrb.mxu0 %v469_v32  ;;  %2095 = vmatpush.msrb.mxu1 %v981_v33  ;;  %v1015_v31 = vld [vmem:[#allocation5 + $0x1cc0] sm:$0xff]  ;;  %v504_v32 = vld [vmem:[#allocation5 + $0xcc8] sm:$0xff] }
 0x195   :  { %2115 = vmatpush.msrb.mxu2 %v470_v34  ;;  %2135 = vmatpush.msrb.mxu3 %v982_v35  ;;  %v1016_v33 = vld [vmem:[#allocation5 + $0x1cc8] sm:$0xff]  ;;  %v471_v34 = vld [vmem:[#allocation5 + $0xbc0] sm:$0xff] }
 0x196   :  { %2076 = vmatpush.msrb.mxu0 %v437_v36  ;;  %2096 = vmatpush.msrb.mxu1 %v949_v37  ;;  %v983_v35 = vld [vmem:[#allocation5 + $0x1bc0] sm:$0xff]  ;;  %v472_v36 = vld [vmem:[#allocation5 + $0xbc8] sm:$0xff] }
 0x197   :  { %2116 = vmatpush.msrb.mxu2 %v438_v38  ;;  %2136 = vmatpush.msrb.mxu3 %v950_v39  ;;  %v984_v37 = vld [vmem:[#allocation5 + $0x1bc8] sm:$0xff]  ;;  %v439_v38 = vld [vmem:[#allocation5 + $0xac0] sm:$0xff] }
 0x198   :  { %2077 = vmatpush.msrb.mxu0 %v405_v40  ;;  %2097 = vmatpush.msrb.mxu1 %v917_v41  ;;  %v951_v39 = vld [vmem:[#allocation5 + $0x1ac0] sm:$0xff]  ;;  %v440_v40 = vld [vmem:[#allocation5 + $0xac8] sm:$0xff] }
 0x199   :  { %2117 = vmatpush.msrb.mxu2 %v406_v42  ;;  %2137 = vmatpush.msrb.mxu3 %v918_v43  ;;  %v952_v41 = vld [vmem:[#allocation5 + $0x1ac8] sm:$0xff]  ;;  %v407_v42 = vld [vmem:[#allocation5 + $0x9c0] sm:$0xff] }
 0x19a   :  { %2078 = vmatpush.msrb.mxu0 %v373_v44  ;;  %2098 = vmatpush.msrb.mxu1 %v885_v45  ;;  %v919_v43 = vld [vmem:[#allocation5 + $0x19c0] sm:$0xff]  ;;  %v408_v44 = vld [vmem:[#allocation5 + $0x9c8] sm:$0xff] }
 0x19b   :  { %2118 = vmatpush.msrb.mxu2 %v374_v46  ;;  %2138 = vmatpush.msrb.mxu3 %v886_v47  ;;  %v920_v45 = vld [vmem:[#allocation5 + $0x19c8] sm:$0xff]  ;;  %v375_v46 = vld [vmem:[#allocation5 + $0x8c0] sm:$0xff] }
 0x19c   :  { %2079 = vmatpush.msrb.mxu0 %v341_v48  ;;  %2099 = vmatpush.msrb.mxu1 %v853_v49  ;;  %v887_v47 = vld [vmem:[#allocation5 + $0x18c0] sm:$0xff]  ;;  %v376_v48 = vld [vmem:[#allocation5 + $0x8c8] sm:$0xff] }
 0x19d   :  { %2119 = vmatpush.msrb.mxu2 %v342_v50  ;;  %2139 = vmatpush.msrb.mxu3 %v854_v51  ;;  %v888_v49 = vld [vmem:[#allocation5 + $0x18c8] sm:$0xff]  ;;  %v343_v50 = vld [vmem:[#allocation5 + $0x7c0] sm:$0xff] }
 0x19e   :  { %2080 = vmatpush.msrb.mxu0 %v309_v52  ;;  %2100 = vmatpush.msrb.mxu1 %v821_v53  ;;  %v855_v51 = vld [vmem:[#allocation5 + $0x17c0] sm:$0xff]  ;;  %v344_v52 = vld [vmem:[#allocation5 + $0x7c8] sm:$0xff] }
 0x19f   :  { %2120 = vmatpush.msrb.mxu2 %v310_v54  ;;  %2140 = vmatpush.msrb.mxu3 %v822_v55  ;;  %v856_v53 = vld [vmem:[#allocation5 + $0x17c8] sm:$0xff]  ;;  %v311_v54 = vld [vmem:[#allocation5 + $0x6c0] sm:$0xff] }
 0x1a0   :  { %2081 = vmatpush.msrb.mxu0 %v277_v56  ;;  %2101 = vmatpush.msrb.mxu1 %v789_v57  ;;  %v823_v55 = vld [vmem:[#allocation5 + $0x16c0] sm:$0xff]  ;;  %v312_v56 = vld [vmem:[#allocation5 + $0x6c8] sm:$0xff] }
 0x1a1   :  { %2121 = vmatpush.msrb.mxu2 %v278_v58  ;;  %2141 = vmatpush.msrb.mxu3 %v790_v59  ;;  %v824_v57 = vld [vmem:[#allocation5 + $0x16c8] sm:$0xff]  ;;  %v279_v58 = vld [vmem:[#allocation5 + $0x5c0] sm:$0xff] }
 0x1a2   :  { %2082 = vmatpush.msrb.mxu0 %v245_v60  ;;  %2102 = vmatpush.msrb.mxu1 %v757_v61  ;;  %v791_v59 = vld [vmem:[#allocation5 + $0x15c0] sm:$0xff]  ;;  %v280_v60 = vld [vmem:[#allocation5 + $0x5c8] sm:$0xff] }
 0x1a3   :  { %2122 = vmatpush.msrb.mxu2 %v246_v62  ;;  %2142 = vmatpush.msrb.mxu3 %v758_v63  ;;  %v792_v61 = vld [vmem:[#allocation5 + $0x15c8] sm:$0xff]  ;;  %v247_v62 = vld [vmem:[#allocation5 + $0x4c0] sm:$0xff] }
 0x1a4   :  { %2083 = vmatpush.msrb.mxu0 %v213_v2  ;;  %2103 = vmatpush.msrb.mxu1 %v725_v3  ;;  %v759_v63 = vld [vmem:[#allocation5 + $0x14c0] sm:$0xff]  ;;  %v248_v2 = vld [vmem:[#allocation5 + $0x4c8] sm:$0xff] }
 0x1a5   :  { %2123 = vmatpush.msrb.mxu2 %v214_v4  ;;  %2143 = vmatpush.msrb.mxu3 %v726_v5  ;;  %v760_v3 = vld [vmem:[#allocation5 + $0x14c8] sm:$0xff]  ;;  %v215_v4 = vld [vmem:[#allocation5 + $0x3c0] sm:$0xff] }
 0x1a6   :  { %2084 = vmatpush.msrb.mxu0 %v181_v6  ;;  %2104 = vmatpush.msrb.mxu1 %v693_v7  ;;  %v727_v5 = vld [vmem:[#allocation5 + $0x13c0] sm:$0xff]  ;;  %v216_v6 = vld [vmem:[#allocation5 + $0x3c8] sm:$0xff] }
 0x1a7   :  { %2124 = vmatpush.msrb.mxu2 %v182_v8  ;;  %2144 = vmatpush.msrb.mxu3 %v694_v9  ;;  %v728_v7 = vld [vmem:[#allocation5 + $0x13c8] sm:$0xff]  ;;  %v183_v8 = vld [vmem:[#allocation5 + $0x2c0] sm:$0xff] }
 0x1a8   :  { %2085 = vmatpush.msrb.mxu0 %v149_v12  ;;  %2105 = vmatpush.msrb.mxu1 %v661_v13  ;;  %v695_v9 = vld [vmem:[#allocation5 + $0x12c0] sm:$0xff]  ;;  %v184_v12 = vld [vmem:[#allocation5 + $0x2c8] sm:$0xff] }
 0x1a9   :  { %2125 = vmatpush.msrb.mxu2 %v150_v14  ;;  %2145 = vmatpush.msrb.mxu3 %v662_v15  ;;  %v696_v13 = vld [vmem:[#allocation5 + $0x12c8] sm:$0xff]  ;;  %v151_v14 = vld [vmem:[#allocation5 + $0x1c0] sm:$0xff] }
 0x1aa   :  { %2086 = vmatpush.msrb.mxu0 %v117_v16  ;;  %2106 = vmatpush.msrb.mxu1 %v629_v17  ;;  %v663_v15 = vld [vmem:[#allocation5 + $0x11c0] sm:$0xff]  ;;  %v152_v16 = vld [vmem:[#allocation5 + $0x1c8] sm:$0xff] }
 0x1ab   :  { %2126 = vmatpush.msrb.mxu2 %v118_v20  ;;  %2146 = vmatpush.msrb.mxu3 %v630_v0  ;;  %v664_v17 = vld [vmem:[#allocation5 + $0x11c8] sm:$0xff]  ;;  %v119_v20 = vld [vmem:[#allocation5 + $0xc0] sm:$0xff] }
 0x1ac   :  { %2007 = vmatmul.f32.vlgmr.msra.gmra.mxu0 %v3943_v18  ;;  %2027 = vmatmul.f32.vlgmr.msra.gmra.mxu1 %v3946_v19  ;;  %v631_v0 = vld [vmem:[#allocation5 + $0x10c0] sm:$0xff] }
 0x1ad   :  { %2047 = vmatmul.f32.vlgmr.msra.gmra.mxu2 %v3943_v18  ;;  %2067 = vmatmul.f32.vlgmr.msra.gmra.mxu3 %v3946_v19 }
 0x1ae   :  { %2151 = vmatpush.msra.mxu0 %v599_v1  ;;  %2171 = vmatpush.msra.mxu1 %v1111_v21  ;;  %v120_v1 = vld [vmem:[#allocation5 + $0xc8] sm:$0xff] }
 0x1af   :  { %2191 = vmatpush.msra.mxu2 %v600_v22  ;;  %2211 = vmatpush.msra.mxu3 %v1112_v23  ;;  %v632_v21 = vld [vmem:[#allocation5 + $0x10c8] sm:$0xff]  ;;  %v601_v22 = vld [vmem:[#allocation5 + $0xfd0] sm:$0xff] }
 0x1b0   :  { %2152 = vmatpush.msra.mxu0 %v567_v24  ;;  %2172 = vmatpush.msra.mxu1 %v1079_v25  ;;  %v1113_v23 = vld [vmem:[#allocation5 + $0x1fd0] sm:$0xff]  ;;  %v602_v24 = vld [vmem:[#allocation5 + $0xfd8] sm:$0xff] }
 0x1b1   :  { %2192 = vmatpush.msra.mxu2 %v568_v26  ;;  %2212 = vmatpush.msra.mxu3 %v1080_v10  ;;  %v1114_v25 = vld [vmem:[#allocation5 + $0x1fd8] sm:$0xff]  ;;  %v569_v26 = vld [vmem:[#allocation5 + $0xed0] sm:$0xff] }
 0x1b2   :  { %2153 = vmatpush.msra.mxu0 %v535_v11  ;;  %2173 = vmatpush.msra.mxu1 %v1047_v27  ;;  %v1081_v10 = vld [vmem:[#allocation5 + $0x1ed0] sm:$0xff]  ;;  %v570_v11 = vld [vmem:[#allocation5 + $0xed8] sm:$0xff] }
 0x1b3   :  { %2193 = vmatpush.msra.mxu2 %v536_v28  ;;  %2213 = vmatpush.msra.mxu3 %v1048_v29  ;;  %v1082_v27 = vld [vmem:[#allocation5 + $0x1ed8] sm:$0xff]  ;;  %v537_v28 = vld [vmem:[#allocation5 + $0xdd0] sm:$0xff] }
 0x1b4   :  { %2154 = vmatpush.msra.mxu0 %v503_v30  ;;  %2174 = vmatpush.msra.mxu1 %v1015_v31  ;;  %v1049_v29 = vld [vmem:[#allocation5 + $0x1dd0] sm:$0xff]  ;;  %v538_v30 = vld [vmem:[#allocation5 + $0xdd8] sm:$0xff] }
 0x1b5   :  { %2194 = vmatpush.msra.mxu2 %v504_v32  ;;  %2214 = vmatpush.msra.mxu3 %v1016_v33  ;;  %v1050_v31 = vld [vmem:[#allocation5 + $0x1dd8] sm:$0xff]  ;;  %v505_v32 = vld [vmem:[#allocation5 + $0xcd0] sm:$0xff] }
 0x1b6   :  { %2155 = vmatpush.msra.mxu0 %v471_v34  ;;  %2175 = vmatpush.msra.mxu1 %v983_v35  ;;  %v1018_v33 = vld [vmem:[#allocation5 + $0x1cd8] sm:$0xff]  ;;  %v473_v34 = vld [vmem:[#allocation5 + $0xbd0] sm:$0xff] }
 0x1b7   :  { %2195 = vmatpush.msra.mxu2 %v472_v36  ;;  %2215 = vmatpush.msra.mxu3 %v984_v37  ;;  %v985_v35 = vld [vmem:[#allocation5 + $0x1bd0] sm:$0xff]  ;;  %v474_v36 = vld [vmem:[#allocation5 + $0xbd8] sm:$0xff] }
 0x1b8   :  { %2156 = vmatpush.msra.mxu0 %v439_v38  ;;  %2176 = vmatpush.msra.mxu1 %v951_v39  ;;  %v986_v37 = vld [vmem:[#allocation5 + $0x1bd8] sm:$0xff]  ;;  %v441_v38 = vld [vmem:[#allocation5 + $0xad0] sm:$0xff] }
 0x1b9   :  { %2196 = vmatpush.msra.mxu2 %v440_v40  ;;  %2216 = vmatpush.msra.mxu3 %v952_v41  ;;  %v953_v39 = vld [vmem:[#allocation5 + $0x1ad0] sm:$0xff]  ;;  %v442_v40 = vld [vmem:[#allocation5 + $0xad8] sm:$0xff] }
 0x1ba   :  { %2157 = vmatpush.msra.mxu0 %v407_v42  ;;  %2177 = vmatpush.msra.mxu1 %v919_v43  ;;  %v954_v41 = vld [vmem:[#allocation5 + $0x1ad8] sm:$0xff]  ;;  %v409_v42 = vld [vmem:[#allocation5 + $0x9d0] sm:$0xff] }
 0x1bb   :  { %2197 = vmatpush.msra.mxu2 %v408_v44  ;;  %2217 = vmatpush.msra.mxu3 %v920_v45  ;;  %v921_v43 = vld [vmem:[#allocation5 + $0x19d0] sm:$0xff]  ;;  %v410_v44 = vld [vmem:[#allocation5 + $0x9d8] sm:$0xff] }
 0x1bc   :  { %2158 = vmatpush.msra.mxu0 %v375_v46  ;;  %2178 = vmatpush.msra.mxu1 %v887_v47  ;;  %v922_v45 = vld [vmem:[#allocation5 + $0x19d8] sm:$0xff]  ;;  %v377_v46 = vld [vmem:[#allocation5 + $0x8d0] sm:$0xff] }
 0x1bd   :  { %2198 = vmatpush.msra.mxu2 %v376_v48  ;;  %2218 = vmatpush.msra.mxu3 %v888_v49  ;;  %v889_v47 = vld [vmem:[#allocation5 + $0x18d0] sm:$0xff]  ;;  %v378_v48 = vld [vmem:[#allocation5 + $0x8d8] sm:$0xff] }
 0x1be   :  { %2159 = vmatpush.msra.mxu0 %v343_v50  ;;  %2179 = vmatpush.msra.mxu1 %v855_v51  ;;  %v890_v49 = vld [vmem:[#allocation5 + $0x18d8] sm:$0xff]  ;;  %v345_v50 = vld [vmem:[#allocation5 + $0x7d0] sm:$0xff] }
 0x1bf   :  { %2199 = vmatpush.msra.mxu2 %v344_v52  ;;  %2219 = vmatpush.msra.mxu3 %v856_v53  ;;  %v857_v51 = vld [vmem:[#allocation5 + $0x17d0] sm:$0xff]  ;;  %v346_v52 = vld [vmem:[#allocation5 + $0x7d8] sm:$0xff] }
 0x1c0   :  { %2160 = vmatpush.msra.mxu0 %v311_v54  ;;  %2180 = vmatpush.msra.mxu1 %v823_v55  ;;  %v858_v53 = vld [vmem:[#allocation5 + $0x17d8] sm:$0xff]  ;;  %v313_v54 = vld [vmem:[#allocation5 + $0x6d0] sm:$0xff] }
 0x1c1   :  { %2200 = vmatpush.msra.mxu2 %v312_v56  ;;  %2220 = vmatpush.msra.mxu3 %v824_v57  ;;  %v825_v55 = vld [vmem:[#allocation5 + $0x16d0] sm:$0xff]  ;;  %v314_v56 = vld [vmem:[#allocation5 + $0x6d8] sm:$0xff] }
 0x1c2   :  { %2161 = vmatpush.msra.mxu0 %v279_v58  ;;  %2181 = vmatpush.msra.mxu1 %v791_v59  ;;  %v826_v57 = vld [vmem:[#allocation5 + $0x16d8] sm:$0xff]  ;;  %v281_v58 = vld [vmem:[#allocation5 + $0x5d0] sm:$0xff] }
 0x1c3   :  { %2201 = vmatpush.msra.mxu2 %v280_v60  ;;  %2221 = vmatpush.msra.mxu3 %v792_v61  ;;  %v793_v59 = vld [vmem:[#allocation5 + $0x15d0] sm:$0xff]  ;;  %v282_v60 = vld [vmem:[#allocation5 + $0x5d8] sm:$0xff] }
 0x1c4   :  { %2162 = vmatpush.msra.mxu0 %v247_v62  ;;  %2182 = vmatpush.msra.mxu1 %v759_v63  ;;  %v794_v61 = vld [vmem:[#allocation5 + $0x15d8] sm:$0xff]  ;;  %v249_v62 = vld [vmem:[#allocation5 + $0x4d0] sm:$0xff] }
 0x1c5   :  { %2202 = vmatpush.msra.mxu2 %v248_v2  ;;  %2222 = vmatpush.msra.mxu3 %v760_v3  ;;  %v761_v63 = vld [vmem:[#allocation5 + $0x14d0] sm:$0xff]  ;;  %v250_v2 = vld [vmem:[#allocation5 + $0x4d8] sm:$0xff] }
 0x1c6   :  { %2163 = vmatpush.msra.mxu0 %v215_v4  ;;  %2183 = vmatpush.msra.mxu1 %v727_v5  ;;  %v762_v3 = vld [vmem:[#allocation5 + $0x14d8] sm:$0xff]  ;;  %v217_v4 = vld [vmem:[#allocation5 + $0x3d0] sm:$0xff] }
 0x1c7   :  { %2203 = vmatpush.msra.mxu2 %v216_v6  ;;  %2223 = vmatpush.msra.mxu3 %v728_v7  ;;  %v729_v5 = vld [vmem:[#allocation5 + $0x13d0] sm:$0xff]  ;;  %v218_v6 = vld [vmem:[#allocation5 + $0x3d8] sm:$0xff] }
 0x1c8   :  { %2164 = vmatpush.msra.mxu0 %v183_v8  ;;  %2184 = vmatpush.msra.mxu1 %v695_v9  ;;  %v730_v7 = vld [vmem:[#allocation5 + $0x13d8] sm:$0xff]  ;;  %v185_v8 = vld [vmem:[#allocation5 + $0x2d0] sm:$0xff] }
 0x1c9   :  { %2204 = vmatpush.msra.mxu2 %v184_v12  ;;  %2224 = vmatpush.msra.mxu3 %v696_v13  ;;  %v697_v9 = vld [vmem:[#allocation5 + $0x12d0] sm:$0xff]  ;;  %v186_v12 = vld [vmem:[#allocation5 + $0x2d8] sm:$0xff] }
 0x1ca   :  { %2165 = vmatpush.msra.mxu0 %v151_v14  ;;  %2185 = vmatpush.msra.mxu1 %v663_v15  ;;  %v698_v13 = vld [vmem:[#allocation5 + $0x12d8] sm:$0xff]  ;;  %v153_v14 = vld [vmem:[#allocation5 + $0x1d0] sm:$0xff] }
 0x1cb   :  { %2205 = vmatpush.msra.mxu2 %v152_v16  ;;  %2225 = vmatpush.msra.mxu3 %v664_v17  ;;  %v665_v15 = vld [vmem:[#allocation5 + $0x11d0] sm:$0xff]  ;;  %v154_v16 = vld [vmem:[#allocation5 + $0x1d8] sm:$0xff] }
 0x1cc   :  { %2166 = vmatpush.msra.mxu0 %v119_v20  ;;  %2186 = vmatpush.msra.mxu1 %v631_v0  ;;  %v666_v17 = vld [vmem:[#allocation5 + $0x11d8] sm:$0xff]  ;;  %v121_v20 = vld [vmem:[#allocation5 + $0xd0] sm:$0xff] }
 0x1cd   :  { %2206 = vmatpush.msra.mxu2 %v120_v1  ;;  %2226 = vmatpush.msra.mxu3 %v632_v21  ;;  %v633_v0 = vld [vmem:[#allocation5 + $0x10d0] sm:$0xff]  ;;  %v122_v1 = vld [vmem:[#allocation5 + $0xd8] sm:$0xff] }
 0x1ce   :  { %2087 = vmatmul.f32.vlgmr.msrb.gmra.mxu0 %v3943_v18  ;;  %2107 = vmatmul.f32.vlgmr.msrb.gmra.mxu1 %v3946_v19  ;;  %v634_v21 = vld [vmem:[#allocation5 + $0x10d8] sm:$0xff] }
 0x1cf   :  { %2127 = vmatmul.f32.vlgmr.msrb.gmra.mxu2 %v3943_v18  ;;  %2147 = vmatmul.f32.vlgmr.msrb.gmra.mxu3 %v3946_v19  ;;  %v1017_v18 = vld [vmem:[#allocation5 + $0x1cd0] sm:$0xff]  ;;  %v506_v19 = vld [vmem:[#allocation5 + $0xcd8] sm:$0xff] }
 0x1d0   :  { %2231 = vmatpush.msrb.mxu0 %v601_v22  ;;  %2251 = vmatpush.msrb.mxu1 %v1113_v23  ;;  %v603_v22 = vld [vmem:[#allocation5 + $0xfe0] sm:$0xff] }
 0x1d1   :  { %2271 = vmatpush.msrb.mxu2 %v602_v24  ;;  %2291 = vmatpush.msrb.mxu3 %v1114_v25  ;;  %v1115_v23 = vld [vmem:[#allocation5 + $0x1fe0] sm:$0xff]  ;;  %v3963_v24 = vld [vmem:[#allocation2] sm:$0xff]  ;;  %v3966_v25 = vld [vmem:[#allocation2 + $0x8] sm:$0xff] }
 0x1d2   :  { %2232 = vmatpush.msrb.mxu0 %v569_v26  ;;  %2252 = vmatpush.msrb.mxu1 %v1081_v10  ;;  %v604_v26 = vld [vmem:[#allocation5 + $0xfe8] sm:$0xff] }
 0x1d3   :  { %2272 = vmatpush.msrb.mxu2 %v570_v11  ;;  %2292 = vmatpush.msrb.mxu3 %v1082_v27  ;;  %v1116_v10 = vld [vmem:[#allocation5 + $0x1fe8] sm:$0xff]  ;;  %v571_v11 = vld [vmem:[#allocation5 + $0xee0] sm:$0xff] }
 0x1d4   :  { %2233 = vmatpush.msrb.mxu0 %v537_v28  ;;  %2253 = vmatpush.msrb.mxu1 %v1049_v29  ;;  %v1083_v27 = vld [vmem:[#allocation5 + $0x1ee0] sm:$0xff]  ;;  %v572_v28 = vld [vmem:[#allocation5 + $0xee8] sm:$0xff] }
 0x1d5   :  { %2273 = vmatpush.msrb.mxu2 %v538_v30  ;;  %2293 = vmatpush.msrb.mxu3 %v1050_v31  ;;  %v1084_v29 = vld [vmem:[#allocation5 + $0x1ee8] sm:$0xff]  ;;  %v539_v30 = vld [vmem:[#allocation5 + $0xde0] sm:$0xff] }
 0x1d6   :  { %2234 = vmatpush.msrb.mxu0 %v505_v32  ;;  %2254 = vmatpush.msrb.mxu1 %v1017_v18  ;;  %v1051_v31 = vld [vmem:[#allocation5 + $0x1de0] sm:$0xff]  ;;  %v540_v32 = vld [vmem:[#allocation5 + $0xde8] sm:$0xff] }
 0x1d7   :  { %2274 = vmatpush.msrb.mxu2 %v506_v19  ;;  %2294 = vmatpush.msrb.mxu3 %v1018_v33  ;;  %v1052_v18 = vld [vmem:[#allocation5 + $0x1de8] sm:$0xff]  ;;  %v507_v19 = vld [vmem:[#allocation5 + $0xce0] sm:$0xff] }
 0x1d8   :  { %2235 = vmatpush.msrb.mxu0 %v473_v34  ;;  %2255 = vmatpush.msrb.mxu1 %v985_v35  ;;  %v1019_v33 = vld [vmem:[#allocation5 + $0x1ce0] sm:$0xff]  ;;  %v508_v34 = vld [vmem:[#allocation5 + $0xce8] sm:$0xff] }
 0x1d9   :  { %2275 = vmatpush.msrb.mxu2 %v474_v36  ;;  %2295 = vmatpush.msrb.mxu3 %v986_v37  ;;  %v1020_v35 = vld [vmem:[#allocation5 + $0x1ce8] sm:$0xff]  ;;  %v475_v36 = vld [vmem:[#allocation5 + $0xbe0] sm:$0xff] }
 0x1da   :  { %2236 = vmatpush.msrb.mxu0 %v441_v38  ;;  %2256 = vmatpush.msrb.mxu1 %v953_v39  ;;  %v987_v37 = vld [vmem:[#allocation5 + $0x1be0] sm:$0xff]  ;;  %v476_v38 = vld [vmem:[#allocation5 + $0xbe8] sm:$0xff] }
 0x1db   :  { %2276 = vmatpush.msrb.mxu2 %v442_v40  ;;  %2296 = vmatpush.msrb.mxu3 %v954_v41  ;;  %v988_v39 = vld [vmem:[#allocation5 + $0x1be8] sm:$0xff]  ;;  %v443_v40 = vld [vmem:[#allocation5 + $0xae0] sm:$0xff] }
 0x1dc   :  { %2237 = vmatpush.msrb.mxu0 %v409_v42  ;;  %2257 = vmatpush.msrb.mxu1 %v921_v43  ;;  %v955_v41 = vld [vmem:[#allocation5 + $0x1ae0] sm:$0xff]  ;;  %v444_v42 = vld [vmem:[#allocation5 + $0xae8] sm:$0xff] }
 0x1dd   :  { %2277 = vmatpush.msrb.mxu2 %v410_v44  ;;  %2297 = vmatpush.msrb.mxu3 %v922_v45  ;;  %v956_v43 = vld [vmem:[#allocation5 + $0x1ae8] sm:$0xff]  ;;  %v411_v44 = vld [vmem:[#allocation5 + $0x9e0] sm:$0xff] }
 0x1de   :  { %2238 = vmatpush.msrb.mxu0 %v377_v46  ;;  %2258 = vmatpush.msrb.mxu1 %v889_v47  ;;  %v923_v45 = vld [vmem:[#allocation5 + $0x19e0] sm:$0xff]  ;;  %v412_v46 = vld [vmem:[#allocation5 + $0x9e8] sm:$0xff] }
 0x1df   :  { %2278 = vmatpush.msrb.mxu2 %v378_v48  ;;  %2298 = vmatpush.msrb.mxu3 %v890_v49  ;;  %v924_v47 = vld [vmem:[#allocation5 + $0x19e8] sm:$0xff]  ;;  %v379_v48 = vld [vmem:[#allocation5 + $0x8e0] sm:$0xff] }
 0x1e0   :  { %2239 = vmatpush.msrb.mxu0 %v345_v50  ;;  %2259 = vmatpush.msrb.mxu1 %v857_v51  ;;  %v891_v49 = vld [vmem:[#allocation5 + $0x18e0] sm:$0xff]  ;;  %v380_v50 = vld [vmem:[#allocation5 + $0x8e8] sm:$0xff] }
 0x1e1   :  { %2279 = vmatpush.msrb.mxu2 %v346_v52  ;;  %2299 = vmatpush.msrb.mxu3 %v858_v53  ;;  %v892_v51 = vld [vmem:[#allocation5 + $0x18e8] sm:$0xff]  ;;  %v347_v52 = vld [vmem:[#allocation5 + $0x7e0] sm:$0xff] }
 0x1e2   :  { %2240 = vmatpush.msrb.mxu0 %v313_v54  ;;  %2260 = vmatpush.msrb.mxu1 %v825_v55  ;;  %v859_v53 = vld [vmem:[#allocation5 + $0x17e0] sm:$0xff]  ;;  %v348_v54 = vld [vmem:[#allocation5 + $0x7e8] sm:$0xff] }
 0x1e3   :  { %2280 = vmatpush.msrb.mxu2 %v314_v56  ;;  %2300 = vmatpush.msrb.mxu3 %v826_v57  ;;  %v860_v55 = vld [vmem:[#allocation5 + $0x17e8] sm:$0xff]  ;;  %v315_v56 = vld [vmem:[#allocation5 + $0x6e0] sm:$0xff] }
 0x1e4   :  { %2241 = vmatpush.msrb.mxu0 %v281_v58  ;;  %2261 = vmatpush.msrb.mxu1 %v793_v59  ;;  %v827_v57 = vld [vmem:[#allocation5 + $0x16e0] sm:$0xff]  ;;  %v316_v58 = vld [vmem:[#allocation5 + $0x6e8] sm:$0xff] }
 0x1e5   :  { %2281 = vmatpush.msrb.mxu2 %v282_v60  ;;  %2301 = vmatpush.msrb.mxu3 %v794_v61  ;;  %v828_v59 = vld [vmem:[#allocation5 + $0x16e8] sm:$0xff]  ;;  %v283_v60 = vld [vmem:[#allocation5 + $0x5e0] sm:$0xff] }
 0x1e6   :  { %2242 = vmatpush.msrb.mxu0 %v249_v62  ;;  %2262 = vmatpush.msrb.mxu1 %v761_v63  ;;  %v795_v61 = vld [vmem:[#allocation5 + $0x15e0] sm:$0xff]  ;;  %v284_v62 = vld [vmem:[#allocation5 + $0x5e8] sm:$0xff] }
 0x1e7   :  { %2282 = vmatpush.msrb.mxu2 %v250_v2  ;;  %2302 = vmatpush.msrb.mxu3 %v762_v3  ;;  %v796_v63 = vld [vmem:[#allocation5 + $0x15e8] sm:$0xff]  ;;  %v251_v2 = vld [vmem:[#allocation5 + $0x4e0] sm:$0xff] }
 0x1e8   :  { %2243 = vmatpush.msrb.mxu0 %v217_v4  ;;  %2263 = vmatpush.msrb.mxu1 %v729_v5  ;;  %v763_v3 = vld [vmem:[#allocation5 + $0x14e0] sm:$0xff]  ;;  %v252_v4 = vld [vmem:[#allocation5 + $0x4e8] sm:$0xff] }
 0x1e9   :  { %2283 = vmatpush.msrb.mxu2 %v218_v6  ;;  %2303 = vmatpush.msrb.mxu3 %v730_v7  ;;  %v764_v5 = vld [vmem:[#allocation5 + $0x14e8] sm:$0xff]  ;;  %v219_v6 = vld [vmem:[#allocation5 + $0x3e0] sm:$0xff] }
 0x1ea   :  { %2244 = vmatpush.msrb.mxu0 %v185_v8  ;;  %2264 = vmatpush.msrb.mxu1 %v697_v9  ;;  %v731_v7 = vld [vmem:[#allocation5 + $0x13e0] sm:$0xff]  ;;  %v220_v8 = vld [vmem:[#allocation5 + $0x3e8] sm:$0xff] }
 0x1eb   :  { %2284 = vmatpush.msrb.mxu2 %v186_v12  ;;  %2304 = vmatpush.msrb.mxu3 %v698_v13  ;;  %v732_v9 = vld [vmem:[#allocation5 + $0x13e8] sm:$0xff]  ;;  %v187_v12 = vld [vmem:[#allocation5 + $0x2e0] sm:$0xff] }
 0x1ec   :  { %2245 = vmatpush.msrb.mxu0 %v153_v14  ;;  %2265 = vmatpush.msrb.mxu1 %v665_v15  ;;  %v699_v13 = vld [vmem:[#allocation5 + $0x12e0] sm:$0xff]  ;;  %v188_v14 = vld [vmem:[#allocation5 + $0x2e8] sm:$0xff] }
 0x1ed   :  { %2285 = vmatpush.msrb.mxu2 %v154_v16  ;;  %2305 = vmatpush.msrb.mxu3 %v666_v17  ;;  %v700_v15 = vld [vmem:[#allocation5 + $0x12e8] sm:$0xff]  ;;  %v155_v16 = vld [vmem:[#allocation5 + $0x1e0] sm:$0xff] }
 0x1ee   :  { %2246 = vmatpush.msrb.mxu0 %v121_v20  ;;  %2266 = vmatpush.msrb.mxu1 %v633_v0  ;;  %v667_v17 = vld [vmem:[#allocation5 + $0x11e0] sm:$0xff]  ;;  %v156_v20 = vld [vmem:[#allocation5 + $0x1e8] sm:$0xff] }
 0x1ef   :  { %2286 = vmatpush.msrb.mxu2 %v122_v1  ;;  %2306 = vmatpush.msrb.mxu3 %v634_v21  ;;  %v668_v0 = vld [vmem:[#allocation5 + $0x11e8] sm:$0xff]  ;;  %v123_v1 = vld [vmem:[#allocation5 + $0xe0] sm:$0xff] }
 0x1f0   :  { %2167 = vmatmul.f32.vlgmr.msra.gmra.mxu0 %v3963_v24  ;;  %2187 = vmatmul.f32.vlgmr.msra.gmra.mxu1 %v3966_v25  ;;  %v635_v21 = vld [vmem:[#allocation5 + $0x10e0] sm:$0xff] }
 0x1f1   :  { %2207 = vmatmul.f32.vlgmr.msra.gmra.mxu2 %v3963_v24  ;;  %2227 = vmatmul.f32.vlgmr.msra.gmra.mxu3 %v3966_v25 }
 0x1f2   :  { %2311 = vmatpush.msra.mxu0 %v603_v22  ;;  %2331 = vmatpush.msra.mxu1 %v1115_v23  ;;  %v124_v22 = vld [vmem:[#allocation5 + $0xe8] sm:$0xff] }
 0x1f3   :  { %2351 = vmatpush.msra.mxu2 %v604_v26  ;;  %2371 = vmatpush.msra.mxu3 %v1116_v10  ;;  %v636_v23 = vld [vmem:[#allocation5 + $0x10e8] sm:$0xff]  ;;  %v605_v26 = vld [vmem:[#allocation5 + $0xff0] sm:$0xff] }
 0x1f4   :  { %2312 = vmatpush.msra.mxu0 %v571_v11  ;;  %2332 = vmatpush.msra.mxu1 %v1083_v27  ;;  %v1117_v10 = vld [vmem:[#allocation5 + $0x1ff0] sm:$0xff]  ;;  %v606_v11 = vld [vmem:[#allocation5 + $0xff8] sm:$0xff] }
 0x1f5   :  { %2352 = vmatpush.msra.mxu2 %v572_v28  ;;  %2372 = vmatpush.msra.mxu3 %v1084_v29  ;;  %v1118_v27 = vld [vmem:[#allocation5 + $0x1ff8] sm:$0xff]  ;;  %v573_v28 = vld [vmem:[#allocation5 + $0xef0] sm:$0xff] }
 0x1f6   :  { %2313 = vmatpush.msra.mxu0 %v539_v30  ;;  %2333 = vmatpush.msra.mxu1 %v1051_v31  ;;  %v1085_v29 = vld [vmem:[#allocation5 + $0x1ef0] sm:$0xff]  ;;  %v574_v30 = vld [vmem:[#allocation5 + $0xef8] sm:$0xff] }
 0x1f7   :  { %2353 = vmatpush.msra.mxu2 %v540_v32  ;;  %2373 = vmatpush.msra.mxu3 %v1052_v18  ;;  %v1086_v31 = vld [vmem:[#allocation5 + $0x1ef8] sm:$0xff]  ;;  %v541_v32 = vld [vmem:[#allocation5 + $0xdf0] sm:$0xff] }
 0x1f8   :  { %2314 = vmatpush.msra.mxu0 %v507_v19  ;;  %2334 = vmatpush.msra.mxu1 %v1019_v33  ;;  %v1053_v18 = vld [vmem:[#allocation5 + $0x1df0] sm:$0xff]  ;;  %v542_v19 = vld [vmem:[#allocation5 + $0xdf8] sm:$0xff] }
 0x1f9   :  { %2354 = vmatpush.msra.mxu2 %v508_v34  ;;  %2374 = vmatpush.msra.mxu3 %v1020_v35  ;;  %v1054_v33 = vld [vmem:[#allocation5 + $0x1df8] sm:$0xff]  ;;  %v509_v34 = vld [vmem:[#allocation5 + $0xcf0] sm:$0xff] }
 0x1fa   :  { %2315 = vmatpush.msra.mxu0 %v475_v36  ;;  %2335 = vmatpush.msra.mxu1 %v987_v37  ;;  %v1021_v35 = vld [vmem:[#allocation5 + $0x1cf0] sm:$0xff]  ;;  %v510_v36 = vld [vmem:[#allocation5 + $0xcf8] sm:$0xff] }
 0x1fb   :  { %2355 = vmatpush.msra.mxu2 %v476_v38  ;;  %2375 = vmatpush.msra.mxu3 %v988_v39  ;;  %v1022_v37 = vld [vmem:[#allocation5 + $0x1cf8] sm:$0xff]  ;;  %v477_v38 = vld [vmem:[#allocation5 + $0xbf0] sm:$0xff] }
 0x1fc   :  { %2316 = vmatpush.msra.mxu0 %v443_v40  ;;  %2336 = vmatpush.msra.mxu1 %v955_v41  ;;  %v989_v39 = vld [vmem:[#allocation5 + $0x1bf0] sm:$0xff]  ;;  %v478_v40 = vld [vmem:[#allocation5 + $0xbf8] sm:$0xff] }
 0x1fd   :  { %2356 = vmatpush.msra.mxu2 %v444_v42  ;;  %2376 = vmatpush.msra.mxu3 %v956_v43  ;;  %v990_v41 = vld [vmem:[#allocation5 + $0x1bf8] sm:$0xff]  ;;  %v445_v42 = vld [vmem:[#allocation5 + $0xaf0] sm:$0xff] }
 0x1fe   :  { %2317 = vmatpush.msra.mxu0 %v411_v44  ;;  %2337 = vmatpush.msra.mxu1 %v923_v45  ;;  %v957_v43 = vld [vmem:[#allocation5 + $0x1af0] sm:$0xff]  ;;  %v446_v44 = vld [vmem:[#allocation5 + $0xaf8] sm:$0xff] }
 0x1ff   :  { %2357 = vmatpush.msra.mxu2 %v412_v46  ;;  %2377 = vmatpush.msra.mxu3 %v924_v47  ;;  %v958_v45 = vld [vmem:[#allocation5 + $0x1af8] sm:$0xff]  ;;  %v413_v46 = vld [vmem:[#allocation5 + $0x9f0] sm:$0xff] }
 0x200   :  { %2318 = vmatpush.msra.mxu0 %v379_v48  ;;  %2338 = vmatpush.msra.mxu1 %v891_v49  ;;  %v925_v47 = vld [vmem:[#allocation5 + $0x19f0] sm:$0xff]  ;;  %v414_v48 = vld [vmem:[#allocation5 + $0x9f8] sm:$0xff] }
 0x201   :  { %2358 = vmatpush.msra.mxu2 %v380_v50  ;;  %2378 = vmatpush.msra.mxu3 %v892_v51  ;;  %v926_v49 = vld [vmem:[#allocation5 + $0x19f8] sm:$0xff]  ;;  %v381_v50 = vld [vmem:[#allocation5 + $0x8f0] sm:$0xff] }
 0x202   :  { %2319 = vmatpush.msra.mxu0 %v347_v52  ;;  %2339 = vmatpush.msra.mxu1 %v859_v53  ;;  %v893_v51 = vld [vmem:[#allocation5 + $0x18f0] sm:$0xff]  ;;  %v382_v52 = vld [vmem:[#allocation5 + $0x8f8] sm:$0xff] }
 0x203   :  { %2359 = vmatpush.msra.mxu2 %v348_v54  ;;  %2379 = vmatpush.msra.mxu3 %v860_v55  ;;  %v894_v53 = vld [vmem:[#allocation5 + $0x18f8] sm:$0xff]  ;;  %v349_v54 = vld [vmem:[#allocation5 + $0x7f0] sm:$0xff] }
 0x204   :  { %2320 = vmatpush.msra.mxu0 %v315_v56  ;;  %2340 = vmatpush.msra.mxu1 %v827_v57  ;;  %v861_v55 = vld [vmem:[#allocation5 + $0x17f0] sm:$0xff]  ;;  %v350_v56 = vld [vmem:[#allocation5 + $0x7f8] sm:$0xff] }
 0x205   :  { %2360 = vmatpush.msra.mxu2 %v316_v58  ;;  %2380 = vmatpush.msra.mxu3 %v828_v59  ;;  %v862_v57 = vld [vmem:[#allocation5 + $0x17f8] sm:$0xff]  ;;  %v317_v58 = vld [vmem:[#allocation5 + $0x6f0] sm:$0xff] }
 0x206   :  { %2321 = vmatpush.msra.mxu0 %v283_v60  ;;  %2341 = vmatpush.msra.mxu1 %v795_v61  ;;  %v829_v59 = vld [vmem:[#allocation5 + $0x16f0] sm:$0xff]  ;;  %v318_v60 = vld [vmem:[#allocation5 + $0x6f8] sm:$0xff] }
 0x207   :  { %2361 = vmatpush.msra.mxu2 %v284_v62  ;;  %2381 = vmatpush.msra.mxu3 %v796_v63  ;;  %v830_v61 = vld [vmem:[#allocation5 + $0x16f8] sm:$0xff]  ;;  %v285_v62 = vld [vmem:[#allocation5 + $0x5f0] sm:$0xff] }
 0x208   :  { %2322 = vmatpush.msra.mxu0 %v251_v2  ;;  %2342 = vmatpush.msra.mxu1 %v763_v3  ;;  %v797_v63 = vld [vmem:[#allocation5 + $0x15f0] sm:$0xff]  ;;  %v286_v2 = vld [vmem:[#allocation5 + $0x5f8] sm:$0xff] }
 0x209   :  { %2362 = vmatpush.msra.mxu2 %v252_v4  ;;  %2382 = vmatpush.msra.mxu3 %v764_v5  ;;  %v798_v3 = vld [vmem:[#allocation5 + $0x15f8] sm:$0xff]  ;;  %v253_v4 = vld [vmem:[#allocation5 + $0x4f0] sm:$0xff] }
 0x20a   :  { %2323 = vmatpush.msra.mxu0 %v219_v6  ;;  %2343 = vmatpush.msra.mxu1 %v731_v7  ;;  %v765_v5 = vld [vmem:[#allocation5 + $0x14f0] sm:$0xff]  ;;  %v254_v6 = vld [vmem:[#allocation5 + $0x4f8] sm:$0xff] }
 0x20b   :  { %2363 = vmatpush.msra.mxu2 %v220_v8  ;;  %2383 = vmatpush.msra.mxu3 %v732_v9  ;;  %v766_v7 = vld [vmem:[#allocation5 + $0x14f8] sm:$0xff]  ;;  %v221_v8 = vld [vmem:[#allocation5 + $0x3f0] sm:$0xff] }
 0x20c   :  { %2324 = vmatpush.msra.mxu0 %v187_v12  ;;  %2344 = vmatpush.msra.mxu1 %v699_v13  ;;  %v733_v9 = vld [vmem:[#allocation5 + $0x13f0] sm:$0xff]  ;;  %v222_v12 = vld [vmem:[#allocation5 + $0x3f8] sm:$0xff] }
 0x20d   :  { %2364 = vmatpush.msra.mxu2 %v188_v14  ;;  %2384 = vmatpush.msra.mxu3 %v700_v15  ;;  %v734_v13 = vld [vmem:[#allocation5 + $0x13f8] sm:$0xff]  ;;  %v189_v14 = vld [vmem:[#allocation5 + $0x2f0] sm:$0xff] }
 0x20e   :  { %2325 = vmatpush.msra.mxu0 %v155_v16  ;;  %2345 = vmatpush.msra.mxu1 %v667_v17  ;;  %v701_v15 = vld [vmem:[#allocation5 + $0x12f0] sm:$0xff]  ;;  %v190_v16 = vld [vmem:[#allocation5 + $0x2f8] sm:$0xff] }
 0x20f   :  { %2365 = vmatpush.msra.mxu2 %v156_v20  ;;  %2385 = vmatpush.msra.mxu3 %v668_v0  ;;  %v702_v17 = vld [vmem:[#allocation5 + $0x12f8] sm:$0xff]  ;;  %v157_v20 = vld [vmem:[#allocation5 + $0x1f0] sm:$0xff] }
 0x210   :  { %2326 = vmatpush.msra.mxu0 %v123_v1  ;;  %2346 = vmatpush.msra.mxu1 %v635_v21  ;;  %v669_v0 = vld [vmem:[#allocation5 + $0x11f0] sm:$0xff]  ;;  %v158_v1 = vld [vmem:[#allocation5 + $0x1f8] sm:$0xff] }
 0x211   :  { %2366 = vmatpush.msra.mxu2 %v124_v22  ;;  %2386 = vmatpush.msra.mxu3 %v636_v23  ;;  %v670_v21 = vld [vmem:[#allocation5 + $0x11f8] sm:$0xff]  ;;  %v125_v22 = vld [vmem:[#allocation5 + $0xf0] sm:$0xff] }
 0x212   :  { %2247 = vmatmul.f32.vlgmr.msrb.gmra.mxu0 %v3963_v24  ;;  %2267 = vmatmul.f32.vlgmr.msrb.gmra.mxu1 %v3966_v25  ;;  %v637_v23 = vld [vmem:[#allocation5 + $0x10f0] sm:$0xff] }
 0x213   :  { %2287 = vmatmul.f32.vlgmr.msrb.gmra.mxu2 %v3963_v24  ;;  %2307 = vmatmul.f32.vlgmr.msrb.gmra.mxu3 %v3966_v25 }
 0x214   :  { %2391 = vmatpush.msrb.mxu0 %v605_v26  ;;  %2411 = vmatpush.msrb.mxu1 %v1117_v10  ;;  %v126_v26 = vld [vmem:[#allocation5 + $0xf8] sm:$0xff] }
 0x215   :  { %2431 = vmatpush.msrb.mxu2 %v606_v11  ;;  %2451 = vmatpush.msrb.mxu3 %v1118_v27  ;;  %v638_v10 = vld [vmem:[#allocation5 + $0x10f8] sm:$0xff] }
 0x216   :  { %2392 = vmatpush.msrb.mxu0 %v573_v28  ;;  %2412 = vmatpush.msrb.mxu1 %v1085_v29  ;;  %v2518_v11 = vld [vmem:[#allocation8 + $0x78] sm:$0xff] }
 0x217   :  { %2432 = vmatpush.msrb.mxu2 %v574_v30  ;;  %2452 = vmatpush.msrb.mxu3 %v1086_v31  ;;  %v2534_v27 = vld [vmem:[#allocation8 + $0xf8] sm:$0xff]  ;;  %v2517_v30 = vld [vmem:[#allocation8 + $0x70] sm:$0xff] }
 0x218   :  { %2393 = vmatpush.msrb.mxu0 %v541_v32  ;;  %2413 = vmatpush.msrb.mxu1 %v1053_v18  ;;  %v2550_v28 = vld [vmem:[#allocation8 + $0x178] sm:$0xff]  ;;  %v2533_v31 = vld [vmem:[#allocation8 + $0xf0] sm:$0xff] }
 0x219   :  { %2433 = vmatpush.msrb.mxu2 %v542_v19  ;;  %2453 = vmatpush.msrb.mxu3 %v1054_v33  ;;  %v2566_v29 = vld [vmem:[#allocation8 + $0x1f8] sm:$0xff]  ;;  %v2549_v32 = vld [vmem:[#allocation8 + $0x170] sm:$0xff]  ;;  %v2516_v19 = vld [vmem:[#allocation8 + $0x68] sm:$0xff] }
 0x21a   :  { %2394 = vmatpush.msrb.mxu0 %v509_v34  ;;  %2414 = vmatpush.msrb.mxu1 %v1021_v35  ;;  %v2565_v18 = vld [vmem:[#allocation8 + $0x1f0] sm:$0xff]  ;;  %v2532_v33 = vld [vmem:[#allocation8 + $0xe8] sm:$0xff] }
 0x21b   :  { %2434 = vmatpush.msrb.mxu2 %v510_v36  ;;  %2454 = vmatpush.msrb.mxu3 %v1022_v37  ;;  %v2548_v34 = vld [vmem:[#allocation8 + $0x168] sm:$0xff]  ;;  %v2515_v36 = vld [vmem:[#allocation8 + $0x60] sm:$0xff] }
 0x21c   :  { %2395 = vmatpush.msrb.mxu0 %v477_v38  ;;  %2415 = vmatpush.msrb.mxu1 %v989_v39  ;;  %v2564_v35 = vld [vmem:[#allocation8 + $0x1e8] sm:$0xff]  ;;  %v2531_v37 = vld [vmem:[#allocation8 + $0xe0] sm:$0xff] }
 0x21d   :  { %2435 = vmatpush.msrb.mxu2 %v478_v40  ;;  %2455 = vmatpush.msrb.mxu3 %v990_v41  ;;  %v2547_v38 = vld [vmem:[#allocation8 + $0x160] sm:$0xff]  ;;  %v2514_v40 = vld [vmem:[#allocation8 + $0x58] sm:$0xff] }
 0x21e   :  { %2396 = vmatpush.msrb.mxu0 %v445_v42  ;;  %2416 = vmatpush.msrb.mxu1 %v957_v43  ;;  %v2563_v39 = vld [vmem:[#allocation8 + $0x1e0] sm:$0xff]  ;;  %v2530_v41 = vld [vmem:[#allocation8 + $0xd8] sm:$0xff] }
 0x21f   :  { %2436 = vmatpush.msrb.mxu2 %v446_v44  ;;  %2456 = vmatpush.msrb.mxu3 %v958_v45  ;;  %v2546_v42 = vld [vmem:[#allocation8 + $0x158] sm:$0xff]  ;;  %v2513_v44 = vld [vmem:[#allocation8 + $0x50] sm:$0xff] }
 0x220   :  { %2397 = vmatpush.msrb.mxu0 %v413_v46  ;;  %2417 = vmatpush.msrb.mxu1 %v925_v47  ;;  %v2562_v43 = vld [vmem:[#allocation8 + $0x1d8] sm:$0xff]  ;;  %v2529_v45 = vld [vmem:[#allocation8 + $0xd0] sm:$0xff] }
 0x221   :  { %2437 = vmatpush.msrb.mxu2 %v414_v48  ;;  %2457 = vmatpush.msrb.mxu3 %v926_v49  ;;  %v2545_v46 = vld [vmem:[#allocation8 + $0x150] sm:$0xff]  ;;  %v2512_v48 = vld [vmem:[#allocation8 + $0x48] sm:$0xff] }
 0x222   :  { %2398 = vmatpush.msrb.mxu0 %v381_v50  ;;  %2418 = vmatpush.msrb.mxu1 %v893_v51  ;;  %v2561_v47 = vld [vmem:[#allocation8 + $0x1d0] sm:$0xff]  ;;  %v2528_v49 = vld [vmem:[#allocation8 + $0xc8] sm:$0xff] }
 0x223   :  { %2438 = vmatpush.msrb.mxu2 %v382_v52  ;;  %2458 = vmatpush.msrb.mxu3 %v894_v53  ;;  %v2544_v50 = vld [vmem:[#allocation8 + $0x148] sm:$0xff]  ;;  %v2511_v52 = vld [vmem:[#allocation8 + $0x40] sm:$0xff] }
 0x224   :  { %2399 = vmatpush.msrb.mxu0 %v349_v54  ;;  %2419 = vmatpush.msrb.mxu1 %v861_v55  ;;  %v2560_v51 = vld [vmem:[#allocation8 + $0x1c8] sm:$0xff]  ;;  %v2527_v53 = vld [vmem:[#allocation8 + $0xc0] sm:$0xff] }
 0x225   :  { %2439 = vmatpush.msrb.mxu2 %v350_v56  ;;  %2459 = vmatpush.msrb.mxu3 %v862_v57  ;;  %v2543_v54 = vld [vmem:[#allocation8 + $0x140] sm:$0xff]  ;;  %v2510_v56 = vld [vmem:[#allocation8 + $0x38] sm:$0xff] }
 0x226   :  { %2400 = vmatpush.msrb.mxu0 %v317_v58  ;;  %2420 = vmatpush.msrb.mxu1 %v829_v59  ;;  %v2559_v55 = vld [vmem:[#allocation8 + $0x1c0] sm:$0xff]  ;;  %v2526_v57 = vld [vmem:[#allocation8 + $0xb8] sm:$0xff]  ;;  %v1208_v58 = vpop.f32.mrf.mxu0  ;;  %v1248_v59 = vpop.f32.mrf.mxu2 }
 0x227   :  { %2440 = vmatpush.msrb.mxu2 %v318_v60  ;;  %2460 = vmatpush.msrb.mxu3 %v830_v61  ;;  %v2542_v60 = vld [vmem:[#allocation8 + $0x138] sm:$0xff] }
 0x228   :  { %2401 = vmatpush.msrb.mxu0 %v285_v62  ;;  %2421 = vmatpush.msrb.mxu1 %v797_v63  ;;  %v2558_v61 = vld [vmem:[#allocation8 + $0x1b8] sm:$0xff]  ;;  %v2509_v62 = vld [vmem:[#allocation8 + $0x30] sm:$0xff] }
 0x229   :  { %2441 = vmatpush.msrb.mxu2 %v286_v2  ;;  %2461 = vmatpush.msrb.mxu3 %v798_v3  ;;  %v2525_v63 = vld [vmem:[#allocation8 + $0xb0] sm:$0xff] }
 0x22a   :  { %2402 = vmatpush.msrb.mxu0 %v253_v4  ;;  %2422 = vmatpush.msrb.mxu1 %v765_v5  ;;  %v2541_v2 = vld [vmem:[#allocation8 + $0x130] sm:$0xff]  ;;  %v3979_v4 = vld [vmem:[#allocation7] sm:$0xff]  ;;  %v2508_v5 = vld [vmem:[#allocation8 + $0x28] sm:$0xff] }
 0x22b   :  { %2442 = vmatpush.msrb.mxu2 %v254_v6  ;;  %2462 = vmatpush.msrb.mxu3 %v766_v7  ;;  %v2557_v3 = vld [vmem:[#allocation8 + $0x1b0] sm:$0xff]  ;;  %v2524_v6 = vld [vmem:[#allocation8 + $0xa8] sm:$0xff]  ;;  %v1228_v7 = vpop.f32.mrf.mxu1 }
 0x22c   :  { %2403 = vmatpush.msrb.mxu0 %v221_v8  ;;  %2423 = vmatpush.msrb.mxu1 %v733_v9  ;;  %v1268_v8 = vpop.f32.mrf.mxu3  ;;  %v2540_v9 = vld [vmem:[#allocation8 + $0x128] sm:$0xff] }
 0x22d   :  { %2443 = vmatpush.msrb.mxu2 %v222_v12  ;;  %2463 = vmatpush.msrb.mxu3 %v734_v13  ;;  %v2556_v12 = vld [vmem:[#allocation8 + $0x1a8] sm:$0xff]  ;;  %v2507_v13 = vld [vmem:[#allocation8 + $0x20] sm:$0xff] }
 0x22e   :  { %2404 = vmatpush.msrb.mxu0 %v189_v14  ;;  %2424 = vmatpush.msrb.mxu1 %v701_v15  ;;  %v2523_v14 = vld [vmem:[#allocation8 + $0xa0] sm:$0xff]  ;;  %v1127_v15 = vperm.slane %v3979_v4, 0 }
 0x22f   :  { %2444 = vmatpush.msrb.mxu2 %v190_v16  ;;  %2464 = vmatpush.msrb.mxu3 %v702_v17  ;;  %v1128_v16 = vperm.slane %v3979_v4, 1  ;;  %v2539_v17 = vld [vmem:[#allocation8 + $0x120] sm:$0xff] }
 0x230   :  { %2405 = vmatpush.msrb.mxu0 %v157_v20  ;;  %2425 = vmatpush.msrb.mxu1 %v669_v0  ;;  %v2555_v20 = vld [vmem:[#allocation8 + $0x1a0] sm:$0xff]  ;;  %v1129_v0 = vperm.slane %v3979_v4, 2 }
 0x231   :  { %2445 = vmatpush.msrb.mxu2 %v158_v1  ;;  %2465 = vmatpush.msrb.mxu3 %v670_v21  ;;  %v1130_v1 = vperm.slane %v3979_v4, 3  ;;  %v1288_v21 = vpop.f32.mrf.mxu0 }
 0x232   :  { %2406 = vmatpush.msrb.mxu0 %v125_v22  ;;  %2426 = vmatpush.msrb.mxu1 %v637_v23  ;;  %v1328_v22 = vpop.f32.mrf.mxu2  ;;  %v2506_v23 = vld [vmem:[#allocation8 + $0x18] sm:$0xff] }
 0x233   :  { %2446 = vmatpush.msrb.mxu2 %v126_v26  ;;  %2466 = vmatpush.msrb.mxu3 %v638_v10  ;;  %v2522_v26 = vld [vmem:[#allocation8 + $0x98] sm:$0xff]  ;;  %v1209_v10 = vadd.f32 %v1208_v58, %v1127_v15  ;;  %v2596_v58 = vld [vmem:[#allocation8 + $0x2e8] sm:$0xff] }
 0x234   :  { %2327 = vmatmul.f32.vlgmr.msra.gmra.mxu0 %v3963_v24  ;;  %2347 = vmatmul.f32.vlgmr.msra.gmra.mxu1 %v3966_v25  ;;  %v2592_v15 = vld [vmem:[#allocation8 + $0x2c8] sm:$0xff] }
 0x235   :  { %2367 = vmatmul.f32.vlgmr.msra.gmra.mxu2 %v3963_v24  ;;  %2387 = vmatmul.f32.vlgmr.msra.gmra.mxu3 %v3966_v25 }
 0x236   :  { %3019 = vmatpush.msra.mxu0 %v2518_v11  ;;  %3039 = vmatpush.msra.mxu1 %v2534_v27  ;;  %v1249_v11 = vadd.f32 %v1248_v59, %v1128_v16  ;;  %v2538_v27 = vld [vmem:[#allocation8 + $0x118] sm:$0xff]  ;;  %v2612_v59 = vld [vmem:[#allocation8 + $0x368] sm:$0xff] }
 0x237   :  { %3059 = vmatpush.msra.mxu2 %v2550_v28  ;;  %3079 = vmatpush.msra.mxu3 %v2566_v29  ;;  %v2554_v28 = vld [vmem:[#allocation8 + $0x198] sm:$0xff]  ;;  %v1289_v29 = vadd.f32 %v1288_v21, %v1129_v0  ;;  %v2608_v16 = vld [vmem:[#allocation8 + $0x348] sm:$0xff]  ;;  %v2591_v0 = vld [vmem:[#allocation8 + $0x2c0] sm:$0xff] }
 0x238   :  { %3020 = vmatpush.msra.mxu0 %v2517_v30  ;;  %3040 = vmatpush.msra.mxu1 %v2533_v31  ;;  %v1329_v30 = vadd.f32 %v1328_v22, %v1130_v1  ;;  %v2505_v31 = vld [vmem:[#allocation8 + $0x10] sm:$0xff]  ;;  %v2607_v22 = vld [vmem:[#allocation8 + $0x340] sm:$0xff] }
 0x239   :  { %3060 = vmatpush.msra.mxu2 %v2549_v32  ;;  %3080 = vmatpush.msra.mxu3 %v2565_v18  ;;  %v2521_v32 = vld [vmem:[#allocation8 + $0x90] sm:$0xff]  ;;  %v1308_v18 = vpop.f32.mrf.mxu1  ;;  %v1368_v1 = vpop.f32.mrf.mxu0 }
 0x23a   :  { %3021 = vmatpush.msra.mxu0 %v2516_v19  ;;  %3041 = vmatpush.msra.mxu1 %v2532_v33  ;;  %v1348_v19 = vpop.f32.mrf.mxu3  ;;  %v2537_v33 = vld [vmem:[#allocation8 + $0x110] sm:$0xff]  ;;  %v1408_v21 = vpop.f32.mrf.mxu2 }
 0x23b   :  { %3061 = vmatpush.msra.mxu2 %v2548_v34  ;;  %3081 = vmatpush.msra.mxu3 %v2564_v35  ;;  %v2553_v34 = vld [vmem:[#allocation8 + $0x190] sm:$0xff]  ;;  %v2504_v35 = vld [vmem:[#allocation8 + $0x8] sm:$0xff] }
 0x23c   :  { %3022 = vmatpush.msra.mxu0 %v2515_v36  ;;  %3042 = vmatpush.msra.mxu1 %v2531_v37  ;;  %v2520_v36 = vld [vmem:[#allocation8 + $0x88] sm:$0xff]  ;;  %v1229_v37 = vadd.f32 %v1228_v7, %v1209_v10  ;;  %v2626_v7 = vld [vmem:[#allocation8 + $0x3d8] sm:$0xff] }
 0x23d   :  { %3062 = vmatpush.msra.mxu2 %v2547_v38  ;;  %3082 = vmatpush.msra.mxu3 %v2563_v39  ;;  %v1269_v38 = vadd.f32 %v1268_v8, %v1249_v11  ;;  %v2536_v39 = vld [vmem:[#allocation8 + $0x108] sm:$0xff]  ;;  %v2577_v8 = vld [vmem:[#allocation8 + $0x250] sm:$0xff]  ;;  %v2590_v10 = vld [vmem:[#allocation8 + $0x2b8] sm:$0xff] }
 0x23e   :  { %3023 = vmatpush.msra.mxu0 %v2514_v40  ;;  %3043 = vmatpush.msra.mxu1 %v2530_v41  ;;  %v1309_v40 = vadd.f32 %v1308_v18, %v1289_v29  ;;  %v2503_v41 = vld [vmem:[#allocation8] sm:$0xff]  ;;  %v2606_v11 = vld [vmem:[#allocation8 + $0x338] sm:$0xff]  ;;  %v2589_v29 = vld [vmem:[#allocation8 + $0x2b0] sm:$0xff] }
 0x23f   :  { %3063 = vmatpush.msra.mxu2 %v2546_v42  ;;  %3083 = vmatpush.msra.mxu3 %v2562_v43  ;;  %v2519_v42 = vld [vmem:[#allocation8 + $0x80] sm:$0xff]  ;;  %v2621_v18 = vld [vmem:[#allocation8 + $0x3b0] sm:$0xff] }
 0x240   :  { %3024 = vmatpush.msra.mxu0 %v2513_v44  ;;  %3044 = vmatpush.msra.mxu1 %v2529_v45  ;;  %v2535_v43 = vld [vmem:[#allocation8 + $0x100] sm:$0xff]  ;;  %v2471_v45 = vmax.f32 %v1229_v37, 0.0  ;;  %v2620_v37 = vld [vmem:[#allocation8 + $0x3a8] sm:$0xff] }
 0x241   :  { %3064 = vmatpush.msra.mxu2 %v2545_v46  ;;  %3084 = vmatpush.msra.mxu3 %v2561_v47  ;;  %v2551_v44 = vld [vmem:[#allocation8 + $0x180] sm:$0xff]  ;;  %v2472_v46 = vmax.f32 %v1269_v38, 0.0  ;;  %v2473_v47 = vmax.f32 %v1309_v40, 0.0  ;;  %v1133_v38 = vperm.slane %v3979_v4, 6 }
 0x242   :  { %3025 = vmatpush.msra.mxu0 %v2512_v48  ;;  %3045 = vmatpush.msra.mxu1 %v2528_v49  ;;  %v2582_v49 = vld [vmem:[#allocation8 + $0x278] sm:$0xff]  ;;  %v2587_v40 = vld [vmem:[#allocation8 + $0x2a0] sm:$0xff] }
 0x243   :  { %3065 = vmatpush.msra.mxu2 %v2544_v50  ;;  %3085 = vmatpush.msra.mxu3 %v2560_v51  ;;  %v2598_v50 = vld [vmem:[#allocation8 + $0x2f8] sm:$0xff] }
 0x244   :  { %3026 = vmatpush.msra.mxu0 %v2511_v52  ;;  %3046 = vmatpush.msra.mxu1 %v2527_v53  ;;  %v2614_v51 = vld [vmem:[#allocation8 + $0x378] sm:$0xff]  ;;  %v2581_v53 = vld [vmem:[#allocation8 + $0x270] sm:$0xff] }
 0x245   :  { %3066 = vmatpush.msra.mxu2 %v2543_v54  ;;  %3086 = vmatpush.msra.mxu3 %v2559_v55  ;;  %v2630_v52 = vld [vmem:[#allocation8 + $0x3f8] sm:$0xff]  ;;  %v2597_v54 = vld [vmem:[#allocation8 + $0x2f0] sm:$0xff] }
 0x246   :  { %3027 = vmatpush.msra.mxu0 %v2510_v56  ;;  %3047 = vmatpush.msra.mxu1 %v2526_v57  ;;  %v2613_v55 = vld [vmem:[#allocation8 + $0x370] sm:$0xff]  ;;  %v2580_v57 = vld [vmem:[#allocation8 + $0x268] sm:$0xff] }
 0x247   :  { %3067 = vmatpush.msra.mxu2 %v2542_v60  ;;  %3087 = vmatpush.msra.mxu3 %v2558_v61  ;;  %v2629_v56 = vld [vmem:[#allocation8 + $0x3f0] sm:$0xff]  ;;  %v2628_v60 = vld [vmem:[#allocation8 + $0x3e8] sm:$0xff]  ;;  %v2579_v61 = vld [vmem:[#allocation8 + $0x260] sm:$0xff] }
 0x248   :  { %3028 = vmatpush.msra.mxu0 %v2509_v62  ;;  %3048 = vmatpush.msra.mxu1 %v2525_v63  ;;  %v2595_v62 = vld [vmem:[#allocation8 + $0x2e0] sm:$0xff] }
 0x249   :  { %3068 = vmatpush.msra.mxu2 %v2541_v2  ;;  %3088 = vmatpush.msra.mxu3 %v2557_v3  ;;  %v2611_v63 = vld [vmem:[#allocation8 + $0x360] sm:$0xff]  ;;  %v2578_v3 = vld [vmem:[#allocation8 + $0x258] sm:$0xff] }
 0x24a   :  { %3029 = vmatpush.msra.mxu0 %v2508_v5  ;;  %3049 = vmatpush.msra.mxu1 %v2524_v6  ;;  %v2627_v2 = vld [vmem:[#allocation8 + $0x3e0] sm:$0xff]  ;;  %v2594_v5 = vld [vmem:[#allocation8 + $0x2d8] sm:$0xff] }
 0x24b   :  { %3069 = vmatpush.msra.mxu2 %v2540_v9  ;;  %3089 = vmatpush.msra.mxu3 %v2556_v12  ;;  %v2610_v6 = vld [vmem:[#allocation8 + $0x358] sm:$0xff]  ;;  %v2593_v9 = vld [vmem:[#allocation8 + $0x2d0] sm:$0xff] }
 0x24c   :  { %3030 = vmatpush.msra.mxu0 %v2507_v13  ;;  %3050 = vmatpush.msra.mxu1 %v2523_v14  ;;  %v2609_v12 = vld [vmem:[#allocation8 + $0x350] sm:$0xff]  ;;  %v2576_v14 = vld [vmem:[#allocation8 + $0x248] sm:$0xff] }
 0x24d   :  { %3070 = vmatpush.msra.mxu2 %v2539_v17  ;;  %3090 = vmatpush.msra.mxu3 %v2555_v20  ;;  %v2625_v13 = vld [vmem:[#allocation8 + $0x3d0] sm:$0xff]  ;;  %v2624_v17 = vld [vmem:[#allocation8 + $0x3c8] sm:$0xff]  ;;  %v2575_v20 = vld [vmem:[#allocation8 + $0x240] sm:$0xff] }
 0x24e   :  { %2407 = vmatmul.f32.vlgmr.msrb.gmra.mxu0 %v3963_v24  ;;  %2427 = vmatmul.f32.vlgmr.msrb.gmra.mxu1 %v3966_v25 }
 0x24f   :  { %2447 = vmatmul.f32.vlgmr.msrb.gmra.mxu2 %v3963_v24  ;;  %2467 = vmatmul.f32.vlgmr.msrb.gmra.mxu3 %v3966_v25  ;;  %v2552_v24 = vld [vmem:[#allocation8 + $0x188] sm:$0xff]  ;;  %v1349_v25 = vadd.f32 %v1348_v19, %v1329_v30  ;;  %v1388_v30 = vpop.f32.mrf.mxu1 }
 0x250   :  { %3031 = vmatpush.msra.mxu0 %v2506_v23  ;;  %3051 = vmatpush.msra.mxu1 %v2522_v26  ;;  %v2623_v23 = vld [vmem:[#allocation8 + $0x3c0] sm:$0xff]  ;;  %v2574_v26 = vld [vmem:[#allocation8 + $0x238] sm:$0xff]  ;;  %v2572_v19 = vld [vmem:[#allocation8 + $0x228] sm:$0xff] }
 0x251   :  { %3071 = vmatpush.msra.mxu2 %v2538_v27  ;;  %3091 = vmatpush.msra.mxu3 %v2554_v28  ;;  %v2474_v48 = vmax.f32 %v1349_v25, 0.0  ;;  %v2622_v27 = vld [vmem:[#allocation8 + $0x3b8] sm:$0xff]  ;;  %v2573_v28 = vld [vmem:[#allocation8 + $0x230] sm:$0xff]  ;;  %v1448_v25 = vpop.f32.mrf.mxu0 }
 0x252   :  { %3032 = vmatpush.msra.mxu0 %v2505_v31  ;;  %3052 = vmatpush.msra.mxu1 %v2521_v32  ;;  %v1428_v31 = vpop.f32.mrf.mxu3  ;;  %v2605_v32 = vld [vmem:[#allocation8 + $0x330] sm:$0xff] }
 0x253   :  { %3072 = vmatpush.msra.mxu2 %v2537_v33  ;;  %3092 = vmatpush.msra.mxu3 %v2553_v34  ;;  %v2588_v33 = vld [vmem:[#allocation8 + $0x2a8] sm:$0xff]  ;;  %v1131_v34 = vperm.slane %v3979_v4, 4 }
 0x254   :  { %3033 = vmatpush.msra.mxu0 %v2504_v35  ;;  %3053 = vmatpush.msra.mxu1 %v2520_v36  ;;  %v1132_v35 = vperm.slane %v3979_v4, 5  ;;  %v2604_v36 = vld [vmem:[#allocation8 + $0x328] sm:$0xff] }
 0x255   :  { %3073 = vmatpush.msra.mxu2 %v2536_v39  ;;  %3093 = vmatpush.msra.mxu3 %v2552_v24  ;;  %v1134_v39 = vperm.slane %v3979_v4, 7  ;;  %v2571_v24 = vld [vmem:[#allocation8 + $0x220] sm:$0xff]  ;;  %v2618_v4 = vld [vmem:[#allocation8 + $0x398] sm:$0xff] }
 0x256   :  { %3034 = vmatpush.msra.mxu0 %v2503_v41  ;;  %3054 = vmatpush.msra.mxu1 %v2519_v42  ;;  %v1488_v41 = vpop.f32.mrf.mxu2  ;;  %v2603_v42 = vld [vmem:[#allocation8 + $0x320] sm:$0xff] }
 0x257   :  { %3074 = vmatpush.msra.mxu2 %v2535_v43  ;;  %3094 = vmatpush.msra.mxu3 %v2551_v44  ;;  %v2619_v43 = vld [vmem:[#allocation8 + $0x3a0] sm:$0xff]  ;;  %v2570_v44 = vld [vmem:[#allocation8 + $0x218] sm:$0xff] }
 0x258   :  { %3035 = vmatmul.f32.vlgmr.msra.gmra.mxu0 %v2471_v45  ;;  %3055 = vmatmul.f32.vlgmr.msra.gmra.mxu1 %v2472_v46  ;;  %v2586_v45 = vld [vmem:[#allocation8 + $0x298] sm:$0xff]  ;;  %v1369_v46 = vadd.f32 %v1368_v1, %v1131_v34  ;;  %v2677_v1 = vld [vmem:[#allocation8 + $0x570] sm:$0xff] }
 0x259   :  { %3075 = vmatmul.f32.vlgmr.msra.gmra.mxu2 %v2473_v47  ;;  %3095 = vmatmul.f32.vlgmr.msra.gmra.mxu3 %v2474_v48  ;;  %v1409_v47 = vadd.f32 %v1408_v21, %v1132_v35  ;;  %v2602_v48 = vld [vmem:[#allocation8 + $0x318] sm:$0xff]  ;;  %v2693_v21 = vld [vmem:[#allocation8 + $0x5f0] sm:$0xff] }
 0x25a   :  { %3099 = vmatpush.msrb.mxu0 %v2582_v49  ;;  %3119 = vmatpush.msrb.mxu1 %v2598_v50  ;;  %v1449_v49 = vadd.f32 %v1448_v25, %v1133_v38  ;;  %v1489_v50 = vadd.f32 %v1488_v41, %v1134_v39  ;;  %v2673_v34 = vld [vmem:[#allocation8 + $0x550] sm:$0xff]  ;;  %v2672_v38 = vld [vmem:[#allocation8 + $0x548] sm:$0xff]  ;;  %v1528_v25 = vpop.f32.mrf.mxu0 }
 0x25b   :  { %3139 = vmatpush.msrb.mxu2 %v2614_v51  ;;  %3159 = vmatpush.msrb.mxu3 %v2630_v52  ;;  %v2569_v51 = vld [vmem:[#allocation8 + $0x210] sm:$0xff]  ;;  %v2688_v39 = vld [vmem:[#allocation8 + $0x5c8] sm:$0xff] }
 0x25c   :  { %3100 = vmatpush.msrb.mxu0 %v2581_v53  ;;  %3120 = vmatpush.msrb.mxu1 %v2597_v54  ;;  %v2585_v52 = vld [vmem:[#allocation8 + $0x290] sm:$0xff]  ;;  %v1468_v53 = vpop.f32.mrf.mxu1  ;;  %v1508_v54 = vpop.f32.mrf.mxu3 }
 0x25d   :  { %3140 = vmatpush.msrb.mxu2 %v2613_v55  ;;  %3160 = vmatpush.msrb.mxu3 %v2629_v56  ;;  %v2601_v55 = vld [vmem:[#allocation8 + $0x310] sm:$0xff] }
 0x25e   :  { %3101 = vmatpush.msrb.mxu0 %v2580_v57  ;;  %3121 = vmatpush.msrb.mxu1 %v2596_v58  ;;  %v2617_v56 = vld [vmem:[#allocation8 + $0x390] sm:$0xff]  ;;  %v2568_v57 = vld [vmem:[#allocation8 + $0x208] sm:$0xff]  ;;  %v1568_v41 = vpop.f32.mrf.mxu2 }
 0x25f   :  { %3141 = vmatpush.msrb.mxu2 %v2612_v59  ;;  %3161 = vmatpush.msrb.mxu3 %v2628_v60  ;;  %v2584_v58 = vld [vmem:[#allocation8 + $0x288] sm:$0xff]  ;;  %v1389_v59 = vadd.f32 %v1388_v30, %v1369_v46  ;;  %v1429_v60 = vadd.f32 %v1428_v31, %v1409_v47  ;;  %v2642_v30 = vld [vmem:[#allocation8 + $0x458] sm:$0xff]  ;;  %v2689_v35 = vld [vmem:[#allocation8 + $0x5d0] sm:$0xff] }
 0x260   :  { %3102 = vmatpush.msrb.mxu0 %v2579_v61  ;;  %3122 = vmatpush.msrb.mxu1 %v2595_v62  ;;  %v2600_v61 = vld [vmem:[#allocation8 + $0x308] sm:$0xff]  ;;  %v2658_v31 = vld [vmem:[#allocation8 + $0x4d8] sm:$0xff] }
 0x261   :  { %3142 = vmatpush.msrb.mxu2 %v2611_v63  ;;  %3162 = vmatpush.msrb.mxu3 %v2627_v2  ;;  %v2616_v62 = vld [vmem:[#allocation8 + $0x388] sm:$0xff]  ;;  %v1469_v63 = vadd.f32 %v1468_v53, %v1449_v49  ;;  %v1509_v2 = vadd.f32 %v1508_v54, %v1489_v50  ;;  %v2670_v46 = vld [vmem:[#allocation8 + $0x538] sm:$0xff]  ;;  %v2653_v49 = vld [vmem:[#allocation8 + $0x4b0] sm:$0xff] }
 0x262   :  { %3103 = vmatpush.msrb.mxu0 %v2578_v3  ;;  %3123 = vmatpush.msrb.mxu1 %v2594_v5  ;;  %v2567_v3 = vld [vmem:[#allocation8 + $0x200] sm:$0xff]  ;;  %v2686_v47 = vld [vmem:[#allocation8 + $0x5b8] sm:$0xff]  ;;  %v2685_v53 = vld [vmem:[#allocation8 + $0x5b0] sm:$0xff] }
 0x263   :  { %3143 = vmatpush.msrb.mxu2 %v2610_v6  ;;  %3163 = vmatpush.msrb.mxu3 %v2626_v7  ;;  %v2583_v5 = vld [vmem:[#allocation8 + $0x280] sm:$0xff]  ;;  %v2636_v54 = vld [vmem:[#allocation8 + $0x428] sm:$0xff] }
 0x264   :  { %3104 = vmatpush.msrb.mxu0 %v2577_v8  ;;  %3124 = vmatpush.msrb.mxu1 %v2593_v9  ;;  %v2599_v6 = vld [vmem:[#allocation8 + $0x300] sm:$0xff]  ;;  %v2475_v8 = vmax.f32 %v1389_v59, 0.0  ;;  %v2476_v9 = vmax.f32 %v1429_v60, 0.0  ;;  %v1548_v50 = vpop.f32.mrf.mxu1  ;;  %v2684_v59 = vld [vmem:[#allocation8 + $0x5a8] sm:$0xff] }
 0x265   :  { %3144 = vmatpush.msrb.mxu2 %v2609_v12  ;;  %3164 = vmatpush.msrb.mxu3 %v2625_v13  ;;  %v2615_v7 = vld [vmem:[#allocation8 + $0x380] sm:$0xff]  ;;  %v2477_v12 = vmax.f32 %v1469_v63, 0.0  ;;  %v2478_v13 = vmax.f32 %v1509_v2, 0.0  ;;  %v1608_v2 = vpop.f32.mrf.mxu0 }
 0x266   :  { %3105 = vmatpush.msrb.mxu0 %v2576_v14  ;;  %3125 = vmatpush.msrb.mxu1 %v2592_v15  ;;  %v2646_v14 = vld [vmem:[#allocation8 + $0x478] sm:$0xff]  ;;  %v2651_v63 = vld [vmem:[#allocation8 + $0x4a0] sm:$0xff] }
 0x267   :  { %3145 = vmatpush.msrb.mxu2 %v2608_v16  ;;  %3165 = vmatpush.msrb.mxu3 %v2624_v17  ;;  %v2662_v15 = vld [vmem:[#allocation8 + $0x4f8] sm:$0xff] }
 0x268   :  { %3106 = vmatpush.msrb.mxu0 %v2575_v20  ;;  %3126 = vmatpush.msrb.mxu1 %v2591_v0  ;;  %v2678_v16 = vld [vmem:[#allocation8 + $0x578] sm:$0xff]  ;;  %v2645_v20 = vld [vmem:[#allocation8 + $0x470] sm:$0xff] }
 0x269   :  { %3146 = vmatpush.msrb.mxu2 %v2607_v22  ;;  %3166 = vmatpush.msrb.mxu3 %v2623_v23  ;;  %v2694_v17 = vld [vmem:[#allocation8 + $0x5f8] sm:$0xff]  ;;  %v2661_v0 = vld [vmem:[#allocation8 + $0x4f0] sm:$0xff]  ;;  %v2644_v22 = vld [vmem:[#allocation8 + $0x468] sm:$0xff] }
 0x26a   :  { %3107 = vmatpush.msrb.mxu0 %v2574_v26  ;;  %3127 = vmatpush.msrb.mxu1 %v2590_v10  ;;  %v2660_v23 = vld [vmem:[#allocation8 + $0x4e8] sm:$0xff] }
 0x26b   :  { %3147 = vmatpush.msrb.mxu2 %v2606_v11  ;;  %3167 = vmatpush.msrb.mxu3 %v2622_v27  ;;  %v2676_v26 = vld [vmem:[#allocation8 + $0x568] sm:$0xff]  ;;  %v2643_v11 = vld [vmem:[#allocation8 + $0x460] sm:$0xff] }
 0x26c   :  { %3108 = vmatpush.msrb.mxu0 %v2573_v28  ;;  %3128 = vmatpush.msrb.mxu1 %v2589_v29  ;;  %v2692_v10 = vld [vmem:[#allocation8 + $0x5e8] sm:$0xff]  ;;  %v2659_v27 = vld [vmem:[#allocation8 + $0x4e0] sm:$0xff] }
 0x26d   :  { %3148 = vmatpush.msrb.mxu2 %v2605_v32  ;;  %3168 = vmatpush.msrb.mxu3 %v2621_v18  ;;  %v2675_v28 = vld [vmem:[#allocation8 + $0x560] sm:$0xff]  ;;  %v2674_v32 = vld [vmem:[#allocation8 + $0x558] sm:$0xff] }
 0x26e   :  { %3109 = vmatpush.msrb.mxu0 %v2572_v19  ;;  %3129 = vmatpush.msrb.mxu1 %v2588_v33  ;;  %v2691_v29 = vld [vmem:[#allocation8 + $0x5e0] sm:$0xff]  ;;  %v2690_v18 = vld [vmem:[#allocation8 + $0x5d8] sm:$0xff]  ;;  %v2641_v19 = vld [vmem:[#allocation8 + $0x450] sm:$0xff] }
 0x26f   :  { %3149 = vmatpush.msrb.mxu2 %v2604_v36  ;;  %3169 = vmatpush.msrb.mxu3 %v2620_v37  ;;  %v2657_v33 = vld [vmem:[#allocation8 + $0x4d0] sm:$0xff]  ;;  %v2640_v36 = vld [vmem:[#allocation8 + $0x448] sm:$0xff] }
 0x270   :  { %3110 = vmatpush.msrb.mxu0 %v2571_v24  ;;  %3130 = vmatpush.msrb.mxu1 %v2587_v40  ;;  %v2656_v37 = vld [vmem:[#allocation8 + $0x4c8] sm:$0xff]  ;;  %v2639_v24 = vld [vmem:[#allocation8 + $0x440] sm:$0xff] }
 0x271   :  { %3150 = vmatpush.msrb.mxu2 %v2603_v42  ;;  %3170 = vmatpush.msrb.mxu3 %v2619_v43  ;;  %v2655_v40 = vld [vmem:[#allocation8 + $0x4c0] sm:$0xff] }
 0x272   :  { %3111 = vmatpush.msrb.mxu0 %v2570_v44  ;;  %3131 = vmatpush.msrb.mxu1 %v2586_v45  ;;  %v2671_v42 = vld [vmem:[#allocation8 + $0x540] sm:$0xff]  ;;  %v2638_v44 = vld [vmem:[#allocation8 + $0x438] sm:$0xff] }
 0x273   :  { %3151 = vmatpush.msrb.mxu2 %v2602_v48  ;;  %3171 = vmatpush.msrb.mxu3 %v2618_v4  ;;  %v2687_v43 = vld [vmem:[#allocation8 + $0x5c0] sm:$0xff]  ;;  %v2654_v45 = vld [vmem:[#allocation8 + $0x4b8] sm:$0xff]  ;;  %v3993_v48 = vld [vmem:[#allocation7 + $0x8] sm:$0xff] }
 0x274   :  { %3112 = vmatpush.msrb.mxu0 %v2569_v51  ;;  %3132 = vmatpush.msrb.mxu1 %v2585_v52  ;;  %v2637_v4 = vld [vmem:[#allocation8 + $0x430] sm:$0xff]  ;;  %v1588_v51 = vpop.f32.mrf.mxu3  ;;  %v1137_v60 = vperm.slane %v3993_v48, 2 }
 0x275   :  { %3152 = vmatpush.msrb.mxu2 %v2601_v55  ;;  %3172 = vmatpush.msrb.mxu3 %v2617_v56  ;;  %v2669_v52 = vld [vmem:[#allocation8 + $0x530] sm:$0xff]  ;;  %v2652_v55 = vld [vmem:[#allocation8 + $0x4a8] sm:$0xff]  ;;  %v1135_v56 = vperm.slane %v3993_v48, 0 }
 0x276   :  { %3113 = vmatpush.msrb.mxu0 %v2568_v57  ;;  %3133 = vmatpush.msrb.mxu1 %v2584_v58  ;;  %v1136_v57 = vperm.slane %v3993_v48, 1  ;;  %v2668_v58 = vld [vmem:[#allocation8 + $0x528] sm:$0xff] }
 0x277   :  { %3153 = vmatpush.msrb.mxu2 %v2600_v61  ;;  %3173 = vmatpush.msrb.mxu3 %v2616_v62  ;;  %v1138_v61 = vperm.slane %v3993_v48, 3  ;;  %v2635_v62 = vld [vmem:[#allocation8 + $0x420] sm:$0xff] }
 0x278   :  { %3114 = vmatpush.msrb.mxu0 %v2567_v3  ;;  %3134 = vmatpush.msrb.mxu1 %v2583_v5  ;;  %v1648_v3 = vpop.f32.mrf.mxu2  ;;  %v2667_v5 = vld [vmem:[#allocation8 + $0x520] sm:$0xff] }
 0x279   :  { %3154 = vmatpush.msrb.mxu2 %v2599_v6  ;;  %3174 = vmatpush.msrb.mxu3 %v2615_v7  ;;  %v2683_v6 = vld [vmem:[#allocation8 + $0x5a0] sm:$0xff]  ;;  %v2634_v7 = vld [vmem:[#allocation8 + $0x418] sm:$0xff] }
 0x27a   :  { %3115 = vmatmul.f32.vlgmr.msrb.gmra.mxu0 %v2475_v8  ;;  %3135 = vmatmul.f32.vlgmr.msrb.gmra.mxu1 %v2476_v9  ;;  %v2650_v8 = vld [vmem:[#allocation8 + $0x498] sm:$0xff]  ;;  %v1529_v9 = vadd.f32 %v1528_v25, %v1135_v56  ;;  %v2725_v25 = vld [vmem:[#allocation8 + $0x6f0] sm:$0xff] }
 0x27b   :  { %3155 = vmatmul.f32.vlgmr.msrb.gmra.mxu2 %v2477_v12  ;;  %3175 = vmatmul.f32.vlgmr.msrb.gmra.mxu3 %v2478_v13  ;;  %v1569_v12 = vadd.f32 %v1568_v41, %v1136_v57  ;;  %v2666_v13 = vld [vmem:[#allocation8 + $0x518] sm:$0xff]  ;;  %v2741_v41 = vld [vmem:[#allocation8 + $0x770] sm:$0xff] }
 0x27c   :  { %3179 = vmatpush.msra.mxu0 %v2646_v14  ;;  %3199 = vmatpush.msra.mxu1 %v2662_v15  ;;  %v2682_v14 = vld [vmem:[#allocation8 + $0x598] sm:$0xff]  ;;  %v1609_v15 = vadd.f32 %v1608_v2, %v1137_v60  ;;  %v2721_v56 = vld [vmem:[#allocation8 + $0x6d0] sm:$0xff]  ;;  %v2720_v60 = vld [vmem:[#allocation8 + $0x6c8] sm:$0xff] }
 0x27d   :  { %3219 = vmatpush.msra.mxu2 %v2678_v16  ;;  %3239 = vmatpush.msra.mxu3 %v2694_v17  ;;  %v1649_v16 = vadd.f32 %v1648_v3, %v1138_v61  ;;  %v2633_v17 = vld [vmem:[#allocation8 + $0x410] sm:$0xff]  ;;  %v2736_v61 = vld [vmem:[#allocation8 + $0x748] sm:$0xff]  ;;  %v2719_v2 = vld [vmem:[#allocation8 + $0x6c0] sm:$0xff]  ;;  %v1688_v3 = vpop.f32.mrf.mxu0 }
 0x27e   :  { %3180 = vmatpush.msra.mxu0 %v2645_v20  ;;  %3200 = vmatpush.msra.mxu1 %v2661_v0  ;;  %v2649_v20 = vld [vmem:[#allocation8 + $0x490] sm:$0xff]  ;;  %v1628_v0 = vpop.f32.mrf.mxu1 }
 0x27f   :  { %3220 = vmatpush.msra.mxu2 %v2677_v1  ;;  %3240 = vmatpush.msra.mxu3 %v2693_v21  ;;  %v1668_v1 = vpop.f32.mrf.mxu3  ;;  %v2665_v21 = vld [vmem:[#allocation8 + $0x510] sm:$0xff] }
 0x280   :  { %3181 = vmatpush.msra.mxu0 %v2644_v22  ;;  %3201 = vmatpush.msra.mxu1 %v2660_v23  ;;  %v2681_v22 = vld [vmem:[#allocation8 + $0x590] sm:$0xff]  ;;  %v2632_v23 = vld [vmem:[#allocation8 + $0x408] sm:$0xff] }
 0x281   :  { %3221 = vmatpush.msra.mxu2 %v2676_v26  ;;  %3241 = vmatpush.msra.mxu3 %v2692_v10  ;;  %v2648_v26 = vld [vmem:[#allocation8 + $0x488] sm:$0xff]  ;;  %v1549_v10 = vadd.f32 %v1548_v50, %v1529_v9  ;;  %v2755_v50 = vld [vmem:[#allocation8 + $0x7e0] sm:$0xff]  ;;  %v2737_v57 = vld [vmem:[#allocation8 + $0x750] sm:$0xff] }
 0x282   :  { %3182 = vmatpush.msra.mxu0 %v2643_v11  ;;  %3202 = vmatpush.msra.mxu1 %v2659_v27  ;;  %v1589_v11 = vadd.f32 %v1588_v51, %v1569_v12  ;;  %v2664_v27 = vld [vmem:[#allocation8 + $0x508] sm:$0xff]  ;;  %v2706_v51 = vld [vmem:[#allocation8 + $0x658] sm:$0xff] }
 0x283   :  { %3222 = vmatpush.msra.mxu2 %v2675_v28  ;;  %3242 = vmatpush.msra.mxu3 %v2691_v29  ;;  %v2680_v28 = vld [vmem:[#allocation8 + $0x588] sm:$0xff]  ;;  %v1629_v29 = vadd.f32 %v1628_v0, %v1609_v15  ;;  %v2718_v9 = vld [vmem:[#allocation8 + $0x6b8] sm:$0xff]  ;;  %v2717_v15 = vld [vmem:[#allocation8 + $0x6b0] sm:$0xff] }
 0x284   :  { %3183 = vmatpush.msra.mxu0 %v2642_v30  ;;  %3203 = vmatpush.msra.mxu1 %v2658_v31  ;;  %v1669_v30 = vadd.f32 %v1668_v1, %v1649_v16  ;;  %v2631_v31 = vld [vmem:[#allocation8 + $0x400] sm:$0xff]  ;;  %v2734_v12 = vld [vmem:[#allocation8 + $0x738] sm:$0xff]  ;;  %v2749_v0 = vld [vmem:[#allocation8 + $0x7b0] sm:$0xff] }
 0x285   :  { %3223 = vmatpush.msra.mxu2 %v2674_v32  ;;  %3243 = vmatpush.msra.mxu3 %v2690_v18  ;;  %v2647_v32 = vld [vmem:[#allocation8 + $0x480] sm:$0xff]  ;;  %v2700_v1 = vld [vmem:[#allocation8 + $0x628] sm:$0xff] }
 0x286   :  { %3184 = vmatpush.msra.mxu0 %v2641_v19  ;;  %3204 = vmatpush.msra.mxu1 %v2657_v33  ;;  %v2663_v18 = vld [vmem:[#allocation8 + $0x500] sm:$0xff]  ;;  %v2479_v33 = vmax.f32 %v1549_v10, 0.0  ;;  %v1708_v16 = vpop.f32.mrf.mxu1  ;;  %v2748_v10 = vld [vmem:[#allocation8 + $0x7a8] sm:$0xff] }
 0x287   :  { %3224 = vmatpush.msra.mxu2 %v2673_v34  ;;  %3244 = vmatpush.msra.mxu3 %v2689_v35  ;;  %v2679_v19 = vld [vmem:[#allocation8 + $0x580] sm:$0xff]  ;;  %v2480_v34 = vmax.f32 %v1589_v11, 0.0  ;;  %v2481_v35 = vmax.f32 %v1629_v29, 0.0  ;;  %v1141_v11 = vperm.slane %v3993_v48, 6 }
 0x288   :  { %3185 = vmatpush.msra.mxu0 %v2640_v36  ;;  %3205 = vmatpush.msra.mxu1 %v2656_v37  ;;  %v2482_v36 = vmax.f32 %v1669_v30, 0.0  ;;  %v2710_v37 = vld [vmem:[#allocation8 + $0x678] sm:$0xff]  ;;  %v2715_v29 = vld [vmem:[#allocation8 + $0x6a0] sm:$0xff]  ;;  %v1768_v30 = vpop.f32.mrf.mxu0 }
 0x289   :  { %3225 = vmatpush.msra.mxu2 %v2672_v38  ;;  %3245 = vmatpush.msra.mxu3 %v2688_v39  ;;  %v2726_v38 = vld [vmem:[#allocation8 + $0x6f8] sm:$0xff] }
 0x28a   :  { %3186 = vmatpush.msra.mxu0 %v2639_v24  ;;  %3206 = vmatpush.msra.mxu1 %v2655_v40  ;;  %v2742_v39 = vld [vmem:[#allocation8 + $0x778] sm:$0xff]  ;;  %v2709_v40 = vld [vmem:[#allocation8 + $0x670] sm:$0xff] }
 0x28b   :  { %3226 = vmatpush.msra.mxu2 %v2671_v42  ;;  %3246 = vmatpush.msra.mxu3 %v2687_v43  ;;  %v2758_v24 = vld [vmem:[#allocation8 + $0x7f8] sm:$0xff]  ;;  %v2757_v42 = vld [vmem:[#allocation8 + $0x7f0] sm:$0xff]  ;;  %v2708_v43 = vld [vmem:[#allocation8 + $0x668] sm:$0xff] }
 0x28c   :  { %3187 = vmatpush.msra.mxu0 %v2638_v44  ;;  %3207 = vmatpush.msra.mxu1 %v2654_v45  ;;  %v2724_v44 = vld [vmem:[#allocation8 + $0x6e8] sm:$0xff] }
 0x28d   :  { %3227 = vmatpush.msra.mxu2 %v2670_v46  ;;  %3247 = vmatpush.msra.mxu3 %v2686_v47  ;;  %v2740_v45 = vld [vmem:[#allocation8 + $0x768] sm:$0xff]  ;;  %v2707_v47 = vld [vmem:[#allocation8 + $0x660] sm:$0xff] }
 0x28e   :  { %3188 = vmatpush.msra.mxu0 %v2637_v4  ;;  %3208 = vmatpush.msra.mxu1 %v2653_v49  ;;  %v2756_v46 = vld [vmem:[#allocation8 + $0x7e8] sm:$0xff]  ;;  %v2723_v4 = vld [vmem:[#allocation8 + $0x6e0] sm:$0xff] }
 0x28f   :  { %3228 = vmatpush.msra.mxu2 %v2669_v52  ;;  %3248 = vmatpush.msra.mxu3 %v2685_v53  ;;  %v2739_v49 = vld [vmem:[#allocation8 + $0x760] sm:$0xff]  ;;  %v2722_v52 = vld [vmem:[#allocation8 + $0x6d8] sm:$0xff] }
 0x290   :  { %3189 = vmatpush.msra.mxu0 %v2636_v54  ;;  %3209 = vmatpush.msra.mxu1 %v2652_v55  ;;  %v2738_v53 = vld [vmem:[#allocation8 + $0x758] sm:$0xff]  ;;  %v2705_v55 = vld [vmem:[#allocation8 + $0x650] sm:$0xff] }
 0x291   :  { %3229 = vmatpush.msra.mxu2 %v2668_v58  ;;  %3249 = vmatpush.msra.mxu3 %v2684_v59  ;;  %v2754_v54 = vld [vmem:[#allocation8 + $0x7d8] sm:$0xff]  ;;  %v2753_v58 = vld [vmem:[#allocation8 + $0x7d0] sm:$0xff]  ;;  %v2704_v59 = vld [vmem:[#allocation8 + $0x648] sm:$0xff] }
 0x292   :  { %3190 = vmatpush.msra.mxu0 %v2635_v62  ;;  %3210 = vmatpush.msra.mxu1 %v2651_v63  ;;  %v2752_v62 = vld [vmem:[#allocation8 + $0x7c8] sm:$0xff]  ;;  %v2703_v63 = vld [vmem:[#allocation8 + $0x640] sm:$0xff] }
 0x293   :  { %3230 = vmatpush.msra.mxu2 %v2667_v5  ;;  %3250 = vmatpush.msra.mxu3 %v2683_v6  ;;  %v1728_v5 = vpop.f32.mrf.mxu2  ;;  %v2735_v6 = vld [vmem:[#allocation8 + $0x740] sm:$0xff] }
 0x294   :  { %3191 = vmatpush.msra.mxu0 %v2634_v7  ;;  %3211 = vmatpush.msra.mxu1 %v2650_v8  ;;  %v2751_v7 = vld [vmem:[#allocation8 + $0x7c0] sm:$0xff]  ;;  %v2702_v8 = vld [vmem:[#allocation8 + $0x638] sm:$0xff] }
 0x295   :  { %3231 = vmatpush.msra.mxu2 %v2666_v13  ;;  %3251 = vmatpush.msra.mxu3 %v2682_v14  ;;  %v2750_v13 = vld [vmem:[#allocation8 + $0x7b8] sm:$0xff]  ;;  %v2701_v14 = vld [vmem:[#allocation8 + $0x630] sm:$0xff] }
 0x296   :  { %3192 = vmatpush.msra.mxu0 %v2633_v17  ;;  %3212 = vmatpush.msra.mxu1 %v2649_v20  ;;  %v1748_v17 = vpop.f32.mrf.mxu3  ;;  %v2733_v20 = vld [vmem:[#allocation8 + $0x730] sm:$0xff] }
 0x297   :  { %3232 = vmatpush.msra.mxu2 %v2665_v21  ;;  %3252 = vmatpush.msra.mxu3 %v2681_v22  ;;  %v2716_v21 = vld [vmem:[#allocation8 + $0x6a8] sm:$0xff]  ;;  %v1139_v22 = vperm.slane %v3993_v48, 4 }
 0x298   :  { %3193 = vmatpush.msra.mxu0 %v2632_v23  ;;  %3213 = vmatpush.msra.mxu1 %v2648_v26  ;;  %v1140_v23 = vperm.slane %v3993_v48, 5  ;;  %v2732_v26 = vld [vmem:[#allocation8 + $0x728] sm:$0xff] }
 0x299   :  { %3233 = vmatpush.msra.mxu2 %v2664_v27  ;;  %3253 = vmatpush.msra.mxu3 %v2680_v28  ;;  %v1142_v27 = vperm.slane %v3993_v48, 7  ;;  %v2699_v28 = vld [vmem:[#allocation8 + $0x620] sm:$0xff]  ;;  %v2746_v48 = vld [vmem:[#allocation8 + $0x798] sm:$0xff] }
 0x29a   :  { %3194 = vmatpush.msra.mxu0 %v2631_v31  ;;  %3214 = vmatpush.msra.mxu1 %v2647_v32  ;;  %v2731_v32 = vld [vmem:[#allocation8 + $0x720] sm:$0xff] }
 0x29b   :  { %3234 = vmatpush.msra.mxu2 %v2663_v18  ;;  %3254 = vmatpush.msra.mxu3 %v2679_v19  ;;  %v1808_v31 = vpop.f32.mrf.mxu2  ;;  %v2747_v18 = vld [vmem:[#allocation8 + $0x7a0] sm:$0xff]  ;;  %v2698_v19 = vld [vmem:[#allocation8 + $0x618] sm:$0xff] }
 0x29c   :  { %3195 = vmatmul.f32.vlgmr.msra.gmra.mxu0 %v2479_v33  ;;  %3215 = vmatmul.f32.vlgmr.msra.gmra.mxu1 %v2480_v34  ;;  %v2714_v33 = vld [vmem:[#allocation8 + $0x698] sm:$0xff]  ;;  %v1689_v34 = vadd.f32 %v1688_v3, %v1139_v22  ;;  %v2805_v3 = vld [vmem:[#allocation8 + $0x970] sm:$0xff] }
 0x29d   :  { %3235 = vmatmul.f32.vlgmr.msra.gmra.mxu2 %v2481_v35  ;;  %3255 = vmatmul.f32.vlgmr.msra.gmra.mxu3 %v2482_v36  ;;  %v1729_v35 = vadd.f32 %v1728_v5, %v1140_v23  ;;  %v2730_v36 = vld [vmem:[#allocation8 + $0x718] sm:$0xff]  ;;  %v2821_v5 = vld [vmem:[#allocation8 + $0x9f0] sm:$0xff] }
 0x29e   :  { %3259 = vmatpush.msrb.mxu0 %v2710_v37  ;;  %3279 = vmatpush.msrb.mxu1 %v2726_v38  ;;  %v1769_v37 = vadd.f32 %v1768_v30, %v1141_v11  ;;  %v1809_v38 = vadd.f32 %v1808_v31, %v1142_v27  ;;  %v2801_v22 = vld [vmem:[#allocation8 + $0x950] sm:$0xff]  ;;  %v2800_v11 = vld [vmem:[#allocation8 + $0x948] sm:$0xff]  ;;  %v1848_v30 = vpop.f32.mrf.mxu0 }
 0x29f   :  { %3299 = vmatpush.msrb.mxu2 %v2742_v39  ;;  %3319 = vmatpush.msrb.mxu3 %v2758_v24  ;;  %v2697_v39 = vld [vmem:[#allocation8 + $0x610] sm:$0xff]  ;;  %v2816_v27 = vld [vmem:[#allocation8 + $0x9c8] sm:$0xff] }
 0x2a0   :  { %3260 = vmatpush.msrb.mxu0 %v2709_v40  ;;  %3280 = vmatpush.msrb.mxu1 %v2725_v25  ;;  %v2713_v24 = vld [vmem:[#allocation8 + $0x690] sm:$0xff]  ;;  %v1788_v40 = vpop.f32.mrf.mxu1  ;;  %v1828_v25 = vpop.f32.mrf.mxu3 }
 0x2a1   :  { %3300 = vmatpush.msrb.mxu2 %v2741_v41  ;;  %3320 = vmatpush.msrb.mxu3 %v2757_v42  ;;  %v2729_v41 = vld [vmem:[#allocation8 + $0x710] sm:$0xff] }
 0x2a2   :  { %3261 = vmatpush.msrb.mxu0 %v2708_v43  ;;  %3281 = vmatpush.msrb.mxu1 %v2724_v44  ;;  %v2745_v42 = vld [vmem:[#allocation8 + $0x790] sm:$0xff]  ;;  %v2696_v43 = vld [vmem:[#allocation8 + $0x608] sm:$0xff] }
 0x2a3   :  { %3301 = vmatpush.msrb.mxu2 %v2740_v45  ;;  %3321 = vmatpush.msrb.mxu3 %v2756_v46  ;;  %v2712_v44 = vld [vmem:[#allocation8 + $0x688] sm:$0xff]  ;;  %v1709_v45 = vadd.f32 %v1708_v16, %v1689_v34  ;;  %v1749_v46 = vadd.f32 %v1748_v17, %v1729_v35  ;;  %v2770_v16 = vld [vmem:[#allocation8 + $0x858] sm:$0xff]  ;;  %v2817_v23 = vld [vmem:[#allocation8 + $0x9d0] sm:$0xff]  ;;  %v1888_v31 = vpop.f32.mrf.mxu2 }
 0x2a4   :  { %3262 = vmatpush.msrb.mxu0 %v2707_v47  ;;  %3282 = vmatpush.msrb.mxu1 %v2723_v4  ;;  %v2728_v47 = vld [vmem:[#allocation8 + $0x708] sm:$0xff]  ;;  %v2786_v17 = vld [vmem:[#allocation8 + $0x8d8] sm:$0xff] }
 0x2a5   :  { %3302 = vmatpush.msrb.mxu2 %v2739_v49  ;;  %3322 = vmatpush.msrb.mxu3 %v2755_v50  ;;  %v2744_v4 = vld [vmem:[#allocation8 + $0x788] sm:$0xff]  ;;  %v1789_v49 = vadd.f32 %v1788_v40, %v1769_v37  ;;  %v1829_v50 = vadd.f32 %v1828_v25, %v1809_v38  ;;  %v2798_v34 = vld [vmem:[#allocation8 + $0x938] sm:$0xff]  ;;  %v2781_v37 = vld [vmem:[#allocation8 + $0x8b0] sm:$0xff] }
 0x2a6   :  { %3263 = vmatpush.msrb.mxu0 %v2706_v51  ;;  %3283 = vmatpush.msrb.mxu1 %v2722_v52  ;;  %v2695_v51 = vld [vmem:[#allocation8 + $0x600] sm:$0xff]  ;;  %v2814_v35 = vld [vmem:[#allocation8 + $0x9b8] sm:$0xff]  ;;  %v2813_v40 = vld [vmem:[#allocation8 + $0x9b0] sm:$0xff] }
 0x2a7   :  { %3303 = vmatpush.msrb.mxu2 %v2738_v53  ;;  %3323 = vmatpush.msrb.mxu3 %v2754_v54  ;;  %v2711_v52 = vld [vmem:[#allocation8 + $0x680] sm:$0xff]  ;;  %v2764_v25 = vld [vmem:[#allocation8 + $0x828] sm:$0xff] }
 0x2a8   :  { %3264 = vmatpush.msrb.mxu0 %v2705_v55  ;;  %3284 = vmatpush.msrb.mxu1 %v2721_v56  ;;  %v2727_v53 = vld [vmem:[#allocation8 + $0x700] sm:$0xff]  ;;  %v2483_v55 = vmax.f32 %v1709_v45, 0.0  ;;  %v2484_v56 = vmax.f32 %v1749_v46, 0.0  ;;  %v1868_v38 = vpop.f32.mrf.mxu1  ;;  %v2812_v45 = vld [vmem:[#allocation8 + $0x9a8] sm:$0xff] }
 0x2a9   :  { %3304 = vmatpush.msrb.mxu2 %v2737_v57  ;;  %3324 = vmatpush.msrb.mxu3 %v2753_v58  ;;  %v2743_v54 = vld [vmem:[#allocation8 + $0x780] sm:$0xff]  ;;  %v2485_v57 = vmax.f32 %v1789_v49, 0.0  ;;  %v2486_v58 = vmax.f32 %v1829_v50, 0.0  ;;  %v1928_v50 = vpop.f32.mrf.mxu0 }
 0x2aa   :  { %3265 = vmatpush.msrb.mxu0 %v2704_v59  ;;  %3285 = vmatpush.msrb.mxu1 %v2720_v60  ;;  %v2774_v59 = vld [vmem:[#allocation8 + $0x878] sm:$0xff]  ;;  %v2779_v49 = vld [vmem:[#allocation8 + $0x8a0] sm:$0xff] }
 0x2ab   :  { %3305 = vmatpush.msrb.mxu2 %v2736_v61  ;;  %3325 = vmatpush.msrb.mxu3 %v2752_v62  ;;  %v2790_v60 = vld [vmem:[#allocation8 + $0x8f8] sm:$0xff] }
 0x2ac   :  { %3266 = vmatpush.msrb.mxu0 %v2703_v63  ;;  %3286 = vmatpush.msrb.mxu1 %v2719_v2  ;;  %v2806_v61 = vld [vmem:[#allocation8 + $0x978] sm:$0xff]  ;;  %v2773_v63 = vld [vmem:[#allocation8 + $0x870] sm:$0xff] }
 0x2ad   :  { %3306 = vmatpush.msrb.mxu2 %v2735_v6  ;;  %3326 = vmatpush.msrb.mxu3 %v2751_v7  ;;  %v2822_v62 = vld [vmem:[#allocation8 + $0x9f8] sm:$0xff]  ;;  %v2789_v2 = vld [vmem:[#allocation8 + $0x8f0] sm:$0xff]  ;;  %v2772_v6 = vld [vmem:[#allocation8 + $0x868] sm:$0xff] }
 0x2ae   :  { %3267 = vmatpush.msrb.mxu0 %v2702_v8  ;;  %3287 = vmatpush.msrb.mxu1 %v2718_v9  ;;  %v2788_v7 = vld [vmem:[#allocation8 + $0x8e8] sm:$0xff] }
 0x2af   :  { %3307 = vmatpush.msrb.mxu2 %v2734_v12  ;;  %3327 = vmatpush.msrb.mxu3 %v2750_v13  ;;  %v2804_v8 = vld [vmem:[#allocation8 + $0x968] sm:$0xff]  ;;  %v2771_v12 = vld [vmem:[#allocation8 + $0x860] sm:$0xff] }
 0x2b0   :  { %3268 = vmatpush.msrb.mxu0 %v2701_v14  ;;  %3288 = vmatpush.msrb.mxu1 %v2717_v15  ;;  %v2820_v9 = vld [vmem:[#allocation8 + $0x9e8] sm:$0xff]  ;;  %v2787_v13 = vld [vmem:[#allocation8 + $0x8e0] sm:$0xff] }
 0x2b1   :  { %3308 = vmatpush.msrb.mxu2 %v2733_v20  ;;  %3328 = vmatpush.msrb.mxu3 %v2749_v0  ;;  %v2803_v14 = vld [vmem:[#allocation8 + $0x960] sm:$0xff]  ;;  %v2802_v20 = vld [vmem:[#allocation8 + $0x958] sm:$0xff] }
 0x2b2   :  { %3269 = vmatpush.msrb.mxu0 %v2700_v1  ;;  %3289 = vmatpush.msrb.mxu1 %v2716_v21  ;;  %v2819_v15 = vld [vmem:[#allocation8 + $0x9e0] sm:$0xff]  ;;  %v2818_v0 = vld [vmem:[#allocation8 + $0x9d8] sm:$0xff]  ;;  %v2769_v1 = vld [vmem:[#allocation8 + $0x850] sm:$0xff] }
 0x2b3   :  { %3309 = vmatpush.msrb.mxu2 %v2732_v26  ;;  %3329 = vmatpush.msrb.mxu3 %v2748_v10  ;;  %v2785_v21 = vld [vmem:[#allocation8 + $0x8d0] sm:$0xff]  ;;  %v2768_v26 = vld [vmem:[#allocation8 + $0x848] sm:$0xff] }
 0x2b4   :  { %3270 = vmatpush.msrb.mxu0 %v2699_v28  ;;  %3290 = vmatpush.msrb.mxu1 %v2715_v29  ;;  %v2784_v10 = vld [vmem:[#allocation8 + $0x8c8] sm:$0xff]  ;;  %v2767_v28 = vld [vmem:[#allocation8 + $0x840] sm:$0xff] }
 0x2b5   :  { %3310 = vmatpush.msrb.mxu2 %v2731_v32  ;;  %3330 = vmatpush.msrb.mxu3 %v2747_v18  ;;  %v2783_v29 = vld [vmem:[#allocation8 + $0x8c0] sm:$0xff] }
 0x2b6   :  { %3271 = vmatpush.msrb.mxu0 %v2698_v19  ;;  %3291 = vmatpush.msrb.mxu1 %v2714_v33  ;;  %v2799_v32 = vld [vmem:[#allocation8 + $0x940] sm:$0xff]  ;;  %v2766_v19 = vld [vmem:[#allocation8 + $0x838] sm:$0xff] }
 0x2b7   :  { %3311 = vmatpush.msrb.mxu2 %v2730_v36  ;;  %3331 = vmatpush.msrb.mxu3 %v2746_v48  ;;  %v2815_v18 = vld [vmem:[#allocation8 + $0x9c0] sm:$0xff]  ;;  %v2782_v33 = vld [vmem:[#allocation8 + $0x8b8] sm:$0xff]  ;;  %v4003_v36 = vld [vmem:[#allocation7 + $0x10] sm:$0xff] }
 0x2b8   :  { %3272 = vmatpush.msrb.mxu0 %v2697_v39  ;;  %3292 = vmatpush.msrb.mxu1 %v2713_v24  ;;  %v2765_v48 = vld [vmem:[#allocation8 + $0x830] sm:$0xff]  ;;  %v1908_v39 = vpop.f32.mrf.mxu3  ;;  %v1145_v46 = vperm.slane %v4003_v36, 2 }
 0x2b9   :  { %3312 = vmatpush.msrb.mxu2 %v2729_v41  ;;  %3332 = vmatpush.msrb.mxu3 %v2745_v42  ;;  %v2797_v24 = vld [vmem:[#allocation8 + $0x930] sm:$0xff]  ;;  %v2780_v41 = vld [vmem:[#allocation8 + $0x8a8] sm:$0xff]  ;;  %v1143_v42 = vperm.slane %v4003_v36, 0 }
 0x2ba   :  { %3273 = vmatpush.msrb.mxu0 %v2696_v43  ;;  %3293 = vmatpush.msrb.mxu1 %v2712_v44  ;;  %v1144_v43 = vperm.slane %v4003_v36, 1  ;;  %v2796_v44 = vld [vmem:[#allocation8 + $0x928] sm:$0xff] }
 0x2bb   :  { %3313 = vmatpush.msrb.mxu2 %v2728_v47  ;;  %3333 = vmatpush.msrb.mxu3 %v2744_v4  ;;  %v1146_v47 = vperm.slane %v4003_v36, 3  ;;  %v2763_v4 = vld [vmem:[#allocation8 + $0x820] sm:$0xff] }
 0x2bc   :  { %3274 = vmatpush.msrb.mxu0 %v2695_v51  ;;  %3294 = vmatpush.msrb.mxu1 %v2711_v52  ;;  %v1968_v51 = vpop.f32.mrf.mxu2  ;;  %v2795_v52 = vld [vmem:[#allocation8 + $0x920] sm:$0xff] }
 0x2bd   :  { %3314 = vmatpush.msrb.mxu2 %v2727_v53  ;;  %3334 = vmatpush.msrb.mxu3 %v2743_v54  ;;  %v2811_v53 = vld [vmem:[#allocation8 + $0x9a0] sm:$0xff]  ;;  %v2762_v54 = vld [vmem:[#allocation8 + $0x818] sm:$0xff] }
 0x2be   :  { %3275 = vmatmul.f32.vlgmr.msrb.gmra.mxu0 %v2483_v55  ;;  %3295 = vmatmul.f32.vlgmr.msrb.gmra.mxu1 %v2484_v56  ;;  %v2778_v55 = vld [vmem:[#allocation8 + $0x898] sm:$0xff]  ;;  %v1849_v56 = vadd.f32 %v1848_v30, %v1143_v42  ;;  %v2853_v30 = vld [vmem:[#allocation8 + $0xaf0] sm:$0xff] }
 0x2bf   :  { %3315 = vmatmul.f32.vlgmr.msrb.gmra.mxu2 %v2485_v57  ;;  %3335 = vmatmul.f32.vlgmr.msrb.gmra.mxu3 %v2486_v58  ;;  %v1889_v57 = vadd.f32 %v1888_v31, %v1144_v43  ;;  %v2794_v58 = vld [vmem:[#allocation8 + $0x918] sm:$0xff]  ;;  %v2869_v31 = vld [vmem:[#allocation8 + $0xb70] sm:$0xff] }
 0x2c0   :  { %3339 = vmatpush.msra.mxu0 %v2774_v59  ;;  %3359 = vmatpush.msra.mxu1 %v2790_v60  ;;  %v2810_v59 = vld [vmem:[#allocation8 + $0x998] sm:$0xff]  ;;  %v1929_v60 = vadd.f32 %v1928_v50, %v1145_v46  ;;  %v2849_v42 = vld [vmem:[#allocation8 + $0xad0] sm:$0xff]  ;;  %v2848_v46 = vld [vmem:[#allocation8 + $0xac8] sm:$0xff] }
 0x2c1   :  { %3379 = vmatpush.msra.mxu2 %v2806_v61  ;;  %3399 = vmatpush.msra.mxu3 %v2822_v62  ;;  %v1969_v61 = vadd.f32 %v1968_v51, %v1146_v47  ;;  %v2761_v62 = vld [vmem:[#allocation8 + $0x810] sm:$0xff]  ;;  %v2864_v47 = vld [vmem:[#allocation8 + $0xb48] sm:$0xff]  ;;  %v2847_v50 = vld [vmem:[#allocation8 + $0xac0] sm:$0xff]  ;;  %v2008_v51 = vpop.f32.mrf.mxu0 }
 0x2c2   :  { %3340 = vmatpush.msra.mxu0 %v2773_v63  ;;  %3360 = vmatpush.msra.mxu1 %v2789_v2  ;;  %v2777_v63 = vld [vmem:[#allocation8 + $0x890] sm:$0xff]  ;;  %v1948_v2 = vpop.f32.mrf.mxu1 }
 0x2c3   :  { %3380 = vmatpush.msra.mxu2 %v2805_v3  ;;  %3400 = vmatpush.msra.mxu3 %v2821_v5  ;;  %v1988_v3 = vpop.f32.mrf.mxu3  ;;  %v2793_v5 = vld [vmem:[#allocation8 + $0x910] sm:$0xff] }
 0x2c4   :  { %3341 = vmatpush.msra.mxu0 %v2772_v6  ;;  %3361 = vmatpush.msra.mxu1 %v2788_v7  ;;  %v2809_v6 = vld [vmem:[#allocation8 + $0x990] sm:$0xff]  ;;  %v2760_v7 = vld [vmem:[#allocation8 + $0x808] sm:$0xff] }
 0x2c5   :  { %3381 = vmatpush.msra.mxu2 %v2804_v8  ;;  %3401 = vmatpush.msra.mxu3 %v2820_v9  ;;  %v2776_v8 = vld [vmem:[#allocation8 + $0x888] sm:$0xff]  ;;  %v1869_v9 = vadd.f32 %v1868_v38, %v1849_v56  ;;  %v2883_v38 = vld [vmem:[#allocation8 + $0xbe0] sm:$0xff]  ;;  %v2865_v43 = vld [vmem:[#allocation8 + $0xb50] sm:$0xff] }
 0x2c6   :  { %3342 = vmatpush.msra.mxu0 %v2771_v12  ;;  %3362 = vmatpush.msra.mxu1 %v2787_v13  ;;  %v1909_v12 = vadd.f32 %v1908_v39, %v1889_v57  ;;  %v2792_v13 = vld [vmem:[#allocation8 + $0x908] sm:$0xff]  ;;  %v2834_v39 = vld [vmem:[#allocation8 + $0xa58] sm:$0xff] }
 0x2c7   :  { %3382 = vmatpush.msra.mxu2 %v2803_v14  ;;  %3402 = vmatpush.msra.mxu3 %v2819_v15  ;;  %v2808_v14 = vld [vmem:[#allocation8 + $0x988] sm:$0xff]  ;;  %v1949_v15 = vadd.f32 %v1948_v2, %v1929_v60  ;;  %v2846_v56 = vld [vmem:[#allocation8 + $0xab8] sm:$0xff]  ;;  %v2845_v60 = vld [vmem:[#allocation8 + $0xab0] sm:$0xff] }
 0x2c8   :  { %3343 = vmatpush.msra.mxu0 %v2770_v16  ;;  %3363 = vmatpush.msra.mxu1 %v2786_v17  ;;  %v1989_v16 = vadd.f32 %v1988_v3, %v1969_v61  ;;  %v2759_v17 = vld [vmem:[#allocation8 + $0x800] sm:$0xff]  ;;  %v2862_v57 = vld [vmem:[#allocation8 + $0xb38] sm:$0xff]  ;;  %v2877_v2 = vld [vmem:[#allocation8 + $0xbb0] sm:$0xff] }
 0x2c9   :  { %3383 = vmatpush.msra.mxu2 %v2802_v20  ;;  %3403 = vmatpush.msra.mxu3 %v2818_v0  ;;  %v2775_v20 = vld [vmem:[#allocation8 + $0x880] sm:$0xff]  ;;  %v2828_v3 = vld [vmem:[#allocation8 + $0xa28] sm:$0xff] }
 0x2ca   :  { %3344 = vmatpush.msra.mxu0 %v2769_v1  ;;  %3364 = vmatpush.msra.mxu1 %v2785_v21  ;;  %v2791_v0 = vld [vmem:[#allocation8 + $0x900] sm:$0xff]  ;;  %v2487_v21 = vmax.f32 %v1869_v9, 0.0  ;;  %v2028_v61 = vpop.f32.mrf.mxu1  ;;  %v2876_v9 = vld [vmem:[#allocation8 + $0xba8] sm:$0xff] }
 0x2cb   :  { %3384 = vmatpush.msra.mxu2 %v2801_v22  ;;  %3404 = vmatpush.msra.mxu3 %v2817_v23  ;;  %v2807_v1 = vld [vmem:[#allocation8 + $0x980] sm:$0xff]  ;;  %v2488_v22 = vmax.f32 %v1909_v12, 0.0  ;;  %v2489_v23 = vmax.f32 %v1949_v15, 0.0  ;;  %v1149_v12 = vperm.slane %v4003_v36, 6 }
 0x2cc   :  { %3345 = vmatpush.msra.mxu0 %v2768_v26  ;;  %3365 = vmatpush.msra.mxu1 %v2784_v10  ;;  %v2490_v26 = vmax.f32 %v1989_v16, 0.0  ;;  %v2838_v10 = vld [vmem:[#allocation8 + $0xa78] sm:$0xff]  ;;  %v2843_v15 = vld [vmem:[#allocation8 + $0xaa0] sm:$0xff]  ;;  %v2088_v16 = vpop.f32.mrf.mxu0 }
 0x2cd   :  { %3385 = vmatpush.msra.mxu2 %v2800_v11  ;;  %3405 = vmatpush.msra.mxu3 %v2816_v27  ;;  %v2854_v11 = vld [vmem:[#allocation8 + $0xaf8] sm:$0xff] }
 0x2ce   :  { %3346 = vmatpush.msra.mxu0 %v2767_v28  ;;  %3366 = vmatpush.msra.mxu1 %v2783_v29  ;;  %v2870_v27 = vld [vmem:[#allocation8 + $0xb78] sm:$0xff]  ;;  %v2837_v29 = vld [vmem:[#allocation8 + $0xa70] sm:$0xff] }
 0x2cf   :  { %3386 = vmatpush.msra.mxu2 %v2799_v32  ;;  %3406 = vmatpush.msra.mxu3 %v2815_v18  ;;  %v2886_v28 = vld [vmem:[#allocation8 + $0xbf8] sm:$0xff]  ;;  %v2885_v32 = vld [vmem:[#allocation8 + $0xbf0] sm:$0xff]  ;;  %v2836_v18 = vld [vmem:[#allocation8 + $0xa68] sm:$0xff] }
 0x2d0   :  { %3347 = vmatpush.msra.mxu0 %v2766_v19  ;;  %3367 = vmatpush.msra.mxu1 %v2782_v33  ;;  %v2852_v19 = vld [vmem:[#allocation8 + $0xae8] sm:$0xff] }
 0x2d1   :  { %3387 = vmatpush.msra.mxu2 %v2798_v34  ;;  %3407 = vmatpush.msra.mxu3 %v2814_v35  ;;  %v2868_v33 = vld [vmem:[#allocation8 + $0xb68] sm:$0xff]  ;;  %v2835_v35 = vld [vmem:[#allocation8 + $0xa60] sm:$0xff] }
 0x2d2   :  { %3348 = vmatpush.msra.mxu0 %v2765_v48  ;;  %3368 = vmatpush.msra.mxu1 %v2781_v37  ;;  %v2884_v34 = vld [vmem:[#allocation8 + $0xbe8] sm:$0xff]  ;;  %v2851_v48 = vld [vmem:[#allocation8 + $0xae0] sm:$0xff] }
 0x2d3   :  { %3388 = vmatpush.msra.mxu2 %v2797_v24  ;;  %3408 = vmatpush.msra.mxu3 %v2813_v40  ;;  %v2867_v37 = vld [vmem:[#allocation8 + $0xb60] sm:$0xff]  ;;  %v2850_v24 = vld [vmem:[#allocation8 + $0xad8] sm:$0xff] }
 0x2d4   :  { %3349 = vmatpush.msra.mxu0 %v2764_v25  ;;  %3369 = vmatpush.msra.mxu1 %v2780_v41  ;;  %v2866_v40 = vld [vmem:[#allocation8 + $0xb58] sm:$0xff]  ;;  %v2833_v41 = vld [vmem:[#allocation8 + $0xa50] sm:$0xff] }
 0x2d5   :  { %3389 = vmatpush.msra.mxu2 %v2796_v44  ;;  %3409 = vmatpush.msra.mxu3 %v2812_v45  ;;  %v2882_v25 = vld [vmem:[#allocation8 + $0xbd8] sm:$0xff]  ;;  %v2881_v44 = vld [vmem:[#allocation8 + $0xbd0] sm:$0xff]  ;;  %v2832_v45 = vld [vmem:[#allocation8 + $0xa48] sm:$0xff] }
 0x2d6   :  { %3350 = vmatpush.msra.mxu0 %v2763_v4  ;;  %3370 = vmatpush.msra.mxu1 %v2779_v49  ;;  %v2880_v4 = vld [vmem:[#allocation8 + $0xbc8] sm:$0xff]  ;;  %v2831_v49 = vld [vmem:[#allocation8 + $0xa40] sm:$0xff] }
 0x2d7   :  { %3390 = vmatpush.msra.mxu2 %v2795_v52  ;;  %3410 = vmatpush.msra.mxu3 %v2811_v53  ;;  %v2048_v52 = vpop.f32.mrf.mxu2  ;;  %v2863_v53 = vld [vmem:[#allocation8 + $0xb40] sm:$0xff] }
 0x2d8   :  { %3351 = vmatpush.msra.mxu0 %v2762_v54  ;;  %3371 = vmatpush.msra.mxu1 %v2778_v55  ;;  %v2879_v54 = vld [vmem:[#allocation8 + $0xbc0] sm:$0xff]  ;;  %v2830_v55 = vld [vmem:[#allocation8 + $0xa38] sm:$0xff] }
 0x2d9   :  { %3391 = vmatpush.msra.mxu2 %v2794_v58  ;;  %3411 = vmatpush.msra.mxu3 %v2810_v59  ;;  %v2878_v58 = vld [vmem:[#allocation8 + $0xbb8] sm:$0xff]  ;;  %v2829_v59 = vld [vmem:[#allocation8 + $0xa30] sm:$0xff] }
 0x2da   :  { %3352 = vmatpush.msra.mxu0 %v2761_v62  ;;  %3372 = vmatpush.msra.mxu1 %v2777_v63  ;;  %v2068_v62 = vpop.f32.mrf.mxu3  ;;  %v2861_v63 = vld [vmem:[#allocation8 + $0xb30] sm:$0xff] }
 0x2db   :  { %3392 = vmatpush.msra.mxu2 %v2793_v5  ;;  %3412 = vmatpush.msra.mxu3 %v2809_v6  ;;  %v2844_v5 = vld [vmem:[#allocation8 + $0xaa8] sm:$0xff]  ;;  %v1147_v6 = vperm.slane %v4003_v36, 4 }
 0x2dc   :  { %3353 = vmatpush.msra.mxu0 %v2760_v7  ;;  %3373 = vmatpush.msra.mxu1 %v2776_v8  ;;  %v1148_v7 = vperm.slane %v4003_v36, 5  ;;  %v2860_v8 = vld [vmem:[#allocation8 + $0xb28] sm:$0xff] }
 0x2dd   :  { %3393 = vmatpush.msra.mxu2 %v2792_v13  ;;  %3413 = vmatpush.msra.mxu3 %v2808_v14  ;;  %v1150_v13 = vperm.slane %v4003_v36, 7  ;;  %v2827_v14 = vld [vmem:[#allocation8 + $0xa20] sm:$0xff]  ;;  %v2874_v36 = vld [vmem:[#allocation8 + $0xb98] sm:$0xff] }
 0x2de   :  { %3354 = vmatpush.msra.mxu0 %v2759_v17  ;;  %3374 = vmatpush.msra.mxu1 %v2775_v20  ;;  %v2859_v20 = vld [vmem:[#allocation8 + $0xb20] sm:$0xff] }
 0x2df   :  { %3394 = vmatpush.msra.mxu2 %v2791_v0  ;;  %3414 = vmatpush.msra.mxu3 %v2807_v1  ;;  %v2128_v17 = vpop.f32.mrf.mxu2  ;;  %v2875_v0 = vld [vmem:[#allocation8 + $0xba0] sm:$0xff]  ;;  %v2826_v1 = vld [vmem:[#allocation8 + $0xa18] sm:$0xff] }
 0x2e0   :  { %3355 = vmatmul.f32.vlgmr.msra.gmra.mxu0 %v2487_v21  ;;  %3375 = vmatmul.f32.vlgmr.msra.gmra.mxu1 %v2488_v22  ;;  %v2842_v21 = vld [vmem:[#allocation8 + $0xa98] sm:$0xff]  ;;  %v2009_v22 = vadd.f32 %v2008_v51, %v1147_v6  ;;  %v2933_v51 = vld [vmem:[#allocation8 + $0xd70] sm:$0xff] }
 0x2e1   :  { %3395 = vmatmul.f32.vlgmr.msra.gmra.mxu2 %v2489_v23  ;;  %3415 = vmatmul.f32.vlgmr.msra.gmra.mxu3 %v2490_v26  ;;  %v2049_v23 = vadd.f32 %v2048_v52, %v1148_v7  ;;  %v2858_v26 = vld [vmem:[#allocation8 + $0xb18] sm:$0xff]  ;;  %v2949_v52 = vld [vmem:[#allocation8 + $0xdf0] sm:$0xff] }
 0x2e2   :  { %3419 = vmatpush.msrb.mxu0 %v2838_v10  ;;  %3439 = vmatpush.msrb.mxu1 %v2854_v11  ;;  %v2089_v10 = vadd.f32 %v2088_v16, %v1149_v12  ;;  %v2129_v11 = vadd.f32 %v2128_v17, %v1150_v13  ;;  %v2929_v6 = vld [vmem:[#allocation8 + $0xd50] sm:$0xff]  ;;  %v2928_v12 = vld [vmem:[#allocation8 + $0xd48] sm:$0xff]  ;;  %v2168_v16 = vpop.f32.mrf.mxu0 }
 0x2e3   :  { %3459 = vmatpush.msrb.mxu2 %v2870_v27  ;;  %3479 = vmatpush.msrb.mxu3 %v2886_v28  ;;  %v2825_v27 = vld [vmem:[#allocation8 + $0xa10] sm:$0xff]  ;;  %v2944_v13 = vld [vmem:[#allocation8 + $0xdc8] sm:$0xff] }
 0x2e4   :  { %3420 = vmatpush.msrb.mxu0 %v2837_v29  ;;  %3440 = vmatpush.msrb.mxu1 %v2853_v30  ;;  %v2841_v28 = vld [vmem:[#allocation8 + $0xa90] sm:$0xff]  ;;  %v2108_v29 = vpop.f32.mrf.mxu1  ;;  %v2148_v30 = vpop.f32.mrf.mxu3 }
 0x2e5   :  { %3460 = vmatpush.msrb.mxu2 %v2869_v31  ;;  %3480 = vmatpush.msrb.mxu3 %v2885_v32  ;;  %v2857_v31 = vld [vmem:[#allocation8 + $0xb10] sm:$0xff] }
 0x2e6   :  { %3421 = vmatpush.msrb.mxu0 %v2836_v18  ;;  %3441 = vmatpush.msrb.mxu1 %v2852_v19  ;;  %v2873_v32 = vld [vmem:[#allocation8 + $0xb90] sm:$0xff]  ;;  %v2824_v18 = vld [vmem:[#allocation8 + $0xa08] sm:$0xff] }
 0x2e7   :  { %3461 = vmatpush.msrb.mxu2 %v2868_v33  ;;  %3481 = vmatpush.msrb.mxu3 %v2884_v34  ;;  %v2840_v19 = vld [vmem:[#allocation8 + $0xa88] sm:$0xff]  ;;  %v2029_v33 = vadd.f32 %v2028_v61, %v2009_v22  ;;  %v2069_v34 = vadd.f32 %v2068_v62, %v2049_v23  ;;  %v2898_v61 = vld [vmem:[#allocation8 + $0xc58] sm:$0xff]  ;;  %v2945_v7 = vld [vmem:[#allocation8 + $0xdd0] sm:$0xff]  ;;  %v2208_v17 = vpop.f32.mrf.mxu2 }
 0x2e8   :  { %3422 = vmatpush.msrb.mxu0 %v2835_v35  ;;  %3442 = vmatpush.msrb.mxu1 %v2851_v48  ;;  %v2856_v35 = vld [vmem:[#allocation8 + $0xb08] sm:$0xff]  ;;  %v2914_v62 = vld [vmem:[#allocation8 + $0xcd8] sm:$0xff] }
 0x2e9   :  { %3462 = vmatpush.msrb.mxu2 %v2867_v37  ;;  %3482 = vmatpush.msrb.mxu3 %v2883_v38  ;;  %v2872_v48 = vld [vmem:[#allocation8 + $0xb88] sm:$0xff]  ;;  %v2109_v37 = vadd.f32 %v2108_v29, %v2089_v10  ;;  %v2149_v38 = vadd.f32 %v2148_v30, %v2129_v11  ;;  %v2926_v22 = vld [vmem:[#allocation8 + $0xd38] sm:$0xff]  ;;  %v2909_v10 = vld [vmem:[#allocation8 + $0xcb0] sm:$0xff] }
 0x2ea   :  { %3423 = vmatpush.msrb.mxu0 %v2834_v39  ;;  %3443 = vmatpush.msrb.mxu1 %v2850_v24  ;;  %v2823_v39 = vld [vmem:[#allocation8 + $0xa00] sm:$0xff]  ;;  %v2942_v23 = vld [vmem:[#allocation8 + $0xdb8] sm:$0xff]  ;;  %v2941_v29 = vld [vmem:[#allocation8 + $0xdb0] sm:$0xff] }
 0x2eb   :  { %3463 = vmatpush.msrb.mxu2 %v2866_v40  ;;  %3483 = vmatpush.msrb.mxu3 %v2882_v25  ;;  %v2839_v24 = vld [vmem:[#allocation8 + $0xa80] sm:$0xff]  ;;  %v2892_v30 = vld [vmem:[#allocation8 + $0xc28] sm:$0xff] }
 0x2ec   :  { %3424 = vmatpush.msrb.mxu0 %v2833_v41  ;;  %3444 = vmatpush.msrb.mxu1 %v2849_v42  ;;  %v2855_v40 = vld [vmem:[#allocation8 + $0xb00] sm:$0xff]  ;;  %v2491_v41 = vmax.f32 %v2029_v33, 0.0  ;;  %v2492_v42 = vmax.f32 %v2069_v34, 0.0  ;;  %v2188_v11 = vpop.f32.mrf.mxu1  ;;  %v2940_v33 = vld [vmem:[#allocation8 + $0xda8] sm:$0xff] }
 0x2ed   :  { %3464 = vmatpush.msrb.mxu2 %v2865_v43  ;;  %3484 = vmatpush.msrb.mxu3 %v2881_v44  ;;  %v2871_v25 = vld [vmem:[#allocation8 + $0xb80] sm:$0xff]  ;;  %v2493_v43 = vmax.f32 %v2109_v37, 0.0  ;;  %v2494_v44 = vmax.f32 %v2149_v38, 0.0  ;;  %v2248_v38 = vpop.f32.mrf.mxu0 }
 0x2ee   :  { %3425 = vmatpush.msrb.mxu0 %v2832_v45  ;;  %3445 = vmatpush.msrb.mxu1 %v2848_v46  ;;  %v2902_v45 = vld [vmem:[#allocation8 + $0xc78] sm:$0xff]  ;;  %v2907_v37 = vld [vmem:[#allocation8 + $0xca0] sm:$0xff] }
 0x2ef   :  { %3465 = vmatpush.msrb.mxu2 %v2864_v47  ;;  %3485 = vmatpush.msrb.mxu3 %v2880_v4  ;;  %v2918_v46 = vld [vmem:[#allocation8 + $0xcf8] sm:$0xff] }
 0x2f0   :  { %3426 = vmatpush.msrb.mxu0 %v2831_v49  ;;  %3446 = vmatpush.msrb.mxu1 %v2847_v50  ;;  %v2934_v47 = vld [vmem:[#allocation8 + $0xd78] sm:$0xff]  ;;  %v2901_v49 = vld [vmem:[#allocation8 + $0xc70] sm:$0xff] }
 0x2f1   :  { %3466 = vmatpush.msrb.mxu2 %v2863_v53  ;;  %3486 = vmatpush.msrb.mxu3 %v2879_v54  ;;  %v2950_v4 = vld [vmem:[#allocation8 + $0xdf8] sm:$0xff]  ;;  %v2917_v50 = vld [vmem:[#allocation8 + $0xcf0] sm:$0xff]  ;;  %v2900_v53 = vld [vmem:[#allocation8 + $0xc68] sm:$0xff] }
 0x2f2   :  { %3427 = vmatpush.msrb.mxu0 %v2830_v55  ;;  %3447 = vmatpush.msrb.mxu1 %v2846_v56  ;;  %v2916_v54 = vld [vmem:[#allocation8 + $0xce8] sm:$0xff] }
 0x2f3   :  { %3467 = vmatpush.msrb.mxu2 %v2862_v57  ;;  %3487 = vmatpush.msrb.mxu3 %v2878_v58  ;;  %v2932_v55 = vld [vmem:[#allocation8 + $0xd68] sm:$0xff]  ;;  %v2899_v57 = vld [vmem:[#allocation8 + $0xc60] sm:$0xff] }
 0x2f4   :  { %3428 = vmatpush.msrb.mxu0 %v2829_v59  ;;  %3448 = vmatpush.msrb.mxu1 %v2845_v60  ;;  %v2948_v56 = vld [vmem:[#allocation8 + $0xde8] sm:$0xff]  ;;  %v2915_v58 = vld [vmem:[#allocation8 + $0xce0] sm:$0xff] }
 0x2f5   :  { %3468 = vmatpush.msrb.mxu2 %v2861_v63  ;;  %3488 = vmatpush.msrb.mxu3 %v2877_v2  ;;  %v2931_v59 = vld [vmem:[#allocation8 + $0xd60] sm:$0xff]  ;;  %v2930_v63 = vld [vmem:[#allocation8 + $0xd58] sm:$0xff] }
 0x2f6   :  { %3429 = vmatpush.msrb.mxu0 %v2828_v3  ;;  %3449 = vmatpush.msrb.mxu1 %v2844_v5  ;;  %v2947_v60 = vld [vmem:[#allocation8 + $0xde0] sm:$0xff]  ;;  %v2946_v2 = vld [vmem:[#allocation8 + $0xdd8] sm:$0xff]  ;;  %v2897_v3 = vld [vmem:[#allocation8 + $0xc50] sm:$0xff] }
 0x2f7   :  { %3469 = vmatpush.msrb.mxu2 %v2860_v8  ;;  %3489 = vmatpush.msrb.mxu3 %v2876_v9  ;;  %v2913_v5 = vld [vmem:[#allocation8 + $0xcd0] sm:$0xff]  ;;  %v2896_v8 = vld [vmem:[#allocation8 + $0xc48] sm:$0xff] }
 0x2f8   :  { %3430 = vmatpush.msrb.mxu0 %v2827_v14  ;;  %3450 = vmatpush.msrb.mxu1 %v2843_v15  ;;  %v2912_v9 = vld [vmem:[#allocation8 + $0xcc8] sm:$0xff]  ;;  %v2895_v14 = vld [vmem:[#allocation8 + $0xc40] sm:$0xff] }
 0x2f9   :  { %3470 = vmatpush.msrb.mxu2 %v2859_v20  ;;  %3490 = vmatpush.msrb.mxu3 %v2875_v0  ;;  %v2911_v15 = vld [vmem:[#allocation8 + $0xcc0] sm:$0xff] }
 0x2fa   :  { %3431 = vmatpush.msrb.mxu0 %v2826_v1  ;;  %3451 = vmatpush.msrb.mxu1 %v2842_v21  ;;  %v2927_v20 = vld [vmem:[#allocation8 + $0xd40] sm:$0xff]  ;;  %v2894_v1 = vld [vmem:[#allocation8 + $0xc38] sm:$0xff] }
 0x2fb   :  { %3471 = vmatpush.msrb.mxu2 %v2858_v26  ;;  %3491 = vmatpush.msrb.mxu3 %v2874_v36  ;;  %v2943_v0 = vld [vmem:[#allocation8 + $0xdc0] sm:$0xff]  ;;  %v2910_v21 = vld [vmem:[#allocation8 + $0xcb8] sm:$0xff]  ;;  %v2893_v36 = vld [vmem:[#allocation8 + $0xc30] sm:$0xff] }
 0x2fc   :  { %3432 = vmatpush.msrb.mxu0 %v2825_v27  ;;  %3452 = vmatpush.msrb.mxu1 %v2841_v28  ;;  %v4013_v26 = vld [vmem:[#allocation7 + $0x18] sm:$0xff]  ;;  %v2228_v27 = vpop.f32.mrf.mxu3  ;;  %v2925_v28 = vld [vmem:[#allocation8 + $0xd30] sm:$0xff] }
 0x2fd   :  { %3472 = vmatpush.msrb.mxu2 %v2857_v31  ;;  %3492 = vmatpush.msrb.mxu3 %v2873_v32  ;;  %v2908_v31 = vld [vmem:[#allocation8 + $0xca8] sm:$0xff]  ;;  %v1151_v32 = vperm.slane %v4013_v26, 0  ;;  %v1153_v34 = vperm.slane %v4013_v26, 2 }
 0x2fe   :  { %3433 = vmatpush.msrb.mxu0 %v2824_v18  ;;  %3453 = vmatpush.msrb.mxu1 %v2840_v19  ;;  %v1152_v18 = vperm.slane %v4013_v26, 1  ;;  %v2924_v19 = vld [vmem:[#allocation8 + $0xd28] sm:$0xff] }
 0x2ff   :  { %3473 = vmatpush.msrb.mxu2 %v2856_v35  ;;  %3493 = vmatpush.msrb.mxu3 %v2872_v48  ;;  %v1154_v35 = vperm.slane %v4013_v26, 3  ;;  %v2891_v48 = vld [vmem:[#allocation8 + $0xc20] sm:$0xff] }
 0x300   :  { %3434 = vmatpush.msrb.mxu0 %v2823_v39  ;;  %3454 = vmatpush.msrb.mxu1 %v2839_v24  ;;  %v2288_v39 = vpop.f32.mrf.mxu2  ;;  %v2923_v24 = vld [vmem:[#allocation8 + $0xd20] sm:$0xff] }
 0x301   :  { %3474 = vmatpush.msrb.mxu2 %v2855_v40  ;;  %3494 = vmatpush.msrb.mxu3 %v2871_v25  ;;  %v2939_v40 = vld [vmem:[#allocation8 + $0xda0] sm:$0xff]  ;;  %v2890_v25 = vld [vmem:[#allocation8 + $0xc18] sm:$0xff] }
 0x302   :  { %3435 = vmatmul.f32.vlgmr.msrb.gmra.mxu0 %v2491_v41  ;;  %3455 = vmatmul.f32.vlgmr.msrb.gmra.mxu1 %v2492_v42  ;;  %v2906_v41 = vld [vmem:[#allocation8 + $0xc98] sm:$0xff]  ;;  %v2169_v42 = vadd.f32 %v2168_v16, %v1151_v32  ;;  %v2981_v16 = vld [vmem:[#allocation8 + $0xef0] sm:$0xff] }
 0x303   :  { %3475 = vmatmul.f32.vlgmr.msrb.gmra.mxu2 %v2493_v43  ;;  %3495 = vmatmul.f32.vlgmr.msrb.gmra.mxu3 %v2494_v44  ;;  %v2209_v43 = vadd.f32 %v2208_v17, %v1152_v18  ;;  %v2922_v44 = vld [vmem:[#allocation8 + $0xd18] sm:$0xff]  ;;  %v2997_v17 = vld [vmem:[#allocation8 + $0xf70] sm:$0xff] }
 0x304   :  { %3499 = vmatpush.msra.mxu0 %v2902_v45  ;;  %3519 = vmatpush.msra.mxu1 %v2918_v46  ;;  %v2938_v45 = vld [vmem:[#allocation8 + $0xd98] sm:$0xff]  ;;  %v2249_v46 = vadd.f32 %v2248_v38, %v1153_v34  ;;  %v2977_v32 = vld [vmem:[#allocation8 + $0xed0] sm:$0xff]  ;;  %v2976_v34 = vld [vmem:[#allocation8 + $0xec8] sm:$0xff] }
 0x305   :  { %3539 = vmatpush.msra.mxu2 %v2934_v47  ;;  %3559 = vmatpush.msra.mxu3 %v2950_v4  ;;  %v2289_v47 = vadd.f32 %v2288_v39, %v1154_v35  ;;  %v2889_v4 = vld [vmem:[#allocation8 + $0xc10] sm:$0xff]  ;;  %v2992_v35 = vld [vmem:[#allocation8 + $0xf48] sm:$0xff]  ;;  %v2975_v38 = vld [vmem:[#allocation8 + $0xec0] sm:$0xff] }
 0x306   :  { %3500 = vmatpush.msra.mxu0 %v2901_v49  ;;  %3520 = vmatpush.msra.mxu1 %v2917_v50  ;;  %v2905_v49 = vld [vmem:[#allocation8 + $0xc90] sm:$0xff]  ;;  %v2268_v50 = vpop.f32.mrf.mxu1  ;;  %v2991_v39 = vld [vmem:[#allocation8 + $0xf40] sm:$0xff] }
 0x307   :  { %3540 = vmatpush.msra.mxu2 %v2933_v51  ;;  %3560 = vmatpush.msra.mxu3 %v2949_v52  ;;  %v2308_v51 = vpop.f32.mrf.mxu3  ;;  %v2921_v52 = vld [vmem:[#allocation8 + $0xd10] sm:$0xff] }
 0x308   :  { %3501 = vmatpush.msra.mxu0 %v2900_v53  ;;  %3521 = vmatpush.msra.mxu1 %v2916_v54  ;;  %v2937_v53 = vld [vmem:[#allocation8 + $0xd90] sm:$0xff]  ;;  %v2888_v54 = vld [vmem:[#allocation8 + $0xc08] sm:$0xff] }
 0x309   :  { %3541 = vmatpush.msra.mxu2 %v2932_v55  ;;  %3561 = vmatpush.msra.mxu3 %v2948_v56  ;;  %v2904_v55 = vld [vmem:[#allocation8 + $0xc88] sm:$0xff]  ;;  %v2189_v56 = vadd.f32 %v2188_v11, %v2169_v42  ;;  %v3011_v11 = vld [vmem:[#allocation8 + $0xfe0] sm:$0xff]  ;;  %v2993_v18 = vld [vmem:[#allocation8 + $0xf50] sm:$0xff]  ;;  %v2368_v42 = vpop.f32.mrf.mxu2 }
 0x30a   :  { %3502 = vmatpush.msra.mxu0 %v2899_v57  ;;  %3522 = vmatpush.msra.mxu1 %v2915_v58  ;;  %v2229_v57 = vadd.f32 %v2228_v27, %v2209_v43  ;;  %v2920_v58 = vld [vmem:[#allocation8 + $0xd08] sm:$0xff]  ;;  %v2962_v27 = vld [vmem:[#allocation8 + $0xe58] sm:$0xff] }
 0x30b   :  { %3542 = vmatpush.msra.mxu2 %v2931_v59  ;;  %3562 = vmatpush.msra.mxu3 %v2947_v60  ;;  %v2936_v59 = vld [vmem:[#allocation8 + $0xd88] sm:$0xff]  ;;  %v2269_v60 = vadd.f32 %v2268_v50, %v2249_v46  ;;  %v2990_v43 = vld [vmem:[#allocation8 + $0xf38] sm:$0xff]  ;;  %v2973_v46 = vld [vmem:[#allocation8 + $0xeb0] sm:$0xff] }
 0x30c   :  { %3503 = vmatpush.msra.mxu0 %v2898_v61  ;;  %3523 = vmatpush.msra.mxu1 %v2914_v62  ;;  %v2309_v61 = vadd.f32 %v2308_v51, %v2289_v47  ;;  %v2887_v62 = vld [vmem:[#allocation8 + $0xc00] sm:$0xff]  ;;  %v2989_v47 = vld [vmem:[#allocation8 + $0xf30] sm:$0xff]  ;;  %v2972_v50 = vld [vmem:[#allocation8 + $0xea8] sm:$0xff]  ;;  %v1155_v51 = vperm.slane %v4013_v26, 4 }
 0x30d   :  { %3543 = vmatpush.msra.mxu2 %v2930_v63  ;;  %3563 = vmatpush.msra.mxu3 %v2946_v2  ;;  %v2903_v63 = vld [vmem:[#allocation8 + $0xc80] sm:$0xff] }
 0x30e   :  { %3504 = vmatpush.msra.mxu0 %v2897_v3  ;;  %3524 = vmatpush.msra.mxu1 %v2913_v5  ;;  %v2919_v2 = vld [vmem:[#allocation8 + $0xd00] sm:$0xff]  ;;  %v2495_v5 = vmax.f32 %v2189_v56, 0.0  ;;  %v3004_v56 = vld [vmem:[#allocation8 + $0xfa8] sm:$0xff] }
 0x30f   :  { %3544 = vmatpush.msra.mxu2 %v2929_v6  ;;  %3564 = vmatpush.msra.mxu3 %v2945_v7  ;;  %v2935_v3 = vld [vmem:[#allocation8 + $0xd80] sm:$0xff]  ;;  %v2496_v6 = vmax.f32 %v2229_v57, 0.0  ;;  %v2497_v7 = vmax.f32 %v2269_v60, 0.0  ;;  %v1157_v57 = vperm.slane %v4013_v26, 6 }
 0x310   :  { %3505 = vmatpush.msra.mxu0 %v2896_v8  ;;  %3525 = vmatpush.msra.mxu1 %v2912_v9  ;;  %v2498_v8 = vmax.f32 %v2309_v61, 0.0  ;;  %v2966_v9 = vld [vmem:[#allocation8 + $0xe78] sm:$0xff]  ;;  %v2971_v60 = vld [vmem:[#allocation8 + $0xea0] sm:$0xff] }
 0x311   :  { %3545 = vmatpush.msra.mxu2 %v2928_v12  ;;  %3565 = vmatpush.msra.mxu3 %v2944_v13  ;;  %v2982_v12 = vld [vmem:[#allocation8 + $0xef8] sm:$0xff]  ;;  %v2987_v61 = vld [vmem:[#allocation8 + $0xf20] sm:$0xff] }
 0x312   :  { %3506 = vmatpush.msra.mxu0 %v2895_v14  ;;  %3526 = vmatpush.msra.mxu1 %v2911_v15  ;;  %v2998_v13 = vld [vmem:[#allocation8 + $0xf78] sm:$0xff]  ;;  %v2965_v15 = vld [vmem:[#allocation8 + $0xe70] sm:$0xff] }
 0x313   :  { %3546 = vmatpush.msra.mxu2 %v2927_v20  ;;  %3566 = vmatpush.msra.mxu3 %v2943_v0  ;;  %v3014_v14 = vld [vmem:[#allocation8 + $0xff8] sm:$0xff]  ;;  %v3013_v20 = vld [vmem:[#allocation8 + $0xff0] sm:$0xff]  ;;  %v2964_v0 = vld [vmem:[#allocation8 + $0xe68] sm:$0xff] }
 0x314   :  { %3507 = vmatpush.msra.mxu0 %v2894_v1  ;;  %3527 = vmatpush.msra.mxu1 %v2910_v21  ;;  %v2980_v1 = vld [vmem:[#allocation8 + $0xee8] sm:$0xff] }
 0x315   :  { %3547 = vmatpush.msra.mxu2 %v2926_v22  ;;  %3567 = vmatpush.msra.mxu3 %v2942_v23  ;;  %v2996_v21 = vld [vmem:[#allocation8 + $0xf68] sm:$0xff]  ;;  %v2963_v23 = vld [vmem:[#allocation8 + $0xe60] sm:$0xff] }
 0x316   :  { %3508 = vmatpush.msra.mxu0 %v2893_v36  ;;  %3528 = vmatpush.msra.mxu1 %v2909_v10  ;;  %v3012_v22 = vld [vmem:[#allocation8 + $0xfe8] sm:$0xff]  ;;  %v2979_v36 = vld [vmem:[#allocation8 + $0xee0] sm:$0xff] }
 0x317   :  { %3548 = vmatpush.msra.mxu2 %v2925_v28  ;;  %3568 = vmatpush.msra.mxu3 %v2941_v29  ;;  %v2995_v10 = vld [vmem:[#allocation8 + $0xf60] sm:$0xff]  ;;  %v2978_v28 = vld [vmem:[#allocation8 + $0xed8] sm:$0xff] }
 0x318   :  { %3509 = vmatpush.msra.mxu0 %v2892_v30  ;;  %3529 = vmatpush.msra.mxu1 %v2908_v31  ;;  %v2994_v29 = vld [vmem:[#allocation8 + $0xf58] sm:$0xff]  ;;  %v2961_v31 = vld [vmem:[#allocation8 + $0xe50] sm:$0xff] }
 0x319   :  { %3549 = vmatpush.msra.mxu2 %v2924_v19  ;;  %3569 = vmatpush.msra.mxu3 %v2940_v33  ;;  %v3010_v30 = vld [vmem:[#allocation8 + $0xfd8] sm:$0xff]  ;;  %v3009_v19 = vld [vmem:[#allocation8 + $0xfd0] sm:$0xff]  ;;  %v2960_v33 = vld [vmem:[#allocation8 + $0xe48] sm:$0xff] }
 0x31a   :  { %3510 = vmatpush.msra.mxu0 %v2891_v48  ;;  %3530 = vmatpush.msra.mxu1 %v2907_v37  ;;  %v3008_v48 = vld [vmem:[#allocation8 + $0xfc8] sm:$0xff]  ;;  %v2959_v37 = vld [vmem:[#allocation8 + $0xe40] sm:$0xff] }
 0x31b   :  { %3550 = vmatpush.msra.mxu2 %v2923_v24  ;;  %3570 = vmatpush.msra.mxu3 %v2939_v40  ;;  %v3007_v24 = vld [vmem:[#allocation8 + $0xfc0] sm:$0xff]  ;;  %v2958_v40 = vld [vmem:[#allocation8 + $0xe38] sm:$0xff] }
 0x31c   :  { %3511 = vmatpush.msra.mxu0 %v2890_v25  ;;  %3531 = vmatpush.msra.mxu1 %v2906_v41  ;;  %v2974_v25 = vld [vmem:[#allocation8 + $0xeb8] sm:$0xff]  ;;  %v2328_v41 = vpop.f32.mrf.mxu0 }
 0x31d   :  { %3551 = vmatpush.msra.mxu2 %v2922_v44  ;;  %3571 = vmatpush.msra.mxu3 %v2938_v45  ;;  %v3006_v44 = vld [vmem:[#allocation8 + $0xfb8] sm:$0xff]  ;;  %v2957_v45 = vld [vmem:[#allocation8 + $0xe30] sm:$0xff] }
 0x31e   :  { %3512 = vmatpush.msra.mxu0 %v2889_v4  ;;  %3532 = vmatpush.msra.mxu1 %v2905_v49  ;;  %v3005_v4 = vld [vmem:[#allocation8 + $0xfb0] sm:$0xff]  ;;  %v2956_v49 = vld [vmem:[#allocation8 + $0xe28] sm:$0xff] }
 0x31f   :  { %3552 = vmatpush.msra.mxu2 %v2921_v52  ;;  %3572 = vmatpush.msra.mxu3 %v2937_v53  ;;  %v2348_v52 = vpop.f32.mrf.mxu1  ;;  %v1156_v53 = vperm.slane %v4013_v26, 5 }
 0x320   :  { %3513 = vmatpush.msra.mxu0 %v2888_v54  ;;  %3533 = vmatpush.msra.mxu1 %v2904_v55  ;;  %v2388_v54 = vpop.f32.mrf.mxu3  ;;  %v2988_v55 = vld [vmem:[#allocation8 + $0xf28] sm:$0xff] }
 0x321   :  { %3553 = vmatpush.msra.mxu2 %v2920_v58  ;;  %3573 = vmatpush.msra.mxu3 %v2936_v59  ;;  %v1158_v58 = vperm.slane %v4013_v26, 7  ;;  %v2955_v59 = vld [vmem:[#allocation8 + $0xe20] sm:$0xff]  ;;  %v3002_v26 = vld [vmem:[#allocation8 + $0xf98] sm:$0xff] }
 0x322   :  { %3514 = vmatpush.msra.mxu0 %v2887_v62  ;;  %3534 = vmatpush.msra.mxu1 %v2903_v63  ;;  %v3003_v62 = vld [vmem:[#allocation8 + $0xfa0] sm:$0xff]  ;;  %v2954_v63 = vld [vmem:[#allocation8 + $0xe18] sm:$0xff] }
 0x323   :  { %3554 = vmatpush.msra.mxu2 %v2919_v2  ;;  %3574 = vmatpush.msra.mxu3 %v2935_v3  ;;  %v2970_v2 = vld [vmem:[#allocation8 + $0xe98] sm:$0xff]  ;;  %v2329_v3 = vadd.f32 %v2328_v41, %v1155_v51 }
 0x324   :  { %3515 = vmatmul.f32.vlgmr.msra.gmra.mxu0 %v2495_v5  ;;  %3535 = vmatmul.f32.vlgmr.msra.gmra.mxu1 %v2496_v6  ;;  %v2369_v5 = vadd.f32 %v2368_v42, %v1156_v53  ;;  %v2408_v6 = vpop.f32.mrf.mxu0 }
 0x325   :  { %3555 = vmatmul.f32.vlgmr.msra.gmra.mxu2 %v2497_v7  ;;  %3575 = vmatmul.f32.vlgmr.msra.gmra.mxu3 %v2498_v8  ;;  %v2448_v7 = vpop.f32.mrf.mxu2  ;;  %v2986_v8 = vld [vmem:[#allocation8 + $0xf18] sm:$0xff] }
 0x326   :  { %3579 = vmatpush.msrb.mxu0 %v2966_v9  ;;  %3599 = vmatpush.msrb.mxu1 %v2982_v12  ;;  %v2409_v9 = vadd.f32 %v2408_v6, %v1157_v57  ;;  %v2449_v12 = vadd.f32 %v2448_v7, %v1158_v58 }
 0x327   :  { %3619 = vmatpush.msrb.mxu2 %v2998_v13  ;;  %3639 = vmatpush.msrb.mxu3 %v3014_v14  ;;  %v2953_v13 = vld [vmem:[#allocation8 + $0xe10] sm:$0xff] }
 0x328   :  { %3580 = vmatpush.msrb.mxu0 %v2965_v15  ;;  %3600 = vmatpush.msrb.mxu1 %v2981_v16  ;;  %v2969_v14 = vld [vmem:[#allocation8 + $0xe90] sm:$0xff] }
 0x329   :  { %3620 = vmatpush.msrb.mxu2 %v2997_v17  ;;  %3640 = vmatpush.msrb.mxu3 %v3013_v20  ;;  %v2985_v15 = vld [vmem:[#allocation8 + $0xf10] sm:$0xff]  ;;  %v2952_v17 = vld [vmem:[#allocation8 + $0xe08] sm:$0xff] }
 0x32a   :  { %3581 = vmatpush.msrb.mxu0 %v2964_v0  ;;  %3601 = vmatpush.msrb.mxu1 %v2980_v1  ;;  %v3001_v16 = vld [vmem:[#allocation8 + $0xf90] sm:$0xff]  ;;  %v2968_v20 = vld [vmem:[#allocation8 + $0xe88] sm:$0xff]  ;;  %v2349_v0 = vadd.f32 %v2348_v52, %v2329_v3  ;;  %v2389_v1 = vadd.f32 %v2388_v54, %v2369_v5 }
 0x32b   :  { %3621 = vmatpush.msrb.mxu2 %v2996_v21  ;;  %3641 = vmatpush.msrb.mxu3 %v3012_v22  ;;  %v2428_v21 = vpop.f32.mrf.mxu1  ;;  %v2468_v22 = vpop.f32.mrf.mxu3 }
 0x32c   :  { %3582 = vmatpush.msrb.mxu0 %v2963_v23  ;;  %3602 = vmatpush.msrb.mxu1 %v2979_v36  ;;  %v2984_v23 = vld [vmem:[#allocation8 + $0xf08] sm:$0xff] }
 0x32d   :  { %3622 = vmatpush.msrb.mxu2 %v2995_v10  ;;  %3642 = vmatpush.msrb.mxu3 %v3011_v11  ;;  %v3000_v36 = vld [vmem:[#allocation8 + $0xf88] sm:$0xff]  ;;  %v2429_v10 = vadd.f32 %v2428_v21, %v2409_v9  ;;  %v2469_v11 = vadd.f32 %v2468_v22, %v2449_v12 }
 0x32e   :  { %3583 = vmatpush.msrb.mxu0 %v2962_v27  ;;  %3603 = vmatpush.msrb.mxu1 %v2978_v28  ;;  %v2951_v27 = vld [vmem:[#allocation8 + $0xe00] sm:$0xff] }
 0x32f   :  { %3623 = vmatpush.msrb.mxu2 %v2994_v29  ;;  %3643 = vmatpush.msrb.mxu3 %v3010_v30  ;;  %v2967_v28 = vld [vmem:[#allocation8 + $0xe80] sm:$0xff] }
 0x330   :  { %3584 = vmatpush.msrb.mxu0 %v2961_v31  ;;  %3604 = vmatpush.msrb.mxu1 %v2977_v32  ;;  %v2983_v29 = vld [vmem:[#allocation8 + $0xf00] sm:$0xff]  ;;  %v2499_v31 = vmax.f32 %v2349_v0, 0.0  ;;  %v2500_v32 = vmax.f32 %v2389_v1, 0.0 }
 0x331   :  { %3624 = vmatpush.msrb.mxu2 %v2993_v18  ;;  %3644 = vmatpush.msrb.mxu3 %v3009_v19  ;;  %v2999_v30 = vld [vmem:[#allocation8 + $0xf80] sm:$0xff]  ;;  %v2501_v18 = vmax.f32 %v2429_v10, 0.0  ;;  %v2502_v19 = vmax.f32 %v2469_v11, 0.0 }
 0x332   :  { %3585 = vmatpush.msrb.mxu0 %v2960_v33  ;;  %3605 = vmatpush.msrb.mxu1 %v2976_v34  ;;  %v3689_v33 = vld [vmem:[#allocation10] ss:$0 sm:$0xff]  ;;  %v3036_v34 = vpop.f32.mrf.mxu0 }
 0x333   :  { %3625 = vmatpush.msrb.mxu2 %v2992_v35  ;;  %3645 = vmatpush.msrb.mxu3 %v3008_v48  ;;  %v3037_v35 = vadd.f32 %v3689_v33, %v3036_v34  ;;  %v3056_v48 = vpop.f32.mrf.mxu1 }
 0x334   :  { %3586 = vmatpush.msrb.mxu0 %v2959_v37  ;;  %3606 = vmatpush.msrb.mxu1 %v2975_v38  ;;  %v3076_v37 = vpop.f32.mrf.mxu2 }
 0x335   :  { %3626 = vmatpush.msrb.mxu2 %v2991_v39  ;;  %3646 = vmatpush.msrb.mxu3 %v3007_v24  ;;  %v3057_v38 = vadd.f32 %v3056_v48, %v3037_v35  ;;  %v3096_v24 = vpop.f32.mrf.mxu3 }
 0x336   :  { %3587 = vmatpush.msrb.mxu0 %v2958_v40  ;;  %3607 = vmatpush.msrb.mxu1 %v2974_v25 }
 0x337   :  { %3627 = vmatpush.msrb.mxu2 %v2990_v43  ;;  %3647 = vmatpush.msrb.mxu3 %v3006_v44  ;;  %v3077_v39 = vadd.f32 %v3076_v37, %v3057_v38 }
 0x338   :  { %3588 = vmatpush.msrb.mxu0 %v2957_v45  ;;  %3608 = vmatpush.msrb.mxu1 %v2973_v46 }
 0x339   :  { %3628 = vmatpush.msrb.mxu2 %v2989_v47  ;;  %3648 = vmatpush.msrb.mxu3 %v3005_v4  ;;  %v3097_v25 = vadd.f32 %v3096_v24, %v3077_v39 }
 0x33a   :  { %3589 = vmatpush.msrb.mxu0 %v2956_v49  ;;  %3609 = vmatpush.msrb.mxu1 %v2972_v50  ;;  %v3116_v40 = vpop.f32.mrf.mxu0 }
 0x33b   :  { %3629 = vmatpush.msrb.mxu2 %v2988_v55  ;;  %3649 = vmatpush.msrb.mxu3 %v3004_v56  ;;  %v3117_v41 = vadd.f32 %v3116_v40, %v3097_v25  ;;  %v3136_v42 = vpop.f32.mrf.mxu1 }
 0x33c   :  { %3590 = vmatpush.msrb.mxu0 %v2955_v59  ;;  %3610 = vmatpush.msrb.mxu1 %v2971_v60  ;;  %v3156_v43 = vpop.f32.mrf.mxu2 }
 0x33d   :  { %3630 = vmatpush.msrb.mxu2 %v2987_v61  ;;  %3650 = vmatpush.msrb.mxu3 %v3003_v62  ;;  %v3137_v44 = vadd.f32 %v3136_v42, %v3117_v41  ;;  %v3176_v46 = vpop.f32.mrf.mxu3 }
 0x33e   :  { %3591 = vmatpush.msrb.mxu0 %v2954_v63  ;;  %3611 = vmatpush.msrb.mxu1 %v2970_v2 }
 0x33f   :  { %3631 = vmatpush.msrb.mxu2 %v2986_v8  ;;  %3651 = vmatpush.msrb.mxu3 %v3002_v26  ;;  %v3157_v45 = vadd.f32 %v3156_v43, %v3137_v44 }
 0x340   :  { %3592 = vmatpush.msrb.mxu0 %v2953_v13  ;;  %3612 = vmatpush.msrb.mxu1 %v2969_v14 }
 0x341   :  { %3632 = vmatpush.msrb.mxu2 %v2985_v15  ;;  %3652 = vmatpush.msrb.mxu3 %v3001_v16  ;;  %v3177_v4 = vadd.f32 %v3176_v46, %v3157_v45 }
 0x342   :  { %3593 = vmatpush.msrb.mxu0 %v2952_v17  ;;  %3613 = vmatpush.msrb.mxu1 %v2968_v20  ;;  %v3196_v47 = vpop.f32.mrf.mxu0 }
 0x343   :  { %3633 = vmatpush.msrb.mxu2 %v2984_v23  ;;  %3653 = vmatpush.msrb.mxu3 %v3000_v36  ;;  %v3197_v49 = vadd.f32 %v3196_v47, %v3177_v4  ;;  %v3216_v50 = vpop.f32.mrf.mxu1 }
 0x344   :  { %3594 = vmatpush.msrb.mxu0 %v2951_v27  ;;  %3614 = vmatpush.msrb.mxu1 %v2967_v28  ;;  %v3236_v51 = vpop.f32.mrf.mxu2 }
 0x345   :  { %3634 = vmatpush.msrb.mxu2 %v2983_v29  ;;  %3654 = vmatpush.msrb.mxu3 %v2999_v30  ;;  %v3217_v52 = vadd.f32 %v3216_v50, %v3197_v49  ;;  %v3256_v54 = vpop.f32.mrf.mxu3 }
 0x346   :  { %3595 = vmatmul.f32.vlgmr.msrb.gmra.mxu0 %v2499_v31  ;;  %3615 = vmatmul.f32.vlgmr.msrb.gmra.mxu1 %v2500_v32 }
 0x347   :  { %3635 = vmatmul.f32.vlgmr.msrb.gmra.mxu2 %v2501_v18  ;;  %3655 = vmatmul.f32.vlgmr.msrb.gmra.mxu3 %v2502_v19  ;;  %v3237_v53 = vadd.f32 %v3236_v51, %v3217_v52 }
 0x349   :  { %v3257_v56 = vadd.f32 %v3256_v54, %v3237_v53 }
 0x34a   :  { %v3276_v55 = vpop.f32.mrf.mxu0 }
 0x34b   :  { %v3277_v57 = vadd.f32 %v3276_v55, %v3257_v56  ;;  %v3296_v58 = vpop.f32.mrf.mxu1 }
 0x34c   :  { %v3316_v59 = vpop.f32.mrf.mxu2 }
 0x34d   :  { %v3297_v60 = vadd.f32 %v3296_v58, %v3277_v57  ;;  %v3336_v62 = vpop.f32.mrf.mxu3 }
 0x34f   :  { %v3317_v61 = vadd.f32 %v3316_v59, %v3297_v60 }
 0x351   :  { %v3337_v2 = vadd.f32 %v3336_v62, %v3317_v61 }
 0x35d   :  { %v3356_v63 = vpop.f32.mrf.mxu0  ;;  %v3376_v5 = vpop.f32.mrf.mxu1 }
 0x35e   :  { %v3357_v3 = vadd.f32 %v3356_v63, %v3337_v2 }
 0x360   :  { %v3377_v7 = vadd.f32 %v3376_v5, %v3357_v3 }
 0x364   :  { %v3396_v6 = vpop.f32.mrf.mxu2  ;;  %v3416_v26 = vpop.f32.mrf.mxu3 }
 0x365   :  { %v3397_v8 = vadd.f32 %v3396_v6, %v3377_v7 }
 0x367   :  { %v3417_v12 = vadd.f32 %v3416_v26, %v3397_v8 }
 0x37f   :  { %v3436_v9 = vpop.f32.mrf.mxu0  ;;  %v3456_v14 = vpop.f32.mrf.mxu1 }
 0x380   :  { %v3437_v13 = vadd.f32 %v3436_v9, %v3417_v12 }
 0x382   :  { %v3457_v16 = vadd.f32 %v3456_v14, %v3437_v13 }
 0x386   :  { %v3476_v15 = vpop.f32.mrf.mxu2  ;;  %v3496_v20 = vpop.f32.mrf.mxu3 }
 0x387   :  { %v3477_v17 = vadd.f32 %v3476_v15, %v3457_v16 }
 0x389   :  { %v3497_v1 = vadd.f32 %v3496_v20, %v3477_v17 }
 0x3a1   :  { %v3516_v0 = vpop.f32.mrf.mxu0  ;;  %v3536_v22 = vpop.f32.mrf.mxu1 }
 0x3a2   :  { %v3517_v21 = vadd.f32 %v3516_v0, %v3497_v1 }
 0x3a4   :  { %v3537_v36 = vadd.f32 %v3536_v22, %v3517_v21 }
 0x3a8   :  { %v3556_v23 = vpop.f32.mrf.mxu2  ;;  %v3576_v11 = vpop.f32.mrf.mxu3 }
 0x3a9   :  { %v3557_v10 = vadd.f32 %v3556_v23, %v3537_v36 }
 0x3ab   :  { %v3577_v27 = vadd.f32 %v3576_v11, %v3557_v10 }
 0x3c3   :  { %v3596_v28 = vpop.f32.mrf.mxu0  ;;  %v3616_v30 = vpop.f32.mrf.mxu1 }
 0x3c4   :  { %v3597_v29 = vadd.f32 %v3596_v28, %v3577_v27 }
 0x3c6   :  { %v3617_v31 = vadd.f32 %v3616_v30, %v3597_v29 }
 0x3ca   :  { %v3636_v32 = vpop.f32.mrf.mxu2  ;;  %v3656_v19 = vpop.f32.mrf.mxu3 }
 0x3cb   :  { %v3637_v18 = vadd.f32 %v3636_v32, %v3617_v31 }
 0x3cd   :  { %v3657_v33 = vadd.f32 %v3656_v19, %v3637_v18 }
 0x3cf   :  { %3659 = vst [vmem:[#allocation11] sm:$0xff] %v3657_v33 }
 0x3d0   :  { %3670 = dma.vmem_to_hbm [thread:$0]  %s3666_s4, 128, %s3668_s21, [#allocation4]  }
 0x3d1   :  { %3846 = dma.done.wait [#allocation4], 128  }
 0x3d2   :  { %3847 = vsyncadd [#allocation4], 4294967168 }
 0x3d3   :  { %3675 = vsyncpa [#allocation3], 1 }
 0x3d4   :  { %3676 = vsyncpa [#allocation6], 1 }
 0x3d5   :  { %3677 = vsyncpa [#allocation9], 1 }
 0x3d6   :  { %3678 = vsyncpa [#allocation4], 1 }

</bundles_post_ra>
